<compile_context>
chip_gen: v7x
topology: tpu7x:2x2x1
jax: 0.10.0
libtpu: 0.0.40
codegen_flags: <defaults>
</compile_context>

<pallas_src>
import functools
import math

import jax
import jax.numpy as jnp
import numpy as np
from jax import lax
from jax.experimental import pallas as pl
from jax.experimental.pallas import tpu as pltpu  # noqa: F401  (TPU backend)


# ------------------------------ fused kernel -------------------------------

def _forward_kernel(emb_ref, w_ref, v_ref, o_ref, *,
                    n_heads, e_layers, d_layers, qk_ker, d_model,
                    use_gelu, off_w, off_v, rows_enc, rows_dec):
    f32, bf16 = jnp.float32, jnp.bfloat16
    dm = d_model
    e = dm // n_heads
    scale = 1.0 / math.sqrt(e)

    def W(name):                                    # bf16 matmul operand slice
        o, r, c = off_w[name]
        return w_ref[o:o + r, :c]

    def V(name):                                    # f32 vector / mask / PE slice
        o, r, c = off_v[name]
        return v_ref[o:o + r, :c]

    def to_bf(x):
        return x.astype(bf16)

    def mm(a_bf, b_bf):                             # bf16 MXU, f32 accumulation
        return jnp.dot(a_bf, b_bf, preferred_element_type=f32)

    if use_gelu:                                    # tanh-GELU -> EUP
        c0 = math.sqrt(2.0 / math.pi)
        act = lambda x: 0.5 * x * (1.0 + jnp.tanh(c0 * (x + 0.044715 * x * x * x)))
    else:
        act = lambda x: jnp.maximum(x, 0.0)

    def layer_norm(x, g, b):
        mu = jnp.mean(x, axis=-1, keepdims=True)
        xc = x - mu
        var = jnp.mean(xc * xc, axis=-1, keepdims=True)
        return xc * lax.rsqrt(var + 1e-5) * V(g) + V(b)

    def conv_proj(x, s_names, taps, bias):
        """Causal kernel-size-K Conv1d on the batch-folded (R, Din) slab.

        Tap k uses x shifted down by s = K-1-k; the shift is a precomputed
        block-diagonal (per-batch) 0/1 matrix from the bf16 slab, so rows with
        (row mod L) < s are zeroed and batches never mix.  The K shifted copies
        are lane-concatenated and hit the MXU once against the (K*Din, Dout) taps.
        """
        xb = to_bf(x)
        parts = [to_bf(mm(W(s), xb)) for s in s_names] + [xb]
        xu = jnp.concatenate(parts, axis=-1) if len(parts) > 1 else xb
        return mm(xu, W(taps)) + V(bias)

    def mha(q, k, v, wo, bo, mask):
        """Multi-head attention on batch-folded rows, fused output projection."""
        qs = to_bf(q * scale)
        kb = to_bf(k)
        vb = to_bf(v)
        outs = []
        for h in range(n_heads):
            sl = slice(h * e, (h + 1) * e)
            s = lax.dot_general(qs[:, sl], kb[:, sl], (((1,), (1,)), ((), ())),
                                preferred_element_type=f32) + mask
            m = jnp.max(s, axis=-1, keepdims=True)
            p = jnp.exp(s - m)
            p = p * pl.reciprocal(jnp.sum(p, axis=-1, keepdims=True), approx=True)
            outs.append(mm(to_bf(p), vb[:, sl]))
        o = jnp.concatenate(outs, axis=-1)          # (R, dm)
        return mm(to_bf(o), W(wo)) + V(bo)          # single fused out-projection

    def ffn(x, w1, b1, w2, b2):
        y = act(mm(to_bf(x), W(w1)) + V(b1))
        return mm(to_bf(y), W(w2)) + V(b2)

    # Hoisted additive masks (0 / -1e30), built once on the host.
    mask_ee = V("mask_ee")
    mask_dd = V("mask_dd")
    mask_de = V("mask_de")

    shifts_e = [f"S_e{s}" for s in range(qk_ker - 1, 0, -1)]
    shifts_d = [f"S_d{s}" for s in range(qk_ker - 1, 0, -1)]

    # ------------------------------- encoder -------------------------------
    feat_e = off_w["emb_W_e"][1]
    x = mm(to_bf(emb_ref[0:rows_enc, :feat_e]), W("emb_W_e")) + V("pe_e")
    for l in range(e_layers):
        p = f"enc{l}_"
        qkv = conv_proj(x, shifts_e, p + "qkv_W", p + "qkv_b")      # (R, 3*dm)
        x = x + mha(qkv[:, 0:dm], qkv[:, dm:2 * dm], qkv[:, 2 * dm:3 * dm],
                    p + "Wo", p + "bo", mask_ee)
        x = layer_norm(x, p + "ln1g", p + "ln1b")
        x = layer_norm(x + ffn(x, p + "W1", p + "b1", p + "W2", p + "b2"),
                       p + "ln2g", p + "ln2b")
    enc_out = layer_norm(x, "enc_ng", "enc_nb")

    # ------------------------------- decoder -------------------------------
    feat_d = off_w["emb_W_d"][1]
    x = mm(to_bf(emb_ref[rows_enc:rows_enc + rows_dec, :feat_d]),
           W("emb_W_d")) + V("pe_d")
    for l in range(d_layers):
        p = f"dec{l}_"
        qkv = conv_proj(x, shifts_d, p + "sqkv_W", p + "sqkv_b")
        x = x + mha(qkv[:, 0:dm], qkv[:, dm:2 * dm], qkv[:, 2 * dm:3 * dm],
                    p + "sWo", p + "sbo", mask_dd)
        x = layer_norm(x, p + "ln1g", p + "ln1b")
        qc = conv_proj(x, shifts_d, p + "cq_W", p + "cq_b")          # (Rd, dm)
        kvc = conv_proj(enc_out, shifts_e, p + "ckv_W", p + "ckv_b")  # (Re, 2*dm)
        x = x + mha(qc, kvc[:, 0:dm], kvc[:, dm:2 * dm],
                    p + "cWo", p + "cbo", mask_de)
        x = layer_norm(x, p + "ln2g", p + "ln2b")
        x = layer_norm(x + ffn(x, p + "W1", p + "b1", p + "W2", p + "b2"),
                       p + "ln3g", p + "ln3b")

    x = layer_norm(x, "dec_ng", "dec_nb")
    # proj and final Linear are fused host-side into W_pf / b_pf; one store.
    o_ref[...] = mm(to_bf(x), W("W_pf")) + V("b_pf")                 # (Rd, final_out)


# --------------------------- host-side weight prep --------------------------

def positional_embedding(L, d_model):
    pos = np.arange(L, dtype=np.float32)[:, None]
    div = np.exp(np.arange(0, d_model, 2, dtype=np.float32)
                 * -(math.log(10000.0) / d_model))
    pe = np.zeros((L, d_model), np.float32)
    pe[:, 0::2] = np.sin(pos * div)
    pe[:, 1::2] = np.cos(pos * div)
    return pe


def _block_shift_matrix(B, L, s):
    """Block-diagonal shift-down-by-s matrix on batch-folded rows (zero-padded)."""
    m = np.zeros((B * L, B * L), np.float32)
    for b in range(B):
        for t in range(s, L):
            m[b * L + t, b * L + t - s] = 1.0
    return m


def _batch_mask(B, Lq, Lk, causal):
    """Additive mask (0 keep / -1e30 drop): same-batch block-diag, opt. causal."""
    rq = np.arange(B * Lq)
    rk = np.arange(B * Lk)
    keep = (rq[:, None] // Lq) == (rk[None, :] // Lk)
    if causal:
        keep = keep & ((rk[None, :] % Lk) <= (rq[:, None] % Lq))
    return np.where(keep, 0.0, -1e30).astype(np.float32)


def _conv_taps(W):                      # torch (Cout, Cin, K) -> (K*Cin, Cout)
    W = np.asarray(W, np.float32)
    Cout, Cin, K = W.shape
    return np.transpose(W, (2, 1, 0)).reshape(K * Cin, Cout)


def _v_taps(Wv, K, dm):
    Wv = np.asarray(Wv, np.float32)
    if Wv.ndim == 3:                    # v_conv=True: causal conv taps
        return _conv_taps(Wv)
    t = np.zeros((K * dm, dm), np.float32)
    t[(K - 1) * dm:, :] = Wv            # Linear: only the un-shifted tap
    return t


def _pack_emb(emb_p, c_in, dm):
    token_W = np.asarray(emb_p["token_W"], np.float32)   # (dm, c_in, Kc)
    Kc = token_W.shape[2]
    Wm = np.transpose(token_W, (2, 1, 0)).reshape(Kc * c_in, dm)
    return np.concatenate([Wm, np.asarray(emb_p["temp_W"], np.float32)], axis=0)


class _SlabBuilder:
    """Row-stacks many small operands into one padded (R, 128) slab."""

    def __init__(self, row_align, width=128):
        self._align = row_align
        self._width = width
        self._rows = 0
        self._blocks = []
        self.offsets = {}

    def add(self, name, arr):
        a = np.asarray(arr, dtype=np.float32)
        if a.ndim == 1:
            a = a.reshape(1, -1)
        r, c = a.shape
        assert c <= self._width, (name, a.shape)
        pad_r = ((r + self._align - 1) // self._align) * self._align
        block = np.zeros((pad_r, self._width), np.float32)
        block[:r, :c] = a
        self.offsets[name] = (self._rows, r, c)
        self._blocks.append(block)
        self._rows += pad_r

    def finalize(self, dtype):
        full = np.concatenate(self._blocks, axis=0)
        return jnp.asarray(full).astype(dtype), dict(self.offsets)


def pack_weights(params, cfg, batch):
    """One-time host re-layout: 1 bf16 weight slab + 1 f32 vector/mask/PE slab."""
    dm, K = cfg["d_model"], cfg["qk_ker"]
    L_enc = cfg["seq_len"]
    L_dec = cfg["label_len"] + cfg["pred_len"]
    B = batch

    wp = _SlabBuilder(row_align=16, width=128)     # bf16 (MXU operands)
    vp = _SlabBuilder(row_align=8, width=128)      # f32  (biases / LN / PE / masks)

    for s in range(1, K):
        wp.add(f"S_e{s}", _block_shift_matrix(B, L_enc, s))
        wp.add(f"S_d{s}", _block_shift_matrix(B, L_dec, s))

    wp.add("emb_W_e", _pack_emb(params["enc_emb"], cfg["enc_in"], dm))
    wp.add("emb_W_d", _pack_emb(params["dec_emb"], cfg["dec_in"], dm))
    vp.add("pe_e", np.tile(positional_embedding(L_enc, dm), (B, 1)))
    vp.add("pe_d", np.tile(positional_embedding(L_dec, dm), (B, 1)))
    vp.add("mask_ee", _batch_mask(B, L_enc, L_enc, causal=False))
    vp.add("mask_dd", _batch_mask(B, L_dec, L_dec, causal=True))
    vp.add("mask_de", _batch_mask(B, L_dec, L_enc, causal=False))

    def add_attn(prefix, ap, with_q=True, with_kv=True):
        if with_q and with_kv:
            wp.add(prefix + "W", np.concatenate(
                [_conv_taps(ap["Wq"]), _conv_taps(ap["Wk"]),
                 _v_taps(ap["Wv"], K, dm)], axis=1))
            vp.add(prefix + "b", np.concatenate(
                [np.asarray(ap["bq"]), np.asarray(ap["bk"]), np.asarray(ap["bv"])]))
        elif with_q:
            wp.add(prefix + "W", _conv_taps(ap["Wq"]))
            vp.add(prefix + "b", np.asarray(ap["bq"]))
        else:
            wp.add(prefix + "W", np.concatenate(
                [_conv_taps(ap["Wk"]), _v_taps(ap["Wv"], K, dm)], axis=1))
            vp.add(prefix + "b", np.concatenate(
                [np.asarray(ap["bk"]), np.asarray(ap["bv"])]))

    for l, lp in enumerate(params["enc_layers"]):
        a = lp["attn"]
        p = f"enc{l}_"
        add_attn(p + "qkv_", a)
        wp.add(p + "Wo", a["Wo"]); vp.add(p + "bo", a["bo"])
        vp.add(p + "ln1g", lp["ln1_g"]); vp.add(p + "ln1b", lp["ln1_b"])
        wp.add(p + "W1", lp["W1"]); vp.add(p + "b1", lp["b1"])
        wp.add(p + "W2", lp["W2"]); vp.add(p + "b2", lp["b2"])
        vp.add(p + "ln2g", lp["ln2_g"]); vp.add(p + "ln2b", lp["ln2_b"])
    vp.add("enc_ng", params["enc_norm_g"]); vp.add("enc_nb", params["enc_norm_b"])

    for l, lp in enumerate(params["dec_layers"]):
        sa, ca = lp["self_attn"], lp["cross_attn"]
        p = f"dec{l}_"
        add_attn(p + "sqkv_", sa)
        wp.add(p + "sWo", sa["Wo"]); vp.add(p + "sbo", sa["bo"])
        vp.add(p + "ln1g", lp["ln1_g"]); vp.add(p + "ln1b", lp["ln1_b"])
        add_attn(p + "cq_", ca, with_q=True, with_kv=False)
        add_attn(p + "ckv_", ca, with_q=False, with_kv=True)
        wp.add(p + "cWo", ca["Wo"]); vp.add(p + "cbo", ca["bo"])
        vp.add(p + "ln2g", lp["ln2_g"]); vp.add(p + "ln2b", lp["ln2_b"])
        wp.add(p + "W1", lp["W1"]); vp.add(p + "b1", lp["b1"])
        wp.add(p + "W2", lp["W2"]); vp.add(p + "b2", lp["b2"])
        vp.add(p + "ln3g", lp["ln3_g"]); vp.add(p + "ln3b", lp["ln3_b"])
    vp.add("dec_ng", params["dec_norm_g"]); vp.add("dec_nb", params["dec_norm_b"])

    # Fuse decoder projection with the final head (both are per-row linear).
    proj_W = np.asarray(params["proj_W"], np.float32)
    proj_b = np.asarray(params["proj_b"], np.float32)
    fin_W = np.asarray(params["final_W"], np.float32)
    fin_b = np.asarray(params["final_b"], np.float32)
    wp.add("W_pf", proj_W @ fin_W)
    vp.add("b_pf", proj_b @ fin_W + fin_b)

    w_slab, off_w = wp.finalize(jnp.bfloat16)
    v_slab, off_v = vp.finalize(jnp.float32)
    return w_slab, v_slab, off_w, off_v


# ------------------------------ forward wrapper -----------------------------

def _circular_unfold(x, Kc):
    # TokenEmbedding: Conv1d(k=3, pad=1, padding_mode='circular', bias=False)
    L = x.shape[1]
    pad = (Kc - 1) // 2
    xp = jnp.concatenate([x[:, L - pad:, :], x, x[:, :pad, :]], axis=1)
    return jnp.concatenate([xp[:, k:k + L, :] for k in range(Kc)], axis=-1)


def model_forward(w_slab, v_slab, x_enc, x_mark_enc, x_dec, x_mark_dec, *,
                  cfg, off_w, off_v):
    # TODO(synk): sparse_flag=True log-sparse score masking not implemented
    # (this config uses sparse_flag=False -> plain full / causal attention).
    B, L_enc, _ = x_enc.shape
    L_dec = x_dec.shape[1]
    Kc = 3                                           # TokenEmbedding kernel size

    emb_e = jnp.concatenate([_circular_unfold(x_enc, Kc), x_mark_enc], axis=-1)
    emb_d = jnp.concatenate([_circular_unfold(x_dec, Kc), x_mark_dec], axis=-1)
    feat_e, feat_d = emb_e.shape[-1], emb_d.shape[-1]
    feat = max(feat_e, feat_d)
    emb_e = emb_e.reshape(B * L_enc, feat_e)
    emb_d = emb_d.reshape(B * L_dec, feat_d)
    if feat_e < feat:
        emb_e = jnp.pad(emb_e, ((0, 0), (0, feat - feat_e)))
    if feat_d < feat:
        emb_d = jnp.pad(emb_d, ((0, 0), (0, feat - feat_d)))
    emb_in = jnp.concatenate([emb_e, emb_d], axis=0)  # (B*(Le+Ld), feat)

    kernel = functools.partial(
        _forward_kernel,
        n_heads=cfg["n_heads"], e_layers=cfg["e_layers"], d_layers=cfg["d_layers"],
        qk_ker=cfg["qk_ker"], d_model=cfg["d_model"],
        use_gelu=(cfg["activation"] == "gelu"),
        off_w=off_w, off_v=off_v,
        rows_enc=B * L_enc, rows_dec=B * L_dec)

    out = pl.pallas_call(
        kernel,
        out_shape=jax.ShapeDtypeStruct((B * L_dec, cfg["final_out"]), jnp.float32),
    )(emb_in, w_slab, v_slab)

    return out.reshape(B, L_dec, cfg["final_out"])[:, -cfg["pred_len"]:, :]


# ------------------------------ param init ---------------------------------

def init_params(key, cfg):
    keys = iter(jax.random.split(key, 256))
    nk = lambda: next(keys)
    nrm = lambda shape, s=0.02: s * jax.random.normal(nk(), shape, jnp.float32)
    dm, dff, qk = cfg["d_model"], cfg["d_ff"], cfg["qk_ker"]
    mark_dim = cfg["mark_dim"]

    def init_attn():
        wv = nrm((dm, dm, qk)) if cfg["v_conv"] else nrm((dm, dm))
        return dict(Wq=nrm((dm, dm, qk)), bq=jnp.zeros((dm,)),
                    Wk=nrm((dm, dm, qk)), bk=jnp.zeros((dm,)),
                    Wv=wv, bv=jnp.zeros((dm,)),
                    Wo=nrm((dm, dm)), bo=jnp.zeros((dm,)))

    def init_ffn_norms(n_norms):
        d = dict(W1=nrm((dm, dff)), b1=jnp.zeros((dff,)),
                 W2=nrm((dff, dm)), b2=jnp.zeros((dm,)))
        for i in range(1, n_norms + 1):
            d[f"ln{i}_g"] = jnp.ones((dm,))
            d[f"ln{i}_b"] = jnp.zeros((dm,))
        return d

    return dict(
        enc_emb=dict(token_W=nrm((dm, cfg["enc_in"], 3)),
                     temp_W=nrm((mark_dim, dm))),
        dec_emb=dict(token_W=nrm((dm, cfg["dec_in"], 3)),
                     temp_W=nrm((mark_dim, dm))),
        enc_layers=[dict(attn=init_attn(), **init_ffn_norms(2))
                    for _ in range(cfg["e_layers"])],
        dec_layers=[dict(self_attn=init_attn(), cross_attn=init_attn(),
                         **init_ffn_norms(3))
                    for _ in range(cfg["d_layers"])],
        enc_norm_g=jnp.ones((dm,)), enc_norm_b=jnp.zeros((dm,)),
        dec_norm_g=jnp.ones((dm,)), dec_norm_b=jnp.zeros((dm,)),
        proj_W=nrm((dm, cfg["c_out"])), proj_b=jnp.zeros((cfg["c_out"],)),
        final_W=nrm((cfg["dec_in"], cfg["final_out"])),
        final_b=jnp.zeros((cfg["final_out"],)),
    )


# -------------------------- pure-JAX reference ------------------------------

def _ref_forward(params, x_enc, x_mark_enc, x_dec, x_mark_dec, cfg):
    dm, H = cfg["d_model"], cfg["n_heads"]
    act = ((lambda z: jax.nn.gelu(z, approximate=False))
           if cfg["activation"] == "gelu" else jax.nn.relu)

    def causal_conv(x, W, b):
        Cout, Cin, K = W.shape
        L = x.shape[1]
        xp = jnp.pad(x, ((0, 0), (K - 1, 0), (0, 0)))
        xu = jnp.concatenate([xp[:, k:k + L, :] for k in range(K)], axis=-1)
        return xu @ jnp.transpose(W, (2, 1, 0)).reshape(K * Cin, Cout) + b

    def circular_conv(x, W):
        Cout, Cin, K = W.shape
        L = x.shape[1]
        pad = (K - 1) // 2
        xp = jnp.concatenate([x[:, L - pad:, :], x, x[:, :pad, :]], axis=1)
        xu = jnp.concatenate([xp[:, k:k + L, :] for k in range(K)], axis=-1)
        return xu @ jnp.transpose(W, (2, 1, 0)).reshape(K * Cin, Cout)

    def ln(x, g, b):
        mu = x.mean(-1, keepdims=True)
        var = ((x - mu) ** 2).mean(-1, keepdims=True)
        return (x - mu) / jnp.sqrt(var + 1e-5) * g + b

    def emb(p, x, xm):
        return (circular_conv(x, p["token_W"])
                + positional_embedding(x.shape[1], dm)[None]
                + xm @ p["temp_W"])

    def mha(q, k, v, causal):
        B, L, _ = q.shape
        S = k.shape[1]
        E = dm // H
        qh = q.reshape(B, L, H, E)
        kh = k.reshape(B, S, H, E)
        vh = v.reshape(B, S, H, E)
        s = jnp.einsum("blhe,bshe->bhls", qh, kh) / math.sqrt(E)
        if causal:
            s = jnp.where(np.tril(np.ones((L, S), bool)), s, -jnp.inf)
        p = jax.nn.softmax(s, axis=-1)
        return jnp.einsum("bhls,bshe->blhe", p, vh).reshape(B, L, H * E)

    def attn_layer(p, xq, xkv, causal):
        q = causal_conv(xq, p["Wq"], p["bq"])
        k = causal_conv(xkv, p["Wk"], p["bk"])
        v = (causal_conv(xkv, p["Wv"], p["bv"]) if p["Wv"].ndim == 3
             else xkv @ p["Wv"] + p["bv"])
        return mha(q, k, v, causal) @ p["Wo"] + p["bo"]

    x = emb(params["enc_emb"], x_enc, x_mark_enc)
    for lp in params["enc_layers"]:
        x = ln(x + attn_layer(lp["attn"], x, x, False), lp["ln1_g"], lp["ln1_b"])
        y = act(x @ lp["W1"] + lp["b1"]) @ lp["W2"] + lp["b2"]
        x = ln(x + y, lp["ln2_g"], lp["ln2_b"])
    enc_out = ln(x, params["enc_norm_g"], params["enc_norm_b"])

    x = emb(params["dec_emb"], x_dec, x_mark_dec)
    for lp in params["dec_layers"]:
        x = ln(x + attn_layer(lp["self_attn"], x, x, True),
               lp["ln1_g"], lp["ln1_b"])
        x = ln(x + attn_layer(lp["cross_attn"], x, enc_out, False),
               lp["ln2_g"], lp["ln2_b"])
        y = act(x @ lp["W1"] + lp["b1"]) @ lp["W2"] + lp["b2"]
        x = ln(x + y, lp["ln3_g"], lp["ln3_b"])
    x = ln(x, params["dec_norm_g"], params["dec_norm_b"])
    x = x @ params["proj_W"] + params["proj_b"]
    x = x[:, -cfg["pred_len"]:, :]
    return x @ params["final_W"] + params["final_b"]


# --------------------------------- main -------------------------------------

if __name__ == "__main__":
    cfg = dict(seq_len=8, label_len=4, pred_len=4,
               enc_in=4, dec_in=4, c_out=4, d_model=32, n_heads=4, d_ff=64,
               e_layers=1, d_layers=1, qk_ker=3, v_conv=False,
               sparse_flag=False, win_len=0, res_len=None,
               dropout=0.0, activation="gelu",
               embed="timeF", freq="h", mark_dim=4,
               output_attention=False, final_out=2)

    key = jax.random.PRNGKey(0)
    k1, k2, k3, k4, kp = jax.random.split(key, 5)
    B = 2
    dec_len = cfg["label_len"] + cfg["pred_len"]
    x_enc = jax.random.normal(k1, (B, cfg["seq_len"], cfg["enc_in"]), jnp.float32)
    x_mark_enc = jax.random.normal(k2, (B, cfg["seq_len"], cfg["mark_dim"]), jnp.float32)
    x_dec = jax.random.normal(k3, (B, dec_len, cfg["dec_in"]), jnp.float32)
    x_mark_dec = jax.random.normal(k4, (B, dec_len, cfg["mark_dim"]), jnp.float32)

    params = init_params(kp, cfg)
    # One-time host-side re-layout into two slabs (batch-dependent masks/PE).
    w_slab, v_slab, off_w, off_v = pack_weights(params, cfg, batch=B)

    fwd = jax.jit(functools.partial(model_forward, cfg=cfg,
                                    off_w=off_w, off_v=off_v))
    out = jax.block_until_ready(
        fwd(w_slab, v_slab, x_enc, x_mark_enc, x_dec, x_mark_dec))

    assert out.shape == (B, cfg["pred_len"], cfg["final_out"]), out.shape
    assert bool(jnp.all(jnp.isfinite(out)))

    # Correctness check against a pure-JAX (f32) implementation of the module.
    # Tolerance covers bf16 MXU inputs, tanh-GELU and approx-reciprocal softmax.
    with jax.default_matmul_precision("float32"):
        ref = _ref_forward(params, x_enc, x_mark_enc, x_dec, x_mark_dec, cfg)
    np.testing.assert_allclose(np.asarray(out), np.asarray(ref),
                               rtol=5e-2, atol=5e-4)

    print("KERNEL_OK")
</pallas_src>

<mosaic_0001>
module attributes {stable_mosaic.version = 11 : i64} {
  func.func @_forward_kernel(%arg0: memref<32x16xf32, #tpu.memory_space<vmem>>, %arg1: memref<800x128xbf16, #tpu.memory_space<vmem>>, %arg2: memref<288x128xf32, #tpu.memory_space<vmem>>, %arg3: memref<16x2xf32, #tpu.memory_space<vmem>>) attributes {dimension_semantics = [], scalar_prefetch = 0 : i64, scratch_operands = 0 : i64, tpu.core_type = #tpu.core_type<tc>} {
    %c32 = arith.constant 32 : index
    %c0 = arith.constant 0 : index
    %0 = vector.load %arg2[%c32, %c0] : memref<288x128xf32, #tpu.memory_space<vmem>>, vector<16x16xf32>
    %c48 = arith.constant 48 : index
    %c0_0 = arith.constant 0 : index
    %1 = vector.load %arg2[%c48, %c0_0] : memref<288x128xf32, #tpu.memory_space<vmem>>, vector<16x16xf32>
    %c64 = arith.constant 64 : index
    %c0_1 = arith.constant 0 : index
    %2 = vector.load %arg2[%c64, %c0_1] : memref<288x128xf32, #tpu.memory_space<vmem>>, vector<16x16xf32>
    %c0_2 = arith.constant 0 : index
    %c0_3 = arith.constant 0 : index
    %3 = vector.load %arg0[%c0_2, %c0_3] : memref<32x16xf32, #tpu.memory_space<vmem>>, vector<16x16xf32>
    %4 = arith.truncf %3 : vector<16x16xf32> to vector<16x16xbf16>
    %c64_4 = arith.constant 64 : index
    %c0_5 = arith.constant 0 : index
    %5 = vector.load %arg1[%c64_4, %c0_5] : memref<800x128xbf16, #tpu.memory_space<vmem>>, vector<16x32xbf16>
    %cst = arith.constant dense<0.000000e+00> : vector<16x32xf32>
    %6 = tpu.matmul %4, %5, %cst {dimension_numbers = #tpu.dot_dimension_numbers<[1], [0], [0], [1], [0, 0, 1, 1], [], []>} : vector<16x16xbf16>, vector<16x32xbf16>, vector<16x32xf32> -> vector<16x32xf32>
    %c0_6 = arith.constant 0 : index
    %c0_7 = arith.constant 0 : index
    %7 = vector.load %arg2[%c0_6, %c0_7] : memref<288x128xf32, #tpu.memory_space<vmem>>, vector<16x32xf32>
    %8 = arith.addf %6, %7 : vector<16x32xf32>
    %9 = arith.truncf %8 : vector<16x32xf32> to vector<16x32xbf16>
    %c32_8 = arith.constant 32 : index
    %c0_9 = arith.constant 0 : index
    %10 = vector.load %arg1[%c32_8, %c0_9] : memref<800x128xbf16, #tpu.memory_space<vmem>>, vector<16x16xbf16>
    %cst_10 = arith.constant dense<0.000000e+00> : vector<16x32xf32>
    %11 = tpu.matmul %10, %9, %cst_10 {dimension_numbers = #tpu.dot_dimension_numbers<[1], [0], [0], [1], [0, 0, 1, 1], [], []>} : vector<16x16xbf16>, vector<16x32xbf16>, vector<16x32xf32> -> vector<16x32xf32>
    %12 = arith.truncf %11 : vector<16x32xf32> to vector<16x32xbf16>
    %c0_11 = arith.constant 0 : index
    %c0_12 = arith.constant 0 : index
    %13 = vector.load %arg1[%c0_11, %c0_12] : memref<800x128xbf16, #tpu.memory_space<vmem>>, vector<16x16xbf16>
    %cst_13 = arith.constant dense<0.000000e+00> : vector<16x32xf32>
    %14 = tpu.matmul %13, %9, %cst_13 {dimension_numbers = #tpu.dot_dimension_numbers<[1], [0], [0], [1], [0, 0, 1, 1], [], []>} : vector<16x16xbf16>, vector<16x32xbf16>, vector<16x32xf32> -> vector<16x32xf32>
    %15 = arith.truncf %14 : vector<16x32xf32> to vector<16x32xbf16>
    %16 = tpu.concatenate %12, %15, %9 in 1 : vector<16x32xbf16>, vector<16x32xbf16>, vector<16x32xbf16> -> vector<16x96xbf16>
    %c96 = arith.constant 96 : index
    %c0_14 = arith.constant 0 : index
    %17 = vector.load %arg1[%c96, %c0_14] : memref<800x128xbf16, #tpu.memory_space<vmem>>, vector<96x96xbf16>
    %cst_15 = arith.constant dense<0.000000e+00> : vector<16x96xf32>
    %18 = tpu.matmul %16, %17, %cst_15 {dimension_numbers = #tpu.dot_dimension_numbers<[1], [0], [0], [1], [0, 0, 1, 1], [], []>} : vector<16x96xbf16>, vector<96x96xbf16>, vector<16x96xf32> -> vector<16x96xf32>
    %c80 = arith.constant 80 : index
    %c0_16 = arith.constant 0 : index
    %19 = vector.load %arg2[%c80, %c0_16] : memref<288x128xf32, #tpu.memory_space<vmem>>, vector<1x96xf32>
    %20 = vector.broadcast %19 : vector<1x96xf32> to vector<16x96xf32>
    %21 = arith.addf %18, %20 : vector<16x96xf32>
    %22 = vector.extract_strided_slice %21 {offsets = [0, 0], sizes = [16, 32], strides = [1, 1]} : vector<16x96xf32> to vector<16x32xf32>
    %23 = vector.extract_strided_slice %21 {offsets = [0, 32], sizes = [16, 32], strides = [1, 1]} : vector<16x96xf32> to vector<16x32xf32>
    %24 = vector.extract_strided_slice %21 {offsets = [0, 64], sizes = [16, 32], strides = [1, 1]} : vector<16x96xf32> to vector<16x32xf32>
    %cst_17 = arith.constant 0.353553385 : f32
    %25 = vector.broadcast %cst_17 : f32 to vector<16x32xf32>
    %26 = arith.mulf %22, %25 : vector<16x32xf32>
    %27 = arith.truncf %26 : vector<16x32xf32> to vector<16x32xbf16>
    %28 = arith.truncf %23 : vector<16x32xf32> to vector<16x32xbf16>
    %29 = arith.truncf %24 : vector<16x32xf32> to vector<16x32xbf16>
    %30 = vector.extract_strided_slice %27 {offsets = [0, 0], sizes = [16, 8], strides = [1, 1]} : vector<16x32xbf16> to vector<16x8xbf16>
    %31 = vector.extract_strided_slice %28 {offsets = [0, 0], sizes = [16, 8], strides = [1, 1]} : vector<16x32xbf16> to vector<16x8xbf16>
    %cst_18 = arith.constant dense<0.000000e+00> : vector<16x16xf32>
    %32 = tpu.matmul %30, %31, %cst_18 {dimension_numbers = #tpu.dot_dimension_numbers<[1], [1], [0], [0], [0, 0, 1, 0], [], []>} : vector<16x8xbf16>, vector<16x8xbf16>, vector<16x16xf32> -> vector<16x16xf32>
    %33 = arith.addf %32, %0 : vector<16x16xf32>
    %cst_19 = arith.constant dense<0xFF800000> : vector<16xf32>
    %34 = vector.multi_reduction <maximumf>, %33, %cst_19 [1] : vector<16x16xf32> to vector<16xf32>
    %35 = vector.shape_cast %34 : vector<16xf32> to vector<16x1xf32>
    %36 = vector.broadcast %35 : vector<16x1xf32> to vector<16x16xf32>
    %37 = arith.subf %33, %36 : vector<16x16xf32>
    %38 = math.exp %37 : vector<16x16xf32>
    %cst_20 = arith.constant dense<0.000000e+00> : vector<16xf32>
    %39 = vector.multi_reduction <add>, %38, %cst_20 [1] : vector<16x16xf32> to vector<16xf32>
    %40 = vector.shape_cast %39 : vector<16xf32> to vector<16x1xf32>
    %41 = tpu.reciprocal %40 {approx = true} : vector<16x1xf32> -> vector<16x1xf32>
    %42 = vector.broadcast %41 : vector<16x1xf32> to vector<16x16xf32>
    %43 = arith.mulf %38, %42 : vector<16x16xf32>
    %44 = arith.truncf %43 : vector<16x16xf32> to vector<16x16xbf16>
    %45 = vector.extract_strided_slice %29 {offsets = [0, 0], sizes = [16, 8], strides = [1, 1]} : vector<16x32xbf16> to vector<16x8xbf16>
    %cst_21 = arith.constant dense<0.000000e+00> : vector<16x8xf32>
    %46 = tpu.matmul %44, %45, %cst_21 {dimension_numbers = #tpu.dot_dimension_numbers<[1], [0], [0], [1], [0, 0, 1, 1], [], []>} : vector<16x16xbf16>, vector<16x8xbf16>, vector<16x8xf32> -> vector<16x8xf32>
    %47 = vector.extract_strided_slice %27 {offsets = [0, 8], sizes = [16, 8], strides = [1, 1]} : vector<16x32xbf16> to vector<16x8xbf16>
    %48 = vector.extract_strided_slice %28 {offsets = [0, 8], sizes = [16, 8], strides = [1, 1]} : vector<16x32xbf16> to vector<16x8xbf16>
    %cst_22 = arith.constant dense<0.000000e+00> : vector<16x16xf32>
    %49 = tpu.matmul %47, %48, %cst_22 {dimension_numbers = #tpu.dot_dimension_numbers<[1], [1], [0], [0], [0, 0, 1, 0], [], []>} : vector<16x8xbf16>, vector<16x8xbf16>, vector<16x16xf32> -> vector<16x16xf32>
    %50 = arith.addf %49, %0 : vector<16x16xf32>
    %cst_23 = arith.constant dense<0xFF800000> : vector<16xf32>
    %51 = vector.multi_reduction <maximumf>, %50, %cst_23 [1] : vector<16x16xf32> to vector<16xf32>
    %52 = vector.shape_cast %51 : vector<16xf32> to vector<16x1xf32>
    %53 = vector.broadcast %52 : vector<16x1xf32> to vector<16x16xf32>
    %54 = arith.subf %50, %53 : vector<16x16xf32>
    %55 = math.exp %54 : vector<16x16xf32>
    %cst_24 = arith.constant dense<0.000000e+00> : vector<16xf32>
    %56 = vector.multi_reduction <add>, %55, %cst_24 [1] : vector<16x16xf32> to vector<16xf32>
    %57 = vector.shape_cast %56 : vector<16xf32> to vector<16x1xf32>
    %58 = tpu.reciprocal %57 {approx = true} : vector<16x1xf32> -> vector<16x1xf32>
    %59 = vector.broadcast %58 : vector<16x1xf32> to vector<16x16xf32>
    %60 = arith.mulf %55, %59 : vector<16x16xf32>
    %61 = arith.truncf %60 : vector<16x16xf32> to vector<16x16xbf16>
    %62 = vector.extract_strided_slice %29 {offsets = [0, 8], sizes = [16, 8], strides = [1, 1]} : vector<16x32xbf16> to vector<16x8xbf16>
    %cst_25 = arith.constant dense<0.000000e+00> : vector<16x8xf32>
    %63 = tpu.matmul %61, %62, %cst_25 {dimension_numbers = #tpu.dot_dimension_numbers<[1], [0], [0], [1], [0, 0, 1, 1], [], []>} : vector<16x16xbf16>, vector<16x8xbf16>, vector<16x8xf32> -> vector<16x8xf32>
    %64 = vector.extract_strided_slice %27 {offsets = [0, 16], sizes = [16, 8], strides = [1, 1]} : vector<16x32xbf16> to vector<16x8xbf16>
    %65 = vector.extract_strided_slice %28 {offsets = [0, 16], sizes = [16, 8], strides = [1, 1]} : vector<16x32xbf16> to vector<16x8xbf16>
    %cst_26 = arith.constant dense<0.000000e+00> : vector<16x16xf32>
    %66 = tpu.matmul %64, %65, %cst_26 {dimension_numbers = #tpu.dot_dimension_numbers<[1], [1], [0], [0], [0, 0, 1, 0], [], []>} : vector<16x8xbf16>, vector<16x8xbf16>, vector<16x16xf32> -> vector<16x16xf32>
    %67 = arith.addf %66, %0 : vector<16x16xf32>
    %cst_27 = arith.constant dense<0xFF800000> : vector<16xf32>
    %68 = vector.multi_reduction <maximumf>, %67, %cst_27 [1] : vector<16x16xf32> to vector<16xf32>
    %69 = vector.shape_cast %68 : vector<16xf32> to vector<16x1xf32>
    %70 = vector.broadcast %69 : vector<16x1xf32> to vector<16x16xf32>
    %71 = arith.subf %67, %70 : vector<16x16xf32>
    %72 = math.exp %71 : vector<16x16xf32>
    %cst_28 = arith.constant dense<0.000000e+00> : vector<16xf32>
    %73 = vector.multi_reduction <add>, %72, %cst_28 [1] : vector<16x16xf32> to vector<16xf32>
    %74 = vector.shape_cast %73 : vector<16xf32> to vector<16x1xf32>
    %75 = tpu.reciprocal %74 {approx = true} : vector<16x1xf32> -> vector<16x1xf32>
    %76 = vector.broadcast %75 : vector<16x1xf32> to vector<16x16xf32>
    %77 = arith.mulf %72, %76 : vector<16x16xf32>
    %78 = arith.truncf %77 : vector<16x16xf32> to vector<16x16xbf16>
    %79 = vector.extract_strided_slice %29 {offsets = [0, 16], sizes = [16, 8], strides = [1, 1]} : vector<16x32xbf16> to vector<16x8xbf16>
    %cst_29 = arith.constant dense<0.000000e+00> : vector<16x8xf32>
    %80 = tpu.matmul %78, %79, %cst_29 {dimension_numbers = #tpu.dot_dimension_numbers<[1], [0], [0], [1], [0, 0, 1, 1], [], []>} : vector<16x16xbf16>, vector<16x8xbf16>, vector<16x8xf32> -> vector<16x8xf32>
    %81 = vector.extract_strided_slice %27 {offsets = [0, 24], sizes = [16, 8], strides = [1, 1]} : vector<16x32xbf16> to vector<16x8xbf16>
    %82 = vector.extract_strided_slice %28 {offsets = [0, 24], sizes = [16, 8], strides = [1, 1]} : vector<16x32xbf16> to vector<16x8xbf16>
    %cst_30 = arith.constant dense<0.000000e+00> : vector<16x16xf32>
    %83 = tpu.matmul %81, %82, %cst_30 {dimension_numbers = #tpu.dot_dimension_numbers<[1], [1], [0], [0], [0, 0, 1, 0], [], []>} : vector<16x8xbf16>, vector<16x8xbf16>, vector<16x16xf32> -> vector<16x16xf32>
    %84 = arith.addf %83, %0 : vector<16x16xf32>
    %cst_31 = arith.constant dense<0xFF800000> : vector<16xf32>
    %85 = vector.multi_reduction <maximumf>, %84, %cst_31 [1] : vector<16x16xf32> to vector<16xf32>
    %86 = vector.shape_cast %85 : vector<16xf32> to vector<16x1xf32>
    %87 = vector.broadcast %86 : vector<16x1xf32> to vector<16x16xf32>
    %88 = arith.subf %84, %87 : vector<16x16xf32>
    %89 = math.exp %88 : vector<16x16xf32>
    %cst_32 = arith.constant dense<0.000000e+00> : vector<16xf32>
    %90 = vector.multi_reduction <add>, %89, %cst_32 [1] : vector<16x16xf32> to vector<16xf32>
    %91 = vector.shape_cast %90 : vector<16xf32> to vector<16x1xf32>
    %92 = tpu.reciprocal %91 {approx = true} : vector<16x1xf32> -> vector<16x1xf32>
    %93 = vector.broadcast %92 : vector<16x1xf32> to vector<16x16xf32>
    %94 = arith.mulf %89, %93 : vector<16x16xf32>
    %95 = arith.truncf %94 : vector<16x16xf32> to vector<16x16xbf16>
    %96 = vector.extract_strided_slice %29 {offsets = [0, 24], sizes = [16, 8], strides = [1, 1]} : vector<16x32xbf16> to vector<16x8xbf16>
    %cst_33 = arith.constant dense<0.000000e+00> : vector<16x8xf32>
    %97 = tpu.matmul %95, %96, %cst_33 {dimension_numbers = #tpu.dot_dimension_numbers<[1], [0], [0], [1], [0, 0, 1, 1], [], []>} : vector<16x16xbf16>, vector<16x8xbf16>, vector<16x8xf32> -> vector<16x8xf32>
    %98 = tpu.concatenate %46, %63, %80, %97 in 1 : vector<16x8xf32>, vector<16x8xf32>, vector<16x8xf32>, vector<16x8xf32> -> vector<16x32xf32>
    %99 = arith.truncf %98 : vector<16x32xf32> to vector<16x32xbf16>
    %c192 = arith.constant 192 : index
    %c0_34 = arith.constant 0 : index
    %100 = vector.load %arg1[%c192, %c0_34] : memref<800x128xbf16, #tpu.memory_space<vmem>>, vector<32x32xbf16>
    %cst_35 = arith.constant dense<0.000000e+00> : vector<16x32xf32>
    %101 = tpu.matmul %99, %100, %cst_35 {dimension_numbers = #tpu.dot_dimension_numbers<[1], [0], [0], [1], [0, 0, 1, 1], [], []>} : vector<16x32xbf16>, vector<32x32xbf16>, vector<16x32xf32> -> vector<16x32xf32>
    %c88 = arith.constant 88 : index
    %c0_36 = arith.constant 0 : index
    %102 = vector.load %arg2[%c88, %c0_36] : memref<288x128xf32, #tpu.memory_space<vmem>>, vector<1x32xf32>
    %103 = vector.broadcast %102 : vector<1x32xf32> to vector<16x32xf32>
    %104 = arith.addf %101, %103 : vector<16x32xf32>
    %105 = arith.addf %8, %104 : vector<16x32xf32>
    %cst_37 = arith.constant dense<0.000000e+00> : vector<16xf32>
    %106 = vector.multi_reduction <add>, %105, %cst_37 [1] : vector<16x32xf32> to vector<16xf32>
    %107 = vector.shape_cast %106 : vector<16xf32> to vector<16x1xf32>
    %cst_38 = arith.constant 3.200000e+01 : f32
    %108 = vector.broadcast %cst_38 : f32 to vector<16x1xf32>
    %109 = arith.divf %107, %108 : vector<16x1xf32>
    %110 = vector.broadcast %109 : vector<16x1xf32> to vector<16x32xf32>
    %111 = arith.subf %105, %110 : vector<16x32xf32>
    %112 = arith.mulf %111, %111 : vector<16x32xf32>
    %cst_39 = arith.constant dense<0.000000e+00> : vector<16xf32>
    %113 = vector.multi_reduction <add>, %112, %cst_39 [1] : vector<16x32xf32> to vector<16xf32>
    %114 = vector.shape_cast %113 : vector<16xf32> to vector<16x1xf32>
    %cst_40 = arith.constant 3.200000e+01 : f32
    %115 = vector.broadcast %cst_40 : f32 to vector<16x1xf32>
    %116 = arith.divf %114, %115 : vector<16x1xf32>
    %cst_41 = arith.constant 9.99999974E-6 : f32
    %117 = vector.broadcast %cst_41 : f32 to vector<16x1xf32>
    %118 = arith.addf %116, %117 : vector<16x1xf32>
    %119 = math.rsqrt %118 : vector<16x1xf32>
    %120 = vector.broadcast %119 : vector<16x1xf32> to vector<16x32xf32>
    %121 = arith.mulf %111, %120 : vector<16x32xf32>
    %c96_42 = arith.constant 96 : index
    %c0_43 = arith.constant 0 : index
    %122 = vector.load %arg2[%c96_42, %c0_43] : memref<288x128xf32, #tpu.memory_space<vmem>>, vector<1x32xf32>
    %123 = vector.broadcast %122 : vector<1x32xf32> to vector<16x32xf32>
    %124 = arith.mulf %121, %123 : vector<16x32xf32>
    %c104 = arith.constant 104 : index
    %c0_44 = arith.constant 0 : index
    %125 = vector.load %arg2[%c104, %c0_44] : memref<288x128xf32, #tpu.memory_space<vmem>>, vector<1x32xf32>
    %126 = vector.broadcast %125 : vector<1x32xf32> to vector<16x32xf32>
    %127 = arith.addf %124, %126 : vector<16x32xf32>
    %128 = arith.truncf %127 : vector<16x32xf32> to vector<16x32xbf16>
    %c224 = arith.constant 224 : index
    %c0_45 = arith.constant 0 : index
    %129 = vector.load %arg1[%c224, %c0_45] : memref<800x128xbf16, #tpu.memory_space<vmem>>, vector<32x64xbf16>
    %cst_46 = arith.constant dense<0.000000e+00> : vector<16x64xf32>
    %130 = tpu.matmul %128, %129, %cst_46 {dimension_numbers = #tpu.dot_dimension_numbers<[1], [0], [0], [1], [0, 0, 1, 1], [], []>} : vector<16x32xbf16>, vector<32x64xbf16>, vector<16x64xf32> -> vector<16x64xf32>
    %c112 = arith.constant 112 : index
    %c0_47 = arith.constant 0 : index
    %131 = vector.load %arg2[%c112, %c0_47] : memref<288x128xf32, #tpu.memory_space<vmem>>, vector<1x64xf32>
    %132 = vector.broadcast %131 : vector<1x64xf32> to vector<16x64xf32>
    %133 = arith.addf %130, %132 : vector<16x64xf32>
    %cst_48 = arith.constant 5.000000e-01 : f32
    %134 = vector.broadcast %cst_48 : f32 to vector<16x64xf32>
    %135 = arith.mulf %134, %133 : vector<16x64xf32>
    %cst_49 = arith.constant 4.471500e-02 : f32
    %136 = vector.broadcast %cst_49 : f32 to vector<16x64xf32>
    %137 = arith.mulf %136, %133 : vector<16x64xf32>
    %138 = arith.mulf %137, %133 : vector<16x64xf32>
    %139 = arith.mulf %138, %133 : vector<16x64xf32>
    %140 = arith.addf %133, %139 : vector<16x64xf32>
    %cst_50 = arith.constant 0.797884583 : f32
    %141 = vector.broadcast %cst_50 : f32 to vector<16x64xf32>
    %142 = arith.mulf %141, %140 : vector<16x64xf32>
    %143 = math.tanh %142 : vector<16x64xf32>
    %cst_51 = arith.constant 1.000000e+00 : f32
    %144 = vector.broadcast %cst_51 : f32 to vector<16x64xf32>
    %145 = arith.addf %144, %143 : vector<16x64xf32>
    %146 = arith.mulf %135, %145 : vector<16x64xf32>
    %147 = arith.truncf %146 : vector<16x64xf32> to vector<16x64xbf16>
    %c256 = arith.constant 256 : index
    %c0_52 = arith.constant 0 : index
    %148 = vector.load %arg1[%c256, %c0_52] : memref<800x128xbf16, #tpu.memory_space<vmem>>, vector<64x32xbf16>
    %cst_53 = arith.constant dense<0.000000e+00> : vector<16x32xf32>
    %149 = tpu.matmul %147, %148, %cst_53 {dimension_numbers = #tpu.dot_dimension_numbers<[1], [0], [0], [1], [0, 0, 1, 1], [], []>} : vector<16x64xbf16>, vector<64x32xbf16>, vector<16x32xf32> -> vector<16x32xf32>
    %c120 = arith.constant 120 : index
    %c0_54 = arith.constant 0 : index
    %150 = vector.load %arg2[%c120, %c0_54] : memref<288x128xf32, #tpu.memory_space<vmem>>, vector<1x32xf32>
    %151 = vector.broadcast %150 : vector<1x32xf32> to vector<16x32xf32>
    %152 = arith.addf %149, %151 : vector<16x32xf32>
    %153 = arith.addf %127, %152 : vector<16x32xf32>
    %cst_55 = arith.constant dense<0.000000e+00> : vector<16xf32>
    %154 = vector.multi_reduction <add>, %153, %cst_55 [1] : vector<16x32xf32> to vector<16xf32>
    %155 = vector.shape_cast %154 : vector<16xf32> to vector<16x1xf32>
    %cst_56 = arith.constant 3.200000e+01 : f32
    %156 = vector.broadcast %cst_56 : f32 to vector<16x1xf32>
    %157 = arith.divf %155, %156 : vector<16x1xf32>
    %158 = vector.broadcast %157 : vector<16x1xf32> to vector<16x32xf32>
    %159 = arith.subf %153, %158 : vector<16x32xf32>
    %160 = arith.mulf %159, %159 : vector<16x32xf32>
    %cst_57 = arith.constant dense<0.000000e+00> : vector<16xf32>
    %161 = vector.multi_reduction <add>, %160, %cst_57 [1] : vector<16x32xf32> to vector<16xf32>
    %162 = vector.shape_cast %161 : vector<16xf32> to vector<16x1xf32>
    %cst_58 = arith.constant 3.200000e+01 : f32
    %163 = vector.broadcast %cst_58 : f32 to vector<16x1xf32>
    %164 = arith.divf %162, %163 : vector<16x1xf32>
    %cst_59 = arith.constant 9.99999974E-6 : f32
    %165 = vector.broadcast %cst_59 : f32 to vector<16x1xf32>
    %166 = arith.addf %164, %165 : vector<16x1xf32>
    %167 = math.rsqrt %166 : vector<16x1xf32>
    %168 = vector.broadcast %167 : vector<16x1xf32> to vector<16x32xf32>
    %169 = arith.mulf %159, %168 : vector<16x32xf32>
    %c128 = arith.constant 128 : index
    %c0_60 = arith.constant 0 : index
    %170 = vector.load %arg2[%c128, %c0_60] : memref<288x128xf32, #tpu.memory_space<vmem>>, vector<1x32xf32>
    %171 = vector.broadcast %170 : vector<1x32xf32> to vector<16x32xf32>
    %172 = arith.mulf %169, %171 : vector<16x32xf32>
    %c136 = arith.constant 136 : index
    %c0_61 = arith.constant 0 : index
    %173 = vector.load %arg2[%c136, %c0_61] : memref<288x128xf32, #tpu.memory_space<vmem>>, vector<1x32xf32>
    %174 = vector.broadcast %173 : vector<1x32xf32> to vector<16x32xf32>
    %175 = arith.addf %172, %174 : vector<16x32xf32>
    %cst_62 = arith.constant dense<0.000000e+00> : vector<16xf32>
    %176 = vector.multi_reduction <add>, %175, %cst_62 [1] : vector<16x32xf32> to vector<16xf32>
    %177 = vector.shape_cast %176 : vector<16xf32> to vector<16x1xf32>
    %cst_63 = arith.constant 3.200000e+01 : f32
    %178 = vector.broadcast %cst_63 : f32 to vector<16x1xf32>
    %179 = arith.divf %177, %178 : vector<16x1xf32>
    %180 = vector.broadcast %179 : vector<16x1xf32> to vector<16x32xf32>
    %181 = arith.subf %175, %180 : vector<16x32xf32>
    %182 = arith.mulf %181, %181 : vector<16x32xf32>
    %cst_64 = arith.constant dense<0.000000e+00> : vector<16xf32>
    %183 = vector.multi_reduction <add>, %182, %cst_64 [1] : vector<16x32xf32> to vector<16xf32>
    %184 = vector.shape_cast %183 : vector<16xf32> to vector<16x1xf32>
    %cst_65 = arith.constant 3.200000e+01 : f32
    %185 = vector.broadcast %cst_65 : f32 to vector<16x1xf32>
    %186 = arith.divf %184, %185 : vector<16x1xf32>
    %cst_66 = arith.constant 9.99999974E-6 : f32
    %187 = vector.broadcast %cst_66 : f32 to vector<16x1xf32>
    %188 = arith.addf %186, %187 : vector<16x1xf32>
    %189 = math.rsqrt %188 : vector<16x1xf32>
    %190 = vector.broadcast %189 : vector<16x1xf32> to vector<16x32xf32>
    %191 = arith.mulf %181, %190 : vector<16x32xf32>
    %c144 = arith.constant 144 : index
    %c0_67 = arith.constant 0 : index
    %192 = vector.load %arg2[%c144, %c0_67] : memref<288x128xf32, #tpu.memory_space<vmem>>, vector<1x32xf32>
    %193 = vector.broadcast %192 : vector<1x32xf32> to vector<16x32xf32>
    %194 = arith.mulf %191, %193 : vector<16x32xf32>
    %c152 = arith.constant 152 : index
    %c0_68 = arith.constant 0 : index
    %195 = vector.load %arg2[%c152, %c0_68] : memref<288x128xf32, #tpu.memory_space<vmem>>, vector<1x32xf32>
    %196 = vector.broadcast %195 : vector<1x32xf32> to vector<16x32xf32>
    %197 = arith.addf %194, %196 : vector<16x32xf32>
    %c16 = arith.constant 16 : index
    %c0_69 = arith.constant 0 : index
    %198 = vector.load %arg0[%c16, %c0_69] : memref<32x16xf32, #tpu.memory_space<vmem>>, vector<16x16xf32>
    %199 = arith.truncf %198 : vector<16x16xf32> to vector<16x16xbf16>
    %c80_70 = arith.constant 80 : index
    %c0_71 = arith.constant 0 : index
    %200 = vector.load %arg1[%c80_70, %c0_71] : memref<800x128xbf16, #tpu.memory_space<vmem>>, vector<16x32xbf16>
    %cst_72 = arith.constant dense<0.000000e+00> : vector<16x32xf32>
    %201 = tpu.matmul %199, %200, %cst_72 {dimension_numbers = #tpu.dot_dimension_numbers<[1], [0], [0], [1], [0, 0, 1, 1], [], []>} : vector<16x16xbf16>, vector<16x32xbf16>, vector<16x32xf32> -> vector<16x32xf32>
    %c16_73 = arith.constant 16 : index
    %c0_74 = arith.constant 0 : index
    %202 = vector.load %arg2[%c16_73, %c0_74] : memref<288x128xf32, #tpu.memory_space<vmem>>, vector<16x32xf32>
    %203 = arith.addf %201, %202 : vector<16x32xf32>
    %204 = arith.truncf %203 : vector<16x32xf32> to vector<16x32xbf16>
    %c48_75 = arith.constant 48 : index
    %c0_76 = arith.constant 0 : index
    %205 = vector.load %arg1[%c48_75, %c0_76] : memref<800x128xbf16, #tpu.memory_space<vmem>>, vector<16x16xbf16>
    %cst_77 = arith.constant dense<0.000000e+00> : vector<16x32xf32>
    %206 = tpu.matmul %205, %204, %cst_77 {dimension_numbers = #tpu.dot_dimension_numbers<[1], [0], [0], [1], [0, 0, 1, 1], [], []>} : vector<16x16xbf16>, vector<16x32xbf16>, vector<16x32xf32> -> vector<16x32xf32>
    %207 = arith.truncf %206 : vector<16x32xf32> to vector<16x32xbf16>
    %c16_78 = arith.constant 16 : index
    %c0_79 = arith.constant 0 : index
    %208 = vector.load %arg1[%c16_78, %c0_79] : memref<800x128xbf16, #tpu.memory_space<vmem>>, vector<16x16xbf16>
    %cst_80 = arith.constant dense<0.000000e+00> : vector<16x32xf32>
    %209 = tpu.matmul %208, %204, %cst_80 {dimension_numbers = #tpu.dot_dimension_numbers<[1], [0], [0], [1], [0, 0, 1, 1], [], []>} : vector<16x16xbf16>, vector<16x32xbf16>, vector<16x32xf32> -> vector<16x32xf32>
    %210 = arith.truncf %209 : vector<16x32xf32> to vector<16x32xbf16>
    %211 = tpu.concatenate %207, %210, %204 in 1 : vector<16x32xbf16>, vector<16x32xbf16>, vector<16x32xbf16> -> vector<16x96xbf16>
    %c320 = arith.constant 320 : index
    %c0_81 = arith.constant 0 : index
    %212 = vector.load %arg1[%c320, %c0_81] : memref<800x128xbf16, #tpu.memory_space<vmem>>, vector<96x96xbf16>
    %cst_82 = arith.constant dense<0.000000e+00> : vector<16x96xf32>
    %213 = tpu.matmul %211, %212, %cst_82 {dimension_numbers = #tpu.dot_dimension_numbers<[1], [0], [0], [1], [0, 0, 1, 1], [], []>} : vector<16x96xbf16>, vector<96x96xbf16>, vector<16x96xf32> -> vector<16x96xf32>
    %c160 = arith.constant 160 : index
    %c0_83 = arith.constant 0 : index
    %214 = vector.load %arg2[%c160, %c0_83] : memref<288x128xf32, #tpu.memory_space<vmem>>, vector<1x96xf32>
    %215 = vector.broadcast %214 : vector<1x96xf32> to vector<16x96xf32>
    %216 = arith.addf %213, %215 : vector<16x96xf32>
    %217 = vector.extract_strided_slice %216 {offsets = [0, 0], sizes = [16, 32], strides = [1, 1]} : vector<16x96xf32> to vector<16x32xf32>
    %218 = vector.extract_strided_slice %216 {offsets = [0, 32], sizes = [16, 32], strides = [1, 1]} : vector<16x96xf32> to vector<16x32xf32>
    %219 = vector.extract_strided_slice %216 {offsets = [0, 64], sizes = [16, 32], strides = [1, 1]} : vector<16x96xf32> to vector<16x32xf32>
    %cst_84 = arith.constant 0.353553385 : f32
    %220 = vector.broadcast %cst_84 : f32 to vector<16x32xf32>
    %221 = arith.mulf %217, %220 : vector<16x32xf32>
    %222 = arith.truncf %221 : vector<16x32xf32> to vector<16x32xbf16>
    %223 = arith.truncf %218 : vector<16x32xf32> to vector<16x32xbf16>
    %224 = arith.truncf %219 : vector<16x32xf32> to vector<16x32xbf16>
    %225 = vector.extract_strided_slice %222 {offsets = [0, 0], sizes = [16, 8], strides = [1, 1]} : vector<16x32xbf16> to vector<16x8xbf16>
    %226 = vector.extract_strided_slice %223 {offsets = [0, 0], sizes = [16, 8], strides = [1, 1]} : vector<16x32xbf16> to vector<16x8xbf16>
    %cst_85 = arith.constant dense<0.000000e+00> : vector<16x16xf32>
    %227 = tpu.matmul %225, %226, %cst_85 {dimension_numbers = #tpu.dot_dimension_numbers<[1], [1], [0], [0], [0, 0, 1, 0], [], []>} : vector<16x8xbf16>, vector<16x8xbf16>, vector<16x16xf32> -> vector<16x16xf32>
    %228 = arith.addf %227, %1 : vector<16x16xf32>
    %cst_86 = arith.constant dense<0xFF800000> : vector<16xf32>
    %229 = vector.multi_reduction <maximumf>, %228, %cst_86 [1] : vector<16x16xf32> to vector<16xf32>
    %230 = vector.shape_cast %229 : vector<16xf32> to vector<16x1xf32>
    %231 = vector.broadcast %230 : vector<16x1xf32> to vector<16x16xf32>
    %232 = arith.subf %228, %231 : vector<16x16xf32>
    %233 = math.exp %232 : vector<16x16xf32>
    %cst_87 = arith.constant dense<0.000000e+00> : vector<16xf32>
    %234 = vector.multi_reduction <add>, %233, %cst_87 [1] : vector<16x16xf32> to vector<16xf32>
    %235 = vector.shape_cast %234 : vector<16xf32> to vector<16x1xf32>
    %236 = tpu.reciprocal %235 {approx = true} : vector<16x1xf32> -> vector<16x1xf32>
    %237 = vector.broadcast %236 : vector<16x1xf32> to vector<16x16xf32>
    %238 = arith.mulf %233, %237 : vector<16x16xf32>
    %239 = arith.truncf %238 : vector<16x16xf32> to vector<16x16xbf16>
    %240 = vector.extract_strided_slice %224 {offsets = [0, 0], sizes = [16, 8], strides = [1, 1]} : vector<16x32xbf16> to vector<16x8xbf16>
    %cst_88 = arith.constant dense<0.000000e+00> : vector<16x8xf32>
    %241 = tpu.matmul %239, %240, %cst_88 {dimension_numbers = #tpu.dot_dimension_numbers<[1], [0], [0], [1], [0, 0, 1, 1], [], []>} : vector<16x16xbf16>, vector<16x8xbf16>, vector<16x8xf32> -> vector<16x8xf32>
    %242 = vector.extract_strided_slice %222 {offsets = [0, 8], sizes = [16, 8], strides = [1, 1]} : vector<16x32xbf16> to vector<16x8xbf16>
    %243 = vector.extract_strided_slice %223 {offsets = [0, 8], sizes = [16, 8], strides = [1, 1]} : vector<16x32xbf16> to vector<16x8xbf16>
    %cst_89 = arith.constant dense<0.000000e+00> : vector<16x16xf32>
    %244 = tpu.matmul %242, %243, %cst_89 {dimension_numbers = #tpu.dot_dimension_numbers<[1], [1], [0], [0], [0, 0, 1, 0], [], []>} : vector<16x8xbf16>, vector<16x8xbf16>, vector<16x16xf32> -> vector<16x16xf32>
    %245 = arith.addf %244, %1 : vector<16x16xf32>
    %cst_90 = arith.constant dense<0xFF800000> : vector<16xf32>
    %246 = vector.multi_reduction <maximumf>, %245, %cst_90 [1] : vector<16x16xf32> to vector<16xf32>
    %247 = vector.shape_cast %246 : vector<16xf32> to vector<16x1xf32>
    %248 = vector.broadcast %247 : vector<16x1xf32> to vector<16x16xf32>
    %249 = arith.subf %245, %248 : vector<16x16xf32>
    %250 = math.exp %249 : vector<16x16xf32>
    %cst_91 = arith.constant dense<0.000000e+00> : vector<16xf32>
    %251 = vector.multi_reduction <add>, %250, %cst_91 [1] : vector<16x16xf32> to vector<16xf32>
    %252 = vector.shape_cast %251 : vector<16xf32> to vector<16x1xf32>
    %253 = tpu.reciprocal %252 {approx = true} : vector<16x1xf32> -> vector<16x1xf32>
    %254 = vector.broadcast %253 : vector<16x1xf32> to vector<16x16xf32>
    %255 = arith.mulf %250, %254 : vector<16x16xf32>
    %256 = arith.truncf %255 : vector<16x16xf32> to vector<16x16xbf16>
    %257 = vector.extract_strided_slice %224 {offsets = [0, 8], sizes = [16, 8], strides = [1, 1]} : vector<16x32xbf16> to vector<16x8xbf16>
    %cst_92 = arith.constant dense<0.000000e+00> : vector<16x8xf32>
    %258 = tpu.matmul %256, %257, %cst_92 {dimension_numbers = #tpu.dot_dimension_numbers<[1], [0], [0], [1], [0, 0, 1, 1], [], []>} : vector<16x16xbf16>, vector<16x8xbf16>, vector<16x8xf32> -> vector<16x8xf32>
    %259 = vector.extract_strided_slice %222 {offsets = [0, 16], sizes = [16, 8], strides = [1, 1]} : vector<16x32xbf16> to vector<16x8xbf16>
    %260 = vector.extract_strided_slice %223 {offsets = [0, 16], sizes = [16, 8], strides = [1, 1]} : vector<16x32xbf16> to vector<16x8xbf16>
    %cst_93 = arith.constant dense<0.000000e+00> : vector<16x16xf32>
    %261 = tpu.matmul %259, %260, %cst_93 {dimension_numbers = #tpu.dot_dimension_numbers<[1], [1], [0], [0], [0, 0, 1, 0], [], []>} : vector<16x8xbf16>, vector<16x8xbf16>, vector<16x16xf32> -> vector<16x16xf32>
    %262 = arith.addf %261, %1 : vector<16x16xf32>
    %cst_94 = arith.constant dense<0xFF800000> : vector<16xf32>
    %263 = vector.multi_reduction <maximumf>, %262, %cst_94 [1] : vector<16x16xf32> to vector<16xf32>
    %264 = vector.shape_cast %263 : vector<16xf32> to vector<16x1xf32>
    %265 = vector.broadcast %264 : vector<16x1xf32> to vector<16x16xf32>
    %266 = arith.subf %262, %265 : vector<16x16xf32>
    %267 = math.exp %266 : vector<16x16xf32>
    %cst_95 = arith.constant dense<0.000000e+00> : vector<16xf32>
    %268 = vector.multi_reduction <add>, %267, %cst_95 [1] : vector<16x16xf32> to vector<16xf32>
    %269 = vector.shape_cast %268 : vector<16xf32> to vector<16x1xf32>
    %270 = tpu.reciprocal %269 {approx = true} : vector<16x1xf32> -> vector<16x1xf32>
    %271 = vector.broadcast %270 : vector<16x1xf32> to vector<16x16xf32>
    %272 = arith.mulf %267, %271 : vector<16x16xf32>
    %273 = arith.truncf %272 : vector<16x16xf32> to vector<16x16xbf16>
    %274 = vector.extract_strided_slice %224 {offsets = [0, 16], sizes = [16, 8], strides = [1, 1]} : vector<16x32xbf16> to vector<16x8xbf16>
    %cst_96 = arith.constant dense<0.000000e+00> : vector<16x8xf32>
    %275 = tpu.matmul %273, %274, %cst_96 {dimension_numbers = #tpu.dot_dimension_numbers<[1], [0], [0], [1], [0, 0, 1, 1], [], []>} : vector<16x16xbf16>, vector<16x8xbf16>, vector<16x8xf32> -> vector<16x8xf32>
    %276 = vector.extract_strided_slice %222 {offsets = [0, 24], sizes = [16, 8], strides = [1, 1]} : vector<16x32xbf16> to vector<16x8xbf16>
    %277 = vector.extract_strided_slice %223 {offsets = [0, 24], sizes = [16, 8], strides = [1, 1]} : vector<16x32xbf16> to vector<16x8xbf16>
    %cst_97 = arith.constant dense<0.000000e+00> : vector<16x16xf32>
    %278 = tpu.matmul %276, %277, %cst_97 {dimension_numbers = #tpu.dot_dimension_numbers<[1], [1], [0], [0], [0, 0, 1, 0], [], []>} : vector<16x8xbf16>, vector<16x8xbf16>, vector<16x16xf32> -> vector<16x16xf32>
    %279 = arith.addf %278, %1 : vector<16x16xf32>
    %cst_98 = arith.constant dense<0xFF800000> : vector<16xf32>
    %280 = vector.multi_reduction <maximumf>, %279, %cst_98 [1] : vector<16x16xf32> to vector<16xf32>
    %281 = vector.shape_cast %280 : vector<16xf32> to vector<16x1xf32>
    %282 = vector.broadcast %281 : vector<16x1xf32> to vector<16x16xf32>
    %283 = arith.subf %279, %282 : vector<16x16xf32>
    %284 = math.exp %283 : vector<16x16xf32>
    %cst_99 = arith.constant dense<0.000000e+00> : vector<16xf32>
    %285 = vector.multi_reduction <add>, %284, %cst_99 [1] : vector<16x16xf32> to vector<16xf32>
    %286 = vector.shape_cast %285 : vector<16xf32> to vector<16x1xf32>
    %287 = tpu.reciprocal %286 {approx = true} : vector<16x1xf32> -> vector<16x1xf32>
    %288 = vector.broadcast %287 : vector<16x1xf32> to vector<16x16xf32>
    %289 = arith.mulf %284, %288 : vector<16x16xf32>
    %290 = arith.truncf %289 : vector<16x16xf32> to vector<16x16xbf16>
    %291 = vector.extract_strided_slice %224 {offsets = [0, 24], sizes = [16, 8], strides = [1, 1]} : vector<16x32xbf16> to vector<16x8xbf16>
    %cst_100 = arith.constant dense<0.000000e+00> : vector<16x8xf32>
    %292 = tpu.matmul %290, %291, %cst_100 {dimension_numbers = #tpu.dot_dimension_numbers<[1], [0], [0], [1], [0, 0, 1, 1], [], []>} : vector<16x16xbf16>, vector<16x8xbf16>, vector<16x8xf32> -> vector<16x8xf32>
    %293 = tpu.concatenate %241, %258, %275, %292 in 1 : vector<16x8xf32>, vector<16x8xf32>, vector<16x8xf32>, vector<16x8xf32> -> vector<16x32xf32>
    %294 = arith.truncf %293 : vector<16x32xf32> to vector<16x32xbf16>
    %c416 = arith.constant 416 : index
    %c0_101 = arith.constant 0 : index
    %295 = vector.load %arg1[%c416, %c0_101] : memref<800x128xbf16, #tpu.memory_space<vmem>>, vector<32x32xbf16>
    %cst_102 = arith.constant dense<0.000000e+00> : vector<16x32xf32>
    %296 = tpu.matmul %294, %295, %cst_102 {dimension_numbers = #tpu.dot_dimension_numbers<[1], [0], [0], [1], [0, 0, 1, 1], [], []>} : vector<16x32xbf16>, vector<32x32xbf16>, vector<16x32xf32> -> vector<16x32xf32>
    %c168 = arith.constant 168 : index
    %c0_103 = arith.constant 0 : index
    %297 = vector.load %arg2[%c168, %c0_103] : memref<288x128xf32, #tpu.memory_space<vmem>>, vector<1x32xf32>
    %298 = vector.broadcast %297 : vector<1x32xf32> to vector<16x32xf32>
    %299 = arith.addf %296, %298 : vector<16x32xf32>
    %300 = arith.addf %203, %299 : vector<16x32xf32>
    %cst_104 = arith.constant dense<0.000000e+00> : vector<16xf32>
    %301 = vector.multi_reduction <add>, %300, %cst_104 [1] : vector<16x32xf32> to vector<16xf32>
    %302 = vector.shape_cast %301 : vector<16xf32> to vector<16x1xf32>
    %cst_105 = arith.constant 3.200000e+01 : f32
    %303 = vector.broadcast %cst_105 : f32 to vector<16x1xf32>
    %304 = arith.divf %302, %303 : vector<16x1xf32>
    %305 = vector.broadcast %304 : vector<16x1xf32> to vector<16x32xf32>
    %306 = arith.subf %300, %305 : vector<16x32xf32>
    %307 = arith.mulf %306, %306 : vector<16x32xf32>
    %cst_106 = arith.constant dense<0.000000e+00> : vector<16xf32>
    %308 = vector.multi_reduction <add>, %307, %cst_106 [1] : vector<16x32xf32> to vector<16xf32>
    %309 = vector.shape_cast %308 : vector<16xf32> to vector<16x1xf32>
    %cst_107 = arith.constant 3.200000e+01 : f32
    %310 = vector.broadcast %cst_107 : f32 to vector<16x1xf32>
    %311 = arith.divf %309, %310 : vector<16x1xf32>
    %cst_108 = arith.constant 9.99999974E-6 : f32
    %312 = vector.broadcast %cst_108 : f32 to vector<16x1xf32>
    %313 = arith.addf %311, %312 : vector<16x1xf32>
    %314 = math.rsqrt %313 : vector<16x1xf32>
    %315 = vector.broadcast %314 : vector<16x1xf32> to vector<16x32xf32>
    %316 = arith.mulf %306, %315 : vector<16x32xf32>
    %c176 = arith.constant 176 : index
    %c0_109 = arith.constant 0 : index
    %317 = vector.load %arg2[%c176, %c0_109] : memref<288x128xf32, #tpu.memory_space<vmem>>, vector<1x32xf32>
    %318 = vector.broadcast %317 : vector<1x32xf32> to vector<16x32xf32>
    %319 = arith.mulf %316, %318 : vector<16x32xf32>
    %c184 = arith.constant 184 : index
    %c0_110 = arith.constant 0 : index
    %320 = vector.load %arg2[%c184, %c0_110] : memref<288x128xf32, #tpu.memory_space<vmem>>, vector<1x32xf32>
    %321 = vector.broadcast %320 : vector<1x32xf32> to vector<16x32xf32>
    %322 = arith.addf %319, %321 : vector<16x32xf32>
    %323 = arith.truncf %322 : vector<16x32xf32> to vector<16x32xbf16>
    %c48_111 = arith.constant 48 : index
    %c0_112 = arith.constant 0 : index
    %324 = vector.load %arg1[%c48_111, %c0_112] : memref<800x128xbf16, #tpu.memory_space<vmem>>, vector<16x16xbf16>
    %cst_113 = arith.constant dense<0.000000e+00> : vector<16x32xf32>
    %325 = tpu.matmul %324, %323, %cst_113 {dimension_numbers = #tpu.dot_dimension_numbers<[1], [0], [0], [1], [0, 0, 1, 1], [], []>} : vector<16x16xbf16>, vector<16x32xbf16>, vector<16x32xf32> -> vector<16x32xf32>
    %326 = arith.truncf %325 : vector<16x32xf32> to vector<16x32xbf16>
    %c16_114 = arith.constant 16 : index
    %c0_115 = arith.constant 0 : index
    %327 = vector.load %arg1[%c16_114, %c0_115] : memref<800x128xbf16, #tpu.memory_space<vmem>>, vector<16x16xbf16>
    %cst_116 = arith.constant dense<0.000000e+00> : vector<16x32xf32>
    %328 = tpu.matmul %327, %323, %cst_116 {dimension_numbers = #tpu.dot_dimension_numbers<[1], [0], [0], [1], [0, 0, 1, 1], [], []>} : vector<16x16xbf16>, vector<16x32xbf16>, vector<16x32xf32> -> vector<16x32xf32>
    %329 = arith.truncf %328 : vector<16x32xf32> to vector<16x32xbf16>
    %330 = tpu.concatenate %326, %329, %323 in 1 : vector<16x32xbf16>, vector<16x32xbf16>, vector<16x32xbf16> -> vector<16x96xbf16>
    %c448 = arith.constant 448 : index
    %c0_117 = arith.constant 0 : index
    %331 = vector.load %arg1[%c448, %c0_117] : memref<800x128xbf16, #tpu.memory_space<vmem>>, vector<96x32xbf16>
    %cst_118 = arith.constant dense<0.000000e+00> : vector<16x32xf32>
    %332 = tpu.matmul %330, %331, %cst_118 {dimension_numbers = #tpu.dot_dimension_numbers<[1], [0], [0], [1], [0, 0, 1, 1], [], []>} : vector<16x96xbf16>, vector<96x32xbf16>, vector<16x32xf32> -> vector<16x32xf32>
    %c192_119 = arith.constant 192 : index
    %c0_120 = arith.constant 0 : index
    %333 = vector.load %arg2[%c192_119, %c0_120] : memref<288x128xf32, #tpu.memory_space<vmem>>, vector<1x32xf32>
    %334 = vector.broadcast %333 : vector<1x32xf32> to vector<16x32xf32>
    %335 = arith.addf %332, %334 : vector<16x32xf32>
    %336 = arith.truncf %197 : vector<16x32xf32> to vector<16x32xbf16>
    %c32_121 = arith.constant 32 : index
    %c0_122 = arith.constant 0 : index
    %337 = vector.load %arg1[%c32_121, %c0_122] : memref<800x128xbf16, #tpu.memory_space<vmem>>, vector<16x16xbf16>
    %cst_123 = arith.constant dense<0.000000e+00> : vector<16x32xf32>
    %338 = tpu.matmul %337, %336, %cst_123 {dimension_numbers = #tpu.dot_dimension_numbers<[1], [0], [0], [1], [0, 0, 1, 1], [], []>} : vector<16x16xbf16>, vector<16x32xbf16>, vector<16x32xf32> -> vector<16x32xf32>
    %339 = arith.truncf %338 : vector<16x32xf32> to vector<16x32xbf16>
    %c0_124 = arith.constant 0 : index
    %c0_125 = arith.constant 0 : index
    %340 = vector.load %arg1[%c0_124, %c0_125] : memref<800x128xbf16, #tpu.memory_space<vmem>>, vector<16x16xbf16>
    %cst_126 = arith.constant dense<0.000000e+00> : vector<16x32xf32>
    %341 = tpu.matmul %340, %336, %cst_126 {dimension_numbers = #tpu.dot_dimension_numbers<[1], [0], [0], [1], [0, 0, 1, 1], [], []>} : vector<16x16xbf16>, vector<16x32xbf16>, vector<16x32xf32> -> vector<16x32xf32>
    %342 = arith.truncf %341 : vector<16x32xf32> to vector<16x32xbf16>
    %343 = tpu.concatenate %339, %342, %336 in 1 : vector<16x32xbf16>, vector<16x32xbf16>, vector<16x32xbf16> -> vector<16x96xbf16>
    %c544 = arith.constant 544 : index
    %c0_127 = arith.constant 0 : index
    %344 = vector.load %arg1[%c544, %c0_127] : memref<800x128xbf16, #tpu.memory_space<vmem>>, vector<96x64xbf16>
    %cst_128 = arith.constant dense<0.000000e+00> : vector<16x64xf32>
    %345 = tpu.matmul %343, %344, %cst_128 {dimension_numbers = #tpu.dot_dimension_numbers<[1], [0], [0], [1], [0, 0, 1, 1], [], []>} : vector<16x96xbf16>, vector<96x64xbf16>, vector<16x64xf32> -> vector<16x64xf32>
    %c200 = arith.constant 200 : index
    %c0_129 = arith.constant 0 : index
    %346 = vector.load %arg2[%c200, %c0_129] : memref<288x128xf32, #tpu.memory_space<vmem>>, vector<1x64xf32>
    %347 = vector.broadcast %346 : vector<1x64xf32> to vector<16x64xf32>
    %348 = arith.addf %345, %347 : vector<16x64xf32>
    %349 = vector.extract_strided_slice %348 {offsets = [0, 0], sizes = [16, 32], strides = [1, 1]} : vector<16x64xf32> to vector<16x32xf32>
    %350 = vector.extract_strided_slice %348 {offsets = [0, 32], sizes = [16, 32], strides = [1, 1]} : vector<16x64xf32> to vector<16x32xf32>
    %cst_130 = arith.constant 0.353553385 : f32
    %351 = vector.broadcast %cst_130 : f32 to vector<16x32xf32>
    %352 = arith.mulf %335, %351 : vector<16x32xf32>
    %353 = arith.truncf %352 : vector<16x32xf32> to vector<16x32xbf16>
    %354 = arith.truncf %349 : vector<16x32xf32> to vector<16x32xbf16>
    %355 = arith.truncf %350 : vector<16x32xf32> to vector<16x32xbf16>
    %356 = vector.extract_strided_slice %353 {offsets = [0, 0], sizes = [16, 8], strides = [1, 1]} : vector<16x32xbf16> to vector<16x8xbf16>
    %357 = vector.extract_strided_slice %354 {offsets = [0, 0], sizes = [16, 8], strides = [1, 1]} : vector<16x32xbf16> to vector<16x8xbf16>
    %cst_131 = arith.constant dense<0.000000e+00> : vector<16x16xf32>
    %358 = tpu.matmul %356, %357, %cst_131 {dimension_numbers = #tpu.dot_dimension_numbers<[1], [1], [0], [0], [0, 0, 1, 0], [], []>} : vector<16x8xbf16>, vector<16x8xbf16>, vector<16x16xf32> -> vector<16x16xf32>
    %359 = arith.addf %358, %2 : vector<16x16xf32>
    %cst_132 = arith.constant dense<0xFF800000> : vector<16xf32>
    %360 = vector.multi_reduction <maximumf>, %359, %cst_132 [1] : vector<16x16xf32> to vector<16xf32>
    %361 = vector.shape_cast %360 : vector<16xf32> to vector<16x1xf32>
    %362 = vector.broadcast %361 : vector<16x1xf32> to vector<16x16xf32>
    %363 = arith.subf %359, %362 : vector<16x16xf32>
    %364 = math.exp %363 : vector<16x16xf32>
    %cst_133 = arith.constant dense<0.000000e+00> : vector<16xf32>
    %365 = vector.multi_reduction <add>, %364, %cst_133 [1] : vector<16x16xf32> to vector<16xf32>
    %366 = vector.shape_cast %365 : vector<16xf32> to vector<16x1xf32>
    %367 = tpu.reciprocal %366 {approx = true} : vector<16x1xf32> -> vector<16x1xf32>
    %368 = vector.broadcast %367 : vector<16x1xf32> to vector<16x16xf32>
    %369 = arith.mulf %364, %368 : vector<16x16xf32>
    %370 = arith.truncf %369 : vector<16x16xf32> to vector<16x16xbf16>
    %371 = vector.extract_strided_slice %355 {offsets = [0, 0], sizes = [16, 8], strides = [1, 1]} : vector<16x32xbf16> to vector<16x8xbf16>
    %cst_134 = arith.constant dense<0.000000e+00> : vector<16x8xf32>
    %372 = tpu.matmul %370, %371, %cst_134 {dimension_numbers = #tpu.dot_dimension_numbers<[1], [0], [0], [1], [0, 0, 1, 1], [], []>} : vector<16x16xbf16>, vector<16x8xbf16>, vector<16x8xf32> -> vector<16x8xf32>
    %373 = vector.extract_strided_slice %353 {offsets = [0, 8], sizes = [16, 8], strides = [1, 1]} : vector<16x32xbf16> to vector<16x8xbf16>
    %374 = vector.extract_strided_slice %354 {offsets = [0, 8], sizes = [16, 8], strides = [1, 1]} : vector<16x32xbf16> to vector<16x8xbf16>
    %cst_135 = arith.constant dense<0.000000e+00> : vector<16x16xf32>
    %375 = tpu.matmul %373, %374, %cst_135 {dimension_numbers = #tpu.dot_dimension_numbers<[1], [1], [0], [0], [0, 0, 1, 0], [], []>} : vector<16x8xbf16>, vector<16x8xbf16>, vector<16x16xf32> -> vector<16x16xf32>
    %376 = arith.addf %375, %2 : vector<16x16xf32>
    %cst_136 = arith.constant dense<0xFF800000> : vector<16xf32>
    %377 = vector.multi_reduction <maximumf>, %376, %cst_136 [1] : vector<16x16xf32> to vector<16xf32>
    %378 = vector.shape_cast %377 : vector<16xf32> to vector<16x1xf32>
    %379 = vector.broadcast %378 : vector<16x1xf32> to vector<16x16xf32>
    %380 = arith.subf %376, %379 : vector<16x16xf32>
    %381 = math.exp %380 : vector<16x16xf32>
    %cst_137 = arith.constant dense<0.000000e+00> : vector<16xf32>
    %382 = vector.multi_reduction <add>, %381, %cst_137 [1] : vector<16x16xf32> to vector<16xf32>
    %383 = vector.shape_cast %382 : vector<16xf32> to vector<16x1xf32>
    %384 = tpu.reciprocal %383 {approx = true} : vector<16x1xf32> -> vector<16x1xf32>
    %385 = vector.broadcast %384 : vector<16x1xf32> to vector<16x16xf32>
    %386 = arith.mulf %381, %385 : vector<16x16xf32>
    %387 = arith.truncf %386 : vector<16x16xf32> to vector<16x16xbf16>
    %388 = vector.extract_strided_slice %355 {offsets = [0, 8], sizes = [16, 8], strides = [1, 1]} : vector<16x32xbf16> to vector<16x8xbf16>
    %cst_138 = arith.constant dense<0.000000e+00> : vector<16x8xf32>
    %389 = tpu.matmul %387, %388, %cst_138 {dimension_numbers = #tpu.dot_dimension_numbers<[1], [0], [0], [1], [0, 0, 1, 1], [], []>} : vector<16x16xbf16>, vector<16x8xbf16>, vector<16x8xf32> -> vector<16x8xf32>
    %390 = vector.extract_strided_slice %353 {offsets = [0, 16], sizes = [16, 8], strides = [1, 1]} : vector<16x32xbf16> to vector<16x8xbf16>
    %391 = vector.extract_strided_slice %354 {offsets = [0, 16], sizes = [16, 8], strides = [1, 1]} : vector<16x32xbf16> to vector<16x8xbf16>
    %cst_139 = arith.constant dense<0.000000e+00> : vector<16x16xf32>
    %392 = tpu.matmul %390, %391, %cst_139 {dimension_numbers = #tpu.dot_dimension_numbers<[1], [1], [0], [0], [0, 0, 1, 0], [], []>} : vector<16x8xbf16>, vector<16x8xbf16>, vector<16x16xf32> -> vector<16x16xf32>
    %393 = arith.addf %392, %2 : vector<16x16xf32>
    %cst_140 = arith.constant dense<0xFF800000> : vector<16xf32>
    %394 = vector.multi_reduction <maximumf>, %393, %cst_140 [1] : vector<16x16xf32> to vector<16xf32>
    %395 = vector.shape_cast %394 : vector<16xf32> to vector<16x1xf32>
    %396 = vector.broadcast %395 : vector<16x1xf32> to vector<16x16xf32>
    %397 = arith.subf %393, %396 : vector<16x16xf32>
    %398 = math.exp %397 : vector<16x16xf32>
    %cst_141 = arith.constant dense<0.000000e+00> : vector<16xf32>
    %399 = vector.multi_reduction <add>, %398, %cst_141 [1] : vector<16x16xf32> to vector<16xf32>
    %400 = vector.shape_cast %399 : vector<16xf32> to vector<16x1xf32>
    %401 = tpu.reciprocal %400 {approx = true} : vector<16x1xf32> -> vector<16x1xf32>
    %402 = vector.broadcast %401 : vector<16x1xf32> to vector<16x16xf32>
    %403 = arith.mulf %398, %402 : vector<16x16xf32>
    %404 = arith.truncf %403 : vector<16x16xf32> to vector<16x16xbf16>
    %405 = vector.extract_strided_slice %355 {offsets = [0, 16], sizes = [16, 8], strides = [1, 1]} : vector<16x32xbf16> to vector<16x8xbf16>
    %cst_142 = arith.constant dense<0.000000e+00> : vector<16x8xf32>
    %406 = tpu.matmul %404, %405, %cst_142 {dimension_numbers = #tpu.dot_dimension_numbers<[1], [0], [0], [1], [0, 0, 1, 1], [], []>} : vector<16x16xbf16>, vector<16x8xbf16>, vector<16x8xf32> -> vector<16x8xf32>
    %407 = vector.extract_strided_slice %353 {offsets = [0, 24], sizes = [16, 8], strides = [1, 1]} : vector<16x32xbf16> to vector<16x8xbf16>
    %408 = vector.extract_strided_slice %354 {offsets = [0, 24], sizes = [16, 8], strides = [1, 1]} : vector<16x32xbf16> to vector<16x8xbf16>
    %cst_143 = arith.constant dense<0.000000e+00> : vector<16x16xf32>
    %409 = tpu.matmul %407, %408, %cst_143 {dimension_numbers = #tpu.dot_dimension_numbers<[1], [1], [0], [0], [0, 0, 1, 0], [], []>} : vector<16x8xbf16>, vector<16x8xbf16>, vector<16x16xf32> -> vector<16x16xf32>
    %410 = arith.addf %409, %2 : vector<16x16xf32>
    %cst_144 = arith.constant dense<0xFF800000> : vector<16xf32>
    %411 = vector.multi_reduction <maximumf>, %410, %cst_144 [1] : vector<16x16xf32> to vector<16xf32>
    %412 = vector.shape_cast %411 : vector<16xf32> to vector<16x1xf32>
    %413 = vector.broadcast %412 : vector<16x1xf32> to vector<16x16xf32>
    %414 = arith.subf %410, %413 : vector<16x16xf32>
    %415 = math.exp %414 : vector<16x16xf32>
    %cst_145 = arith.constant dense<0.000000e+00> : vector<16xf32>
    %416 = vector.multi_reduction <add>, %415, %cst_145 [1] : vector<16x16xf32> to vector<16xf32>
    %417 = vector.shape_cast %416 : vector<16xf32> to vector<16x1xf32>
    %418 = tpu.reciprocal %417 {approx = true} : vector<16x1xf32> -> vector<16x1xf32>
    %419 = vector.broadcast %418 : vector<16x1xf32> to vector<16x16xf32>
    %420 = arith.mulf %415, %419 : vector<16x16xf32>
    %421 = arith.truncf %420 : vector<16x16xf32> to vector<16x16xbf16>
    %422 = vector.extract_strided_slice %355 {offsets = [0, 24], sizes = [16, 8], strides = [1, 1]} : vector<16x32xbf16> to vector<16x8xbf16>
    %cst_146 = arith.constant dense<0.000000e+00> : vector<16x8xf32>
    %423 = tpu.matmul %421, %422, %cst_146 {dimension_numbers = #tpu.dot_dimension_numbers<[1], [0], [0], [1], [0, 0, 1, 1], [], []>} : vector<16x16xbf16>, vector<16x8xbf16>, vector<16x8xf32> -> vector<16x8xf32>
    %424 = tpu.concatenate %372, %389, %406, %423 in 1 : vector<16x8xf32>, vector<16x8xf32>, vector<16x8xf32>, vector<16x8xf32> -> vector<16x32xf32>
    %425 = arith.truncf %424 : vector<16x32xf32> to vector<16x32xbf16>
    %c640 = arith.constant 640 : index
    %c0_147 = arith.constant 0 : index
    %426 = vector.load %arg1[%c640, %c0_147] : memref<800x128xbf16, #tpu.memory_space<vmem>>, vector<32x32xbf16>
    %cst_148 = arith.constant dense<0.000000e+00> : vector<16x32xf32>
    %427 = tpu.matmul %425, %426, %cst_148 {dimension_numbers = #tpu.dot_dimension_numbers<[1], [0], [0], [1], [0, 0, 1, 1], [], []>} : vector<16x32xbf16>, vector<32x32xbf16>, vector<16x32xf32> -> vector<16x32xf32>
    %c208 = arith.constant 208 : index
    %c0_149 = arith.constant 0 : index
    %428 = vector.load %arg2[%c208, %c0_149] : memref<288x128xf32, #tpu.memory_space<vmem>>, vector<1x32xf32>
    %429 = vector.broadcast %428 : vector<1x32xf32> to vector<16x32xf32>
    %430 = arith.addf %427, %429 : vector<16x32xf32>
    %431 = arith.addf %322, %430 : vector<16x32xf32>
    %cst_150 = arith.constant dense<0.000000e+00> : vector<16xf32>
    %432 = vector.multi_reduction <add>, %431, %cst_150 [1] : vector<16x32xf32> to vector<16xf32>
    %433 = vector.shape_cast %432 : vector<16xf32> to vector<16x1xf32>
    %cst_151 = arith.constant 3.200000e+01 : f32
    %434 = vector.broadcast %cst_151 : f32 to vector<16x1xf32>
    %435 = arith.divf %433, %434 : vector<16x1xf32>
    %436 = vector.broadcast %435 : vector<16x1xf32> to vector<16x32xf32>
    %437 = arith.subf %431, %436 : vector<16x32xf32>
    %438 = arith.mulf %437, %437 : vector<16x32xf32>
    %cst_152 = arith.constant dense<0.000000e+00> : vector<16xf32>
    %439 = vector.multi_reduction <add>, %438, %cst_152 [1] : vector<16x32xf32> to vector<16xf32>
    %440 = vector.shape_cast %439 : vector<16xf32> to vector<16x1xf32>
    %cst_153 = arith.constant 3.200000e+01 : f32
    %441 = vector.broadcast %cst_153 : f32 to vector<16x1xf32>
    %442 = arith.divf %440, %441 : vector<16x1xf32>
    %cst_154 = arith.constant 9.99999974E-6 : f32
    %443 = vector.broadcast %cst_154 : f32 to vector<16x1xf32>
    %444 = arith.addf %442, %443 : vector<16x1xf32>
    %445 = math.rsqrt %444 : vector<16x1xf32>
    %446 = vector.broadcast %445 : vector<16x1xf32> to vector<16x32xf32>
    %447 = arith.mulf %437, %446 : vector<16x32xf32>
    %c216 = arith.constant 216 : index
    %c0_155 = arith.constant 0 : index
    %448 = vector.load %arg2[%c216, %c0_155] : memref<288x128xf32, #tpu.memory_space<vmem>>, vector<1x32xf32>
    %449 = vector.broadcast %448 : vector<1x32xf32> to vector<16x32xf32>
    %450 = arith.mulf %447, %449 : vector<16x32xf32>
    %c224_156 = arith.constant 224 : index
    %c0_157 = arith.constant 0 : index
    %451 = vector.load %arg2[%c224_156, %c0_157] : memref<288x128xf32, #tpu.memory_space<vmem>>, vector<1x32xf32>
    %452 = vector.broadcast %451 : vector<1x32xf32> to vector<16x32xf32>
    %453 = arith.addf %450, %452 : vector<16x32xf32>
    %454 = arith.truncf %453 : vector<16x32xf32> to vector<16x32xbf16>
    %c672 = arith.constant 672 : index
    %c0_158 = arith.constant 0 : index
    %455 = vector.load %arg1[%c672, %c0_158] : memref<800x128xbf16, #tpu.memory_space<vmem>>, vector<32x64xbf16>
    %cst_159 = arith.constant dense<0.000000e+00> : vector<16x64xf32>
    %456 = tpu.matmul %454, %455, %cst_159 {dimension_numbers = #tpu.dot_dimension_numbers<[1], [0], [0], [1], [0, 0, 1, 1], [], []>} : vector<16x32xbf16>, vector<32x64xbf16>, vector<16x64xf32> -> vector<16x64xf32>
    %c232 = arith.constant 232 : index
    %c0_160 = arith.constant 0 : index
    %457 = vector.load %arg2[%c232, %c0_160] : memref<288x128xf32, #tpu.memory_space<vmem>>, vector<1x64xf32>
    %458 = vector.broadcast %457 : vector<1x64xf32> to vector<16x64xf32>
    %459 = arith.addf %456, %458 : vector<16x64xf32>
    %cst_161 = arith.constant 5.000000e-01 : f32
    %460 = vector.broadcast %cst_161 : f32 to vector<16x64xf32>
    %461 = arith.mulf %460, %459 : vector<16x64xf32>
    %cst_162 = arith.constant 4.471500e-02 : f32
    %462 = vector.broadcast %cst_162 : f32 to vector<16x64xf32>
    %463 = arith.mulf %462, %459 : vector<16x64xf32>
    %464 = arith.mulf %463, %459 : vector<16x64xf32>
    %465 = arith.mulf %464, %459 : vector<16x64xf32>
    %466 = arith.addf %459, %465 : vector<16x64xf32>
    %cst_163 = arith.constant 0.797884583 : f32
    %467 = vector.broadcast %cst_163 : f32 to vector<16x64xf32>
    %468 = arith.mulf %467, %466 : vector<16x64xf32>
    %469 = math.tanh %468 : vector<16x64xf32>
    %cst_164 = arith.constant 1.000000e+00 : f32
    %470 = vector.broadcast %cst_164 : f32 to vector<16x64xf32>
    %471 = arith.addf %470, %469 : vector<16x64xf32>
    %472 = arith.mulf %461, %471 : vector<16x64xf32>
    %473 = arith.truncf %472 : vector<16x64xf32> to vector<16x64xbf16>
    %c704 = arith.constant 704 : index
    %c0_165 = arith.constant 0 : index
    %474 = vector.load %arg1[%c704, %c0_165] : memref<800x128xbf16, #tpu.memory_space<vmem>>, vector<64x32xbf16>
    %cst_166 = arith.constant dense<0.000000e+00> : vector<16x32xf32>
    %475 = tpu.matmul %473, %474, %cst_166 {dimension_numbers = #tpu.dot_dimension_numbers<[1], [0], [0], [1], [0, 0, 1, 1], [], []>} : vector<16x64xbf16>, vector<64x32xbf16>, vector<16x32xf32> -> vector<16x32xf32>
    %c240 = arith.constant 240 : index
    %c0_167 = arith.constant 0 : index
    %476 = vector.load %arg2[%c240, %c0_167] : memref<288x128xf32, #tpu.memory_space<vmem>>, vector<1x32xf32>
    %477 = vector.broadcast %476 : vector<1x32xf32> to vector<16x32xf32>
    %478 = arith.addf %475, %477 : vector<16x32xf32>
    %479 = arith.addf %453, %478 : vector<16x32xf32>
    %cst_168 = arith.constant dense<0.000000e+00> : vector<16xf32>
    %480 = vector.multi_reduction <add>, %479, %cst_168 [1] : vector<16x32xf32> to vector<16xf32>
    %481 = vector.shape_cast %480 : vector<16xf32> to vector<16x1xf32>
    %cst_169 = arith.constant 3.200000e+01 : f32
    %482 = vector.broadcast %cst_169 : f32 to vector<16x1xf32>
    %483 = arith.divf %481, %482 : vector<16x1xf32>
    %484 = vector.broadcast %483 : vector<16x1xf32> to vector<16x32xf32>
    %485 = arith.subf %479, %484 : vector<16x32xf32>
    %486 = arith.mulf %485, %485 : vector<16x32xf32>
    %cst_170 = arith.constant dense<0.000000e+00> : vector<16xf32>
    %487 = vector.multi_reduction <add>, %486, %cst_170 [1] : vector<16x32xf32> to vector<16xf32>
    %488 = vector.shape_cast %487 : vector<16xf32> to vector<16x1xf32>
    %cst_171 = arith.constant 3.200000e+01 : f32
    %489 = vector.broadcast %cst_171 : f32 to vector<16x1xf32>
    %490 = arith.divf %488, %489 : vector<16x1xf32>
    %cst_172 = arith.constant 9.99999974E-6 : f32
    %491 = vector.broadcast %cst_172 : f32 to vector<16x1xf32>
    %492 = arith.addf %490, %491 : vector<16x1xf32>
    %493 = math.rsqrt %492 : vector<16x1xf32>
    %494 = vector.broadcast %493 : vector<16x1xf32> to vector<16x32xf32>
    %495 = arith.mulf %485, %494 : vector<16x32xf32>
    %c248 = arith.constant 248 : index
    %c0_173 = arith.constant 0 : index
    %496 = vector.load %arg2[%c248, %c0_173] : memref<288x128xf32, #tpu.memory_space<vmem>>, vector<1x32xf32>
    %497 = vector.broadcast %496 : vector<1x32xf32> to vector<16x32xf32>
    %498 = arith.mulf %495, %497 : vector<16x32xf32>
    %c256_174 = arith.constant 256 : index
    %c0_175 = arith.constant 0 : index
    %499 = vector.load %arg2[%c256_174, %c0_175] : memref<288x128xf32, #tpu.memory_space<vmem>>, vector<1x32xf32>
    %500 = vector.broadcast %499 : vector<1x32xf32> to vector<16x32xf32>
    %501 = arith.addf %498, %500 : vector<16x32xf32>
    %cst_176 = arith.constant dense<0.000000e+00> : vector<16xf32>
    %502 = vector.multi_reduction <add>, %501, %cst_176 [1] : vector<16x32xf32> to vector<16xf32>
    %503 = vector.shape_cast %502 : vector<16xf32> to vector<16x1xf32>
    %cst_177 = arith.constant 3.200000e+01 : f32
    %504 = vector.broadcast %cst_177 : f32 to vector<16x1xf32>
    %505 = arith.divf %503, %504 : vector<16x1xf32>
    %506 = vector.broadcast %505 : vector<16x1xf32> to vector<16x32xf32>
    %507 = arith.subf %501, %506 : vector<16x32xf32>
    %508 = arith.mulf %507, %507 : vector<16x32xf32>
    %cst_178 = arith.constant dense<0.000000e+00> : vector<16xf32>
    %509 = vector.multi_reduction <add>, %508, %cst_178 [1] : vector<16x32xf32> to vector<16xf32>
    %510 = vector.shape_cast %509 : vector<16xf32> to vector<16x1xf32>
    %cst_179 = arith.constant 3.200000e+01 : f32
    %511 = vector.broadcast %cst_179 : f32 to vector<16x1xf32>
    %512 = arith.divf %510, %511 : vector<16x1xf32>
    %cst_180 = arith.constant 9.99999974E-6 : f32
    %513 = vector.broadcast %cst_180 : f32 to vector<16x1xf32>
    %514 = arith.addf %512, %513 : vector<16x1xf32>
    %515 = math.rsqrt %514 : vector<16x1xf32>
    %516 = vector.broadcast %515 : vector<16x1xf32> to vector<16x32xf32>
    %517 = arith.mulf %507, %516 : vector<16x32xf32>
    %c264 = arith.constant 264 : index
    %c0_181 = arith.constant 0 : index
    %518 = vector.load %arg2[%c264, %c0_181] : memref<288x128xf32, #tpu.memory_space<vmem>>, vector<1x32xf32>
    %519 = vector.broadcast %518 : vector<1x32xf32> to vector<16x32xf32>
    %520 = arith.mulf %517, %519 : vector<16x32xf32>
    %c272 = arith.constant 272 : index
    %c0_182 = arith.constant 0 : index
    %521 = vector.load %arg2[%c272, %c0_182] : memref<288x128xf32, #tpu.memory_space<vmem>>, vector<1x32xf32>
    %522 = vector.broadcast %521 : vector<1x32xf32> to vector<16x32xf32>
    %523 = arith.addf %520, %522 : vector<16x32xf32>
    %524 = arith.truncf %523 : vector<16x32xf32> to vector<16x32xbf16>
    %c768 = arith.constant 768 : index
    %c0_183 = arith.constant 0 : index
    %525 = vector.load %arg1[%c768, %c0_183] : memref<800x128xbf16, #tpu.memory_space<vmem>>, vector<32x2xbf16>
    %cst_184 = arith.constant dense<0.000000e+00> : vector<16x2xf32>
    %526 = tpu.matmul %524, %525, %cst_184 {dimension_numbers = #tpu.dot_dimension_numbers<[1], [0], [0], [1], [0, 0, 1, 1], [], []>} : vector<16x32xbf16>, vector<32x2xbf16>, vector<16x2xf32> -> vector<16x2xf32>
    %c280 = arith.constant 280 : index
    %c0_185 = arith.constant 0 : index
    %527 = vector.load %arg2[%c280, %c0_185] : memref<288x128xf32, #tpu.memory_space<vmem>>, vector<1x2xf32>
    %528 = vector.broadcast %527 : vector<1x2xf32> to vector<16x2xf32>
    %529 = arith.addf %526, %528 : vector<16x2xf32>
    %c0_186 = arith.constant 0 : index
    %c0_187 = arith.constant 0 : index
    %530 = vector.load %arg3[%c0_186, %c0_187] : memref<16x2xf32, #tpu.memory_space<vmem>>, vector<16x2xf32>
    tpu.vector_store %arg3[%c0_186, %c0_187], %529 {strides = array<i32>} : memref<16x2xf32, #tpu.memory_space<vmem>>, vector<16x2xf32>,
    return
  }
}

</mosaic_0001>

<bundles_post_ra>
// kernel: model_forward.1
= control target key start
LH: loop header
LB: loop body
LE: loop exit
PB: predicated region body
PF: predicated region fallthrough
CT: control target
= control target key end

     0   :  { %8 = vsyncpa [#allocation3], 0  ;;  %s4268_s12 = smov [#allocation2]   ;;  %s4961_s0 = inlined_call_operand.vmem [shape: f32[32,16], index: 0, kind: input, shape index: {}]   ;;  %s4962_s1 = inlined_call_operand.hbm [shape: bf16[800,128], index: 1, kind: input, shape index: {}]   ;;  %s4963_s2 = inlined_call_operand.vmem [shape: f32[288,128], index: 2, kind: input, shape index: {}]   ;;  %s4964_s3 = inlined_call_operand.vmem [shape: f32[16,2], index: 3, kind: output, shape index: {}]  }
   0x1   :  { %s16_s13 = sshll.u32 %s4268_s12, 4  ;;  %s4244_s16 = scalar_lea.hbm %s4962_s1, 6400  ;;  %s17_s13 = int_to_ptr.vmem [resolvable:$true] %s16_s13 }
   0x2   :  { %p4245_p0 = scmp.ne.s32.totalorder %s4962_s1, %s4244_s16  ;;  %p4248_p1 = scmp.lt.u32.totalorder %s4244_s16, %s4962_s1 }
   0x4   :  { %p4250_p2 = pnand %p4248_p1, %p4245_p0 }
   0x6   :  { %4253 = shalt.err (!%p4250_p2)
}
   0x7   :  { %s4254_s21 = scalar_lea.vmem %s17_s13, 6400  ;;  %p4259_p4 = scmp.lt.s32.totalorder %s17_s13, %s17_s13 }
   0x8   :  { %p4255_p3 = scmp.ne.s32.totalorder %s17_s13, %s4254_s21  ;;  %p4260_p5 = scmp.lt.s32.totalorder %s4254_s21, %s4254_s21 }
   0xa   :  { %p4261_p6 = por %p4260_p5, %p4259_p4 }
   0xc   :  { %p4262_p7 = pnand %p4261_p6, %p4255_p3 }
   0xe   :  { %4265 = shalt.err (!%p4262_p7)
}
   0xf   :  { %s4269_s22 = smov 64   ;;  %s4270_s23 = smov 4  }
  0x10   :  { %22 = dma.hbm_to_vmem [thread:$0]  %s4962_s1, 6400, %s17_s13, [#allocation3], %s4269_s22, %s4269_s22, %s4270_s23  }
  0x11   :  { %4266 = dma.done.wait [#allocation3], 6400  }
  0x12   :  { %4267 = vsyncadd [#allocation3], 4294960896  ;;  %v4271_v0 = vmov 0.0   ;;  %vm4272_vm0 = vmmov 0   ;;  %v4060_v1 = vld [vmem:[#allocation2 + $0x20] sm:$0xff]   ;;  %v36_v3 = vld [vmem:[%s4961_s0 + $0x8] sm:$0xff] }
  0x13   :  { %3656 = vmatprep.subr.bf16.mxu0 %v4271_v0  ;;  %3658 = vmatprep.mubr.msk.bf16.mxu0 %vm4272_vm0, %v4271_v0  ;;  %v35_v2 = vld [vmem:[%s4961_s0] sm:$0xff]  ;;  %vm48_vm1 = vcmask 130048   ;;  %v41_v7 = vld [vmem:[%s4963_s2 + $0x8] sm:$0xff]  ;;  %v4062_v15 = vld [vmem:[#allocation2 + $0x10] sm:$0xff]   ;;  %s4273_s6 = smov 32   ;;  %vm204_vm2 = vcmask 261120  }
  0x14   :  { %3662 = vmatprep.subr.bf16.mxu1 %v4271_v0  ;;  %3664 = vmatprep.mubr.msk.bf16.mxu1 %vm4272_vm0, %v4271_v0  ;;  %v37_v4 = vpack.c.bf16 %v36_v3, %v35_v2  ;;  %v40_v5 = vld [vmem:[%s4963_s2] sm:$0xff]  ;;  %v4063_v16 = vld [vmem:[#allocation2 + $0x30] sm:$0xff]   ;;  %v4064_v17 = vld [vmem:[#allocation2 + $0x38] sm:$0xff]   ;;  %vm208_vm3 = vcmask 523264   ;;  %vm264_vm4 = vcmask 785408   ;;  %s4274_s9 = smov 96  }
  0x15   :  { %3657 = vmatpush3.bf16.msra.mxu0 %v4060_v1  ;;  %v4061_v14 = vld [vmem:[#allocation2] sm:$0xff]   ;;  %v4066_v19 = vld [vmem:[#allocation2 + $0x48] sm:$0xff]   ;;  %v4067_v20 = vld [vmem:[#allocation2 + $0x50] sm:$0xff]   ;;  %vm315_vm5 = vcmask 64512   ;;  %s4275_s14 = smov 88   ;;  %s4276_s15 = smov 120  }
  0x16   :  { %3668 = vmatprep.subr.bf16.mxu0 %v4271_v0  ;;  %v4065_v18 = vld [vmem:[#allocation2 + $0x40] sm:$0xff]   ;;  %v4068_v21 = vld [vmem:[#allocation2 + $0x58] sm:$0xff]   ;;  %v3416_v36 = vld [vmem:[%s4963_s2 + $0x50] ss:$0 sm:$0xff]  ;;  %s4277_s16 = smov 80   ;;  %s4278_s17 = smov 112  }
  0x17   :  { %v4385_v49 = vld [vmem:[%s4963_s2 + $0x20] sm:$0xff]  ;;  %v4390_v51 = vld [vmem:[%s4963_s2 + $0x28] sm:$0xff]  ;;  %s4279_s18 = smov 72   ;;  %s4280_s19 = smov 104   ;;  %vm825_vm6 = vcmask 195584   ;;  %vm3402_vm7 = vcmask 15360  }
  0x18   :  { %3659 = vmatmul.mubr.msk.bf16.vlgmr.msra.gmra.mrb[0].mxu0 %vm48_vm1, %v37_v4  ;;  %s4281_s20 = smov 56   ;;  %s4282_s21 = smov 40  }
  0x19   :  { %3670 = vmatprep.mubr.msk.bf16.mxu0 %vm4272_vm0, %v4271_v0  ;;  %s4283_s23 = smov 48   ;;  %s4284_s24 = smov 8  }
  0x1a   :  { %s4285_s25 = smov 16   ;;  %s4286_s26 = smov 24  }
  0xeb   :  { %v86_v6 = vpop.f32.mrb[0].mxu0 }
  0xec   :  { %v3660_v8 = vpop.f32.mrb[1].mxu0  ;;  %v4343_v10 = vadd.f32 %v86_v6, %v40_v5 }
  0xed   :  { %v89_v9 = vpop.f32.mrb[2].mxu0 }
  0xee   :  { %v4345_v11 = vadd.f32 %v89_v9, %v41_v7  ;;  %v3661_v12 = vpop.f32.mrb[3].mxu0 }
  0xf0   :  { %v93_v13 = vpack.c.bf16 %v4345_v11, %v4343_v10 }
  0xf2   :  { %3663 = vmatpush3.bf16.msra.mxu1 %v93_v13  ;;  %3669 = vmatpush3.bf16.msra.mxu0 %v93_v13 }
  0xf3   :  { %3674 = vmatprep.subr.bf16.mxu1 %v4271_v0  ;;  %3690 = vmatprep.subr.bf16.mxu0 %v4271_v0 }
  0xf5   :  { %3671 = vmatmul.mubr.msk.bf16.vlgmr.msra.gmra.mrb[4].mxu0 %vm48_vm1, %v4061_v14  ;;  %3665 = vmatmul.mubr.msk.bf16.vlgmr.msra.gmra.mrb[0].mxu1 %vm48_vm1, %v4062_v15 }
  0xf6   :  { %3686 = vmatprep.mubr.msk.bf16.mxu1 %vm4272_vm0, %v4271_v0  ;;  %3692 = vmatprep.mubr.msk.bf16.mxu0 %vm4272_vm0, %v4271_v0 }
  0xf7   :  { %3675 = vmatpush3.bf16.msra.mxu1 %v4063_v16 }
  0xf8   :  { %3676 = vmatprep.subr.bf16.mxu1 %v4271_v0 }
  0xfb   :  { %3677 = vmatpush3.bf16.msra.mxu1 %v4064_v17 }
  0xfc   :  { %3678 = vmatprep.subr.bf16.mxu1 %v4271_v0 }
  0xff   :  { %3679 = vmatpush3.bf16.msra.mxu1 %v4065_v18 }
 0x100   :  { %3680 = vmatprep.subr.bf16.mxu1 %v4271_v0 }
 0x103   :  { %3681 = vmatpush3.bf16.msra.mxu1 %v4066_v19 }
 0x104   :  { %3682 = vmatprep.subr.bf16.mxu1 %v4271_v0 }
 0x107   :  { %3683 = vmatpush3.bf16.msra.mxu1 %v4067_v20 }
 0x108   :  { %3684 = vmatprep.subr.bf16.mxu1 %v4271_v0 }
 0x10b   :  { %3685 = vmatpush3.bf16.msra.mxu1 %v4068_v21 }
 0x10c   :  { %3708 = vmatprep.subr.bf16.mxu1 %v4271_v0 }
 0x1c8   :  { %v190_v22 = vpop.f32.mrb[4].mxu0  ;;  %v138_v23 = vpop.f32.mrb[0].mxu1 }
 0x1c9   :  { %v3672_v24 = vpop.f32.mrb[5].mxu0  ;;  %v3666_v25 = vpop.f32.mrb[1].mxu1 }
 0x1ca   :  { %v193_v26 = vpop.f32.mrb[6].mxu0  ;;  %v141_v27 = vpop.f32.mrb[2].mxu1 }
 0x1cb   :  { %v197_v28 = vpack.c.bf16 %v193_v26, %v190_v22  ;;  %v3673_v29 = vpop.f32.mrb[7].mxu0  ;;  %v145_v30 = vpack.c.bf16 %v141_v27, %v138_v23  ;;  %v3667_v31 = vpop.f32.mrb[3].mxu1 }
 0x1cd   :  { %199 = vrot.lane.b32.xlu0 %v197_v28, %s4273_s6 }
 0x1d1   :  { %202 = vrot.lane.b32.xlu0 %v93_v13, %s4269_s22 }
 0x23f   :  { %v200_v32 = vpop.permute.xlu0 %199 }
 0x240   :  { %v207_v33 = vsel %vm204_vm2, %v145_v30, %v200_v32 }
 0x243   :  { %v203_v34 = vpop.permute.xlu0 %202 }
 0x244   :  { %v210_v35 = vsel %vm208_vm3, %v207_v33, %v203_v34 }
 0x245   :  { %3687 = vmatmul.mubr.msk.bf16.vlgmr.msra.gmra.mrb[4].mxu1 %vm264_vm4, %v210_v35 }
 0x246   :  { %3710 = vmatprep.mubr.msk.bf16.mxu1 %vm4272_vm0, %v4271_v0 }
 0x318   :  { %v301_v37 = vpop.f32.mrb[4].mxu1 }
 0x319   :  { %v302_v38 = vadd.f32 %v3416_v36, %v301_v37  ;;  %v3688_v39 = vpop.f32.mrb[5].mxu1 }
 0x31a   :  { %v304_v40 = vpop.f32.mrb[6].mxu1 }
 0x31b   :  { %v305_v41 = vadd.f32 %v3416_v36, %v304_v40  ;;  %v3689_v42 = vpop.f32.mrb[7].mxu1  ;;  %v308_v43 = vmul.f32 0.35355338, %v302_v38 }
 0x31d   :  { %v309_v44 = vmul.f32 0.35355338, %v305_v41  ;;  %v4373_v45 = vpack.c.bf16 %v305_v41, %v302_v38 }
 0x31f   :  { %v310_v46 = vpack.c.bf16 %v309_v44, %v308_v43  ;;  %313 = vrot.lane.b32.xlu1 %v4373_v45, %s4274_s9 }
 0x391   :  { %v314_v47 = vpop.permute.xlu1 %313 }
 0x392   :  { %v320_v48 = vsel %vm315_vm5, %v314_v47, 0 }
 0x393   :  { %3691 = vmatpush3.bf16.xpose.msra.mxu0 %v320_v48 }
 0x394   :  { %3696 = vmatprep.subr.bf16.mxu0 %v4271_v0 }
 0x39a   :  { %3693 = vmatmul.mubr.msk.bf16.vlgmr.msra.gmra.mrb[8].mxu0 %vm315_vm5, %v310_v46 }
 0x39b   :  { %3698 = vmatprep.mubr.msk.bf16.mxu0 %vm4272_vm0, %v4271_v0 }
 0x46d   :  { %v356_v50 = vpop.f32.mrb[8].mxu0 }
 0x46e   :  { %v357_v52 = vadd.f32 %v356_v50, %v4385_v49  ;;  %v3694_v53 = vpop.f32.mrb[9].mxu0 }
 0x46f   :  { %v359_v54 = vpop.f32.mrb[10].mxu0 }
 0x470   :  { %v360_v55 = vadd.f32 %v359_v54, %v4390_v51  ;;  %v3695_v56 = vpop.f32.mrb[11].mxu0  ;;  %v363_v57 = vsel %vm48_vm1, %v357_v52, -inf }
 0x471   :  { %364 = vmax.xlane.f32.xlu1 %v363_v57 }
 0x472   :  { %v366_v58 = vsel %vm48_vm1, %v360_v55, -inf }
 0x473   :  { %367 = vmax.xlane.f32.xlu0 %v366_v58 }
 0x4fe   :  { %v365_v59 = vpop.xlane.xlu1 %364 }
 0x4ff   :  { %v369_v60 = vsub.f32 %v357_v52, %v365_v59 }
 0x500   :  { %v368_v61 = vpop.xlane.xlu0 %367 }
 0x501   :  { %v371_v62 = vmul.f32 1.442695, %v369_v60  ;;  %v370_v63 = vsub.f32 %v360_v55, %v368_v61 }
 0x503   :  { %4110 = vpow2.f32 %v371_v62  ;;  %v373_v1 = vmul.f32 1.442695, %v370_v63 }
 0x505   :  { %4112 = vpow2.f32 %v373_v1 }
 0x50d   :  { %v4111_v2 = vpop.eup %4110 }
 0x50e   :  { %v375_v3 = vsel %vm48_vm1, %v4111_v2, 0.0 }
 0x50f   :  { %v4113_v4 = vpop.eup %4112  ;;  %376 = vadd.xlane.f32.xlu0 %v375_v3 }
 0x510   :  { %v378_v5 = vsel %vm48_vm1, %v4113_v4, 0.0 }
 0x511   :  { %379 = vadd.xlane.f32.xlu1 %v378_v5 }
 0x522   :  { %436 = vrot.lane.b32.xlu1 %v4373_v45, %s4275_s14 }
 0x525   :  { %386 = vrot.lane.b32.xlu0 %v4373_v45, %s4269_s22 }
 0x526   :  { %434 = vrot.lane.b32.xlu1 %v310_v46, %s4276_s15 }
 0x529   :  { %557 = vrot.lane.b32.xlu0 %v4373_v45, %s4277_s16 }
 0x52a   :  { %555 = vrot.lane.b32.xlu1 %v310_v46, %s4278_s17 }
 0x52d   :  { %678 = vrot.lane.b32.xlu0 %v4373_v45, %s4279_s18 }
 0x52e   :  { %676 = vrot.lane.b32.xlu1 %v310_v46, %s4280_s19 }
 0x59c   :  { %v377_v6 = vpop.xlane.xlu0 %376 }
 0x59d   :  { %4114 = vrcp.f32 %v377_v6 }
 0x59e   :  { %v380_v7 = vpop.xlane.xlu1 %379 }
 0x59f   :  { %4116 = vrcp.f32 %v380_v7 }
 0x5a0   :  { %v387_v8 = vpop.permute.xlu0 %386 }
 0x5a1   :  { %3697 = vmatpush3.bf16.msra.mxu0 %v387_v8 }
 0x5a2   :  { %3702 = vmatprep.subr.bf16.mxu0 %v4271_v0  ;;  %v437_v15 = vpop.permute.xlu1 %436 }
 0x5a3   :  { %v442_v17 = vsel %vm315_vm5, %v437_v15, 0 }
 0x5a4   :  { %v558_v18 = vpop.permute.xlu0 %557 }
 0x5a5   :  { %v563_v20 = vsel %vm315_vm5, %v558_v18, 0 }
 0x5a6   :  { %v435_v19 = vpop.permute.xlu1 %434 }
 0x5a7   :  { %v4115_v9 = vpop.eup %4114 }
 0x5a8   :  { %v383_v13 = vmul.f32 %v4115_v9, %v4111_v2  ;;  %v679_v21 = vpop.permute.xlu0 %678 }
 0x5a9   :  { %v4117_v12 = vpop.eup %4116  ;;  %v684_v23 = vsel %vm315_vm5, %v679_v21, 0 }
 0x5aa   :  { %v384_v14 = vmul.f32 %v4117_v12, %v4113_v4  ;;  %v556_v22 = vpop.permute.xlu1 %555 }
 0x5ac   :  { %v385_v16 = vpack.c.bf16 %v384_v14, %v383_v13 }
 0x5ae   :  { %3699 = vmatmul.mubr.msk.bf16.vlgmr.msra.gmra.mrb[12].mxu0 %vm48_vm1, %v385_v16  ;;  %v677_v24 = vpop.permute.xlu1 %676 }
 0x5af   :  { %3703 = vmatpush3.bf16.xpose.msra.mxu0 %v442_v17  ;;  %3704 = vmatprep.mubr.msk.bf16.mxu0 %vm4272_vm0, %v4271_v0 }
 0x5b0   :  { %3714 = vmatprep.subr.bf16.mxu0 %v4271_v0 }
 0x5b6   :  { %3705 = vmatmul.mubr.msk.bf16.vlgmr.msra.gmra.mrb[16].mxu0 %vm315_vm5, %v435_v19 }
 0x5b7   :  { %3715 = vmatpush3.bf16.xpose.msra.mxu0 %v563_v20  ;;  %3716 = vmatprep.mubr.msk.bf16.mxu0 %vm4272_vm0, %v4271_v0 }
 0x5b8   :  { %3726 = vmatprep.subr.bf16.mxu0 %v4271_v0 }
 0x5be   :  { %3717 = vmatmul.mubr.msk.bf16.vlgmr.msra.gmra.mrb[20].mxu0 %vm315_vm5, %v556_v22 }
 0x5bf   :  { %3727 = vmatpush3.bf16.xpose.msra.mxu0 %v684_v23  ;;  %3728 = vmatprep.mubr.msk.bf16.mxu0 %vm4272_vm0, %v4271_v0 }
 0x5c0   :  { %3738 = vmatprep.subr.bf16.mxu0 %v4271_v0 }
 0x5c6   :  { %3729 = vmatmul.mubr.msk.bf16.vlgmr.msra.gmra.mrb[24].mxu0 %vm315_vm5, %v677_v24 }
 0x5c7   :  { %3742 = vmatprep.mubr.msk.bf16.mxu0 %vm4272_vm0, %v4271_v0 }
 0x681   :  { %v4428_v25 = vpop.f32.mrb[12].mxu0 }
 0x682   :  { %v3700_v26 = vpop.f32.mrb[13].mxu0 }
 0x683   :  { %v4430_v27 = vpop.f32.mrb[14].mxu0 }
 0x684   :  { %v3701_v28 = vpop.f32.mrb[15].mxu0 }
 0x689   :  { %v478_v29 = vpop.f32.mrb[16].mxu0 }
 0x68a   :  { %v479_v30 = vadd.f32 %v478_v29, %v4385_v49  ;;  %v3706_v31 = vpop.f32.mrb[17].mxu0 }
 0x68b   :  { %v481_v32 = vpop.f32.mrb[18].mxu0 }
 0x68c   :  { %v482_v33 = vadd.f32 %v481_v32, %v4390_v51  ;;  %v3707_v34 = vpop.f32.mrb[19].mxu0  ;;  %v485_v35 = vsel %vm48_vm1, %v479_v30, -inf }
 0x68d   :  { %486 = vmax.xlane.f32.xlu0 %v485_v35 }
 0x68e   :  { %v488_v36 = vsel %vm48_vm1, %v482_v33, -inf }
 0x68f   :  { %489 = vmax.xlane.f32.xlu1 %v488_v36 }
 0x691   :  { %v599_v37 = vpop.f32.mrb[20].mxu0 }
 0x692   :  { %v600_v38 = vadd.f32 %v599_v37, %v4385_v49  ;;  %v3718_v39 = vpop.f32.mrb[21].mxu0 }
 0x693   :  { %v602_v40 = vpop.f32.mrb[22].mxu0 }
 0x694   :  { %v603_v41 = vadd.f32 %v602_v40, %v4390_v51  ;;  %v3719_v42 = vpop.f32.mrb[23].mxu0  ;;  %v606_v43 = vsel %vm48_vm1, %v600_v38, -inf }
 0x695   :  { %607 = vmax.xlane.f32.xlu0 %v606_v43 }
 0x696   :  { %v609_v44 = vsel %vm48_vm1, %v603_v41, -inf }
 0x699   :  { %610 = vmax.xlane.f32.xlu0 %v609_v44  ;;  %v720_v46 = vpop.f32.mrb[24].mxu0 }
 0x69a   :  { %v721_v47 = vadd.f32 %v720_v46, %v4385_v49  ;;  %v3730_v48 = vpop.f32.mrb[25].mxu0 }
 0x69b   :  { %v723_v50 = vpop.f32.mrb[26].mxu0 }
 0x69c   :  { %v724_v52 = vadd.f32 %v723_v50, %v4390_v51  ;;  %v3731_v53 = vpop.f32.mrb[27].mxu0  ;;  %v727_v54 = vsel %vm48_vm1, %v721_v47, -inf }
 0x69d   :  { %728 = vmax.xlane.f32.xlu1 %v727_v54 }
 0x69e   :  { %v730_v55 = vsel %vm48_vm1, %v724_v52, -inf }
 0x69f   :  { %731 = vmax.xlane.f32.xlu0 %v730_v55 }
 0x6ae   :  { %508 = vrot.lane.b32.xlu1 %v4373_v45, %s4281_s20 }
 0x71a   :  { %v487_v56 = vpop.xlane.xlu0 %486 }
 0x71b   :  { %v491_v57 = vsub.f32 %v479_v30, %v487_v56  ;;  %v4069_v56 = vld [vmem:[#allocation2 + $0x60] sm:$0xff]  }
 0x71c   :  { %v490_v58 = vpop.xlane.xlu1 %489  ;;  %3739 = vmatpush3.bf16.msra.mxu0 %v4069_v56  ;;  %v3437_v56 = vld [vmem:[%s4963_s2 + $0x68] ss:$0 sm:$0xff] }
 0x71d   :  { %v493_v59 = vmul.f32 1.442695, %v491_v57  ;;  %v492_v49 = vsub.f32 %v482_v33, %v490_v58  ;;  %3740 = vmatprep.subr.bf16.mxu0 %v4271_v0 }
 0x71f   :  { %4118 = vpow2.f32 %v493_v59  ;;  %v495_v60 = vmul.f32 1.442695, %v492_v49  ;;  %v4070_v59 = vld [vmem:[#allocation2 + $0x68] sm:$0xff]  }
 0x720   :  { %3741 = vmatpush3.bf16.msra.mxu0 %v4070_v59 }
 0x721   :  { %4120 = vpow2.f32 %v495_v60  ;;  %3754 = vmatprep.subr.bf16.mxu0 %v4271_v0 }
 0x722   :  { %v608_v51 = vpop.xlane.xlu0 %607 }
 0x723   :  { %v612_v61 = vsub.f32 %v600_v38, %v608_v51 }
 0x725   :  { %v614_v62 = vmul.f32 1.442695, %v612_v61 }
 0x726   :  { %v611_v63 = vpop.xlane.xlu0 %610 }
 0x727   :  { %4122 = vpow2.f32 %v614_v62  ;;  %v613_v1 = vsub.f32 %v603_v41, %v611_v63 }
 0x729   :  { %v4119_v2 = vpop.eup %4118  ;;  %v616_v3 = vmul.f32 1.442695, %v613_v1 }
 0x72a   :  { %v729_v4 = vpop.xlane.xlu1 %728  ;;  %v497_v5 = vsel %vm48_vm1, %v4119_v2, 0.0 }
 0x72b   :  { %v4121_v6 = vpop.eup %4120  ;;  %4124 = vpow2.f32 %v616_v3  ;;  %v733_v7 = vsub.f32 %v721_v47, %v729_v4  ;;  %498 = vadd.xlane.f32.xlu1 %v497_v5 }
 0x72c   :  { %v732_v8 = vpop.xlane.xlu0 %731  ;;  %v500_v9 = vsel %vm48_vm1, %v4121_v6, 0.0 }
 0x72d   :  { %v735_v12 = vmul.f32 1.442695, %v733_v7  ;;  %v734_v13 = vsub.f32 %v724_v52, %v732_v8  ;;  %501 = vadd.xlane.f32.xlu0 %v500_v9 }
 0x72e   :  { %v509_v14 = vpop.permute.xlu1 %508 }
 0x72f   :  { %4126 = vpow2.f32 %v735_v12  ;;  %v737_v15 = vmul.f32 1.442695, %v734_v13  ;;  %3709 = vmatpush3.bf16.msra.mxu1 %v509_v14 }
 0x730   :  { %3720 = vmatprep.subr.bf16.mxu1 %v4271_v0 }
 0x731   :  { %v4123_v16 = vpop.eup %4122  ;;  %4128 = vpow2.f32 %v737_v15 }
 0x732   :  { %v618_v17 = vsel %vm48_vm1, %v4123_v16, 0.0 }
 0x733   :  { %619 = vadd.xlane.f32.xlu1 %v618_v17 }
 0x735   :  { %v4125_v18 = vpop.eup %4124 }
 0x736   :  { %v621_v19 = vsel %vm48_vm1, %v4125_v18, 0.0 }
 0x737   :  { %622 = vadd.xlane.f32.xlu0 %v621_v19 }
 0x739   :  { %v4127_v20 = vpop.eup %4126 }
 0x73a   :  { %v739_v21 = vsel %vm48_vm1, %v4127_v20, 0.0 }
 0x73b   :  { %v4129_v22 = vpop.eup %4128  ;;  %740 = vadd.xlane.f32.xlu1 %v739_v21 }
 0x73c   :  { %v742_v23 = vsel %vm48_vm1, %v4129_v22, 0.0 }
 0x73d   :  { %743 = vadd.xlane.f32.xlu0 %v742_v23 }
 0x74c   :  { %750 = vrot.lane.b32.xlu1 %v4373_v45, %s4282_s21 }
 0x753   :  { %629 = vrot.lane.b32.xlu0 %v4373_v45, %s4283_s23 }
 0x7b8   :  { %v499_v24 = vpop.xlane.xlu1 %498 }
 0x7b9   :  { %4130 = vrcp.f32 %v499_v24 }
 0x7ba   :  { %v502_v26 = vpop.xlane.xlu0 %501 }
 0x7bb   :  { %4132 = vrcp.f32 %v502_v26 }
 0x7c0   :  { %v620_v28 = vpop.xlane.xlu1 %619 }
 0x7c1   :  { %4134 = vrcp.f32 %v620_v28 }
 0x7c3   :  { %v4131_v29 = vpop.eup %4130 }
 0x7c4   :  { %v623_v30 = vpop.xlane.xlu0 %622  ;;  %v505_v32 = vmul.f32 %v4131_v29, %v4119_v2 }
 0x7c5   :  { %v4133_v31 = vpop.eup %4132  ;;  %4136 = vrcp.f32 %v623_v30 }
 0x7c6   :  { %v506_v33 = vmul.f32 %v4133_v31, %v4121_v6 }
 0x7c8   :  { %v741_v34 = vpop.xlane.xlu1 %740  ;;  %v507_v35 = vpack.c.bf16 %v506_v33, %v505_v32 }
 0x7c9   :  { %4138 = vrcp.f32 %v741_v34 }
 0x7ca   :  { %v744_v36 = vpop.xlane.xlu0 %743  ;;  %3711 = vmatmul.mubr.msk.bf16.vlgmr.msra.gmra.mrb[8].mxu1 %vm48_vm1, %v507_v35 }
 0x7cb   :  { %4140 = vrcp.f32 %v744_v36  ;;  %3722 = vmatprep.mubr.msk.bf16.mxu1 %vm4272_vm0, %v4271_v0  ;;  %v4135_v45 = vpop.eup %4134 }
 0x7cc   :  { %v626_v39 = vmul.f32 %v4135_v45, %v4123_v16  ;;  %v751_v43 = vpop.permute.xlu1 %750 }
 0x7ce   :  { %v630_v37 = vpop.permute.xlu0 %629 }
 0x7cf   :  { %v4137_v38 = vpop.eup %4136  ;;  %3721 = vmatpush3.bf16.msra.mxu1 %v630_v37 }
 0x7d0   :  { %v627_v40 = vmul.f32 %v4137_v38, %v4125_v18  ;;  %3732 = vmatprep.subr.bf16.mxu1 %v4271_v0 }
 0x7d2   :  { %v628_v41 = vpack.c.bf16 %v627_v40, %v626_v39  ;;  %v4071_v40 = vld [vmem:[#allocation2 + $0x70] sm:$0xff]  }
 0x7d3   :  { %v4139_v42 = vpop.eup %4138 }
 0x7d4   :  { %3723 = vmatmul.mubr.msk.bf16.vlgmr.msra.gmra.mrb[12].mxu1 %vm48_vm1, %v628_v41  ;;  %v747_v47 = vmul.f32 %v4139_v42, %v4127_v20 }
 0x7d5   :  { %v4141_v44 = vpop.eup %4140  ;;  %3733 = vmatpush3.bf16.msra.mxu1 %v751_v43  ;;  %3734 = vmatprep.mubr.msk.bf16.mxu1 %vm4272_vm0, %v4271_v0 }
 0x7d6   :  { %v748_v46 = vmul.f32 %v4141_v44, %v4129_v22  ;;  %3746 = vmatprep.subr.bf16.mxu1 %v4271_v0 }
 0x7d8   :  { %v749_v48 = vpack.c.bf16 %v748_v46, %v747_v47 }
 0x7dc   :  { %3735 = vmatmul.mubr.msk.bf16.vlgmr.msra.gmra.mrb[16].mxu1 %vm48_vm1, %v749_v48 }
 0x7dd   :  { %3750 = vmatprep.mubr.msk.bf16.mxu1 %vm4272_vm0, %v4271_v0  ;;  %3747 = vmatpush3.bf16.msra.mxu1 %v4071_v40  ;;  %v4551_v40 = vld [vmem:[#allocation2 + $0x8] sm:$0xff]  }
 0x7de   :  { %3748 = vmatprep.subr.bf16.mxu1 %v4271_v0 }
 0x89d   :  { %v548_v50 = vpop.f32.mrb[8].mxu1 }
 0x89e   :  { %v3712_v52 = vpop.f32.mrb[9].mxu1 }
 0x89f   :  { %v551_v53 = vpop.f32.mrb[10].mxu1  ;;  %v3436_v52 = vld [vmem:[%s4963_s2 + $0x60] ss:$0 sm:$0xff] }
 0x8a0   :  { %v4015_v54 = vpack.i.bf16 %v551_v53, %v548_v50  ;;  %v3713_v55 = vpop.f32.mrb[11].mxu1 }
 0x8a2   :  { %4016 = vrot.lane.b32.xlu1 %v4015_v54, %s4284_s24 }
 0x8a7   :  { %v669_v57 = vpop.f32.mrb[12].mxu1 }
 0x8a8   :  { %v3724_v58 = vpop.f32.mrb[13].mxu1 }
 0x8a9   :  { %v672_v49 = vpop.f32.mrb[14].mxu1 }
 0x8aa   :  { %v4020_v60 = vpack.i.bf16 %v672_v49, %v669_v57  ;;  %v3725_v51 = vpop.f32.mrb[15].mxu1  ;;  %v4073_v49 = vld [vmem:[#allocation2 + $0x28] sm:$0xff]  }
 0x8ab   :  { %v1185_v51 = vld [vmem:[%s4961_s0 + $0x10] sm:$0xff] }
 0x8ac   :  { %4021 = vrot.lane.b32.xlu0 %v4020_v60, %s4285_s25 }
 0x8af   :  { %v790_v61 = vpop.f32.mrb[16].mxu1 }
 0x8b0   :  { %v3736_v62 = vpop.f32.mrb[17].mxu1 }
 0x8b1   :  { %v793_v63 = vpop.f32.mrb[18].mxu1 }
 0x8b2   :  { %v4025_v1 = vpack.i.bf16 %v793_v63, %v790_v61  ;;  %v3737_v2 = vpop.f32.mrb[19].mxu1  ;;  %v1186_v61 = vld [vmem:[%s4961_s0 + $0x18] sm:$0xff]  ;;  %v4074_v63 = vld [vmem:[#allocation2 + $0x80] sm:$0xff]  }
 0x8b3   :  { %v1187_v62 = vpack.c.bf16 %v1186_v61, %v1185_v51  ;;  %v4076_v2 = vld [vmem:[#allocation2 + $0x90] sm:$0xff]  }
 0x8b4   :  { %4026 = vrot.lane.b32.xlu1 %v4025_v1, %s4286_s26  ;;  %v4075_v1 = vld [vmem:[#allocation2 + $0x88] sm:$0xff]  }
 0x914   :  { %v4017_v3 = vpop.permute.xlu1 %4016 }
 0x915   :  { %v4019_v5 = vunpack.i.h.bf16 %v4017_v3  ;;  %v4018_v6 = vunpack.i.l.bf16 %v4017_v3  ;;  %v4077_v3 = vld [vmem:[#allocation2 + $0x98] sm:$0xff]  }
 0x917   :  { %v822_v12 = vsel %vm315_vm5, %v4430_v27, %v4019_v5  ;;  %v821_v13 = vsel %vm315_vm5, %v4428_v25, %v4018_v6  ;;  %v3432_v25 = vld [vmem:[%s4963_s2 + $0x58] ss:$0 sm:$0xff] }
 0x91e   :  { %v4022_v4 = vpop.permute.xlu0 %4021 }
 0x91f   :  { %v4024_v7 = vunpack.i.h.bf16 %v4022_v4  ;;  %v4023_v8 = vunpack.i.l.bf16 %v4022_v4  ;;  %v3438_v4 = vld [vmem:[%s4963_s2 + $0x70] ss:$0 sm:$0xff] }
 0x921   :  { %v823_v16 = vsel %vm48_vm1, %v821_v13, %v4023_v8  ;;  %v824_v17 = vsel %vm48_vm1, %v822_v12, %v4024_v7 }
 0x926   :  { %v4027_v9 = vpop.permute.xlu1 %4026 }
 0x927   :  { %v4029_v14 = vunpack.i.h.bf16 %v4027_v9  ;;  %v4028_v15 = vunpack.i.l.bf16 %v4027_v9 }
 0x929   :  { %v826_v18 = vsel %vm825_vm6, %v823_v16, %v4028_v15  ;;  %v827_v19 = vsel %vm825_vm6, %v824_v17, %v4029_v14  ;;  %v1190_v16 = vld [vmem:[%s4963_s2 + $0x10] sm:$0xff] }
 0x92a   :  { %v828_v20 = vpack.c.bf16 %v827_v19, %v826_v18 }
 0x92c   :  { %3743 = vmatmul.mubr.msk.bf16.vlgmr.msra.gmra.mrb[28].mxu0 %vm204_vm2, %v828_v20  ;;  %v1191_v20 = vld [vmem:[%s4963_s2 + $0x18] sm:$0xff] }
 0x92d   :  { %3762 = vmatprep.mubr.msk.bf16.mxu0 %vm4272_vm0, %v4271_v0  ;;  %3755 = vmatpush3.bf16.msra.mxu0 %v4074_v63 }
 0x92e   :  { %3756 = vmatprep.subr.bf16.mxu0 %v4271_v0 }
 0x931   :  { %3757 = vmatpush3.bf16.msra.mxu0 %v4075_v1 }
 0x932   :  { %3758 = vmatprep.subr.bf16.mxu0 %v4271_v0 }
 0x935   :  { %3759 = vmatpush3.bf16.msra.mxu0 %v4076_v2 }
 0x936   :  { %3760 = vmatprep.subr.bf16.mxu0 %v4271_v0 }
 0x939   :  { %3761 = vmatpush3.bf16.msra.mxu0 %v4077_v3 }
 0x93a   :  { %3778 = vmatprep.subr.bf16.mxu0 %v4271_v0 }
 0x9ff   :  { %v887_v27 = vpop.f32.mrb[28].mxu0 }
 0xa00   :  { %v888_v21 = vadd.f32 %v3432_v25, %v887_v27  ;;  %v3744_v22 = vpop.f32.mrb[29].mxu0 }
 0xa01   :  { %v890_v23 = vpop.f32.mrb[30].mxu0 }
 0xa02   :  { %v891_v24 = vadd.f32 %v3432_v25, %v890_v23  ;;  %v3745_v26 = vpop.f32.mrb[31].mxu0  ;;  %v894_v28 = vadd.f32 %v888_v21, %v4343_v10 }
 0xa04   :  { %v896_v29 = vsel %vm204_vm2, %v894_v28, 0.0  ;;  %v895_v30 = vadd.f32 %v891_v24, %v4345_v11  ;;  %v4072_v11 = vld [vmem:[#allocation2 + $0x78] sm:$0xff]  }
 0xa05   :  { %897 = vadd.xlane.f32.xlu0 %v896_v29  ;;  %3749 = vmatpush3.bf16.msra.mxu1 %v4072_v11  ;;  %v4080_v11 = vld [vmem:[#allocation2 + $0xa0] sm:$0xff]  }
 0xa06   :  { %v899_v31 = vsel %vm204_vm2, %v895_v30, 0.0  ;;  %3766 = vmatprep.subr.bf16.mxu1 %v4271_v0 }
 0xa07   :  { %900 = vadd.xlane.f32.xlu1 %v899_v31 }
 0xa92   :  { %v898_v32 = vpop.xlane.xlu0 %897 }
 0xa93   :  { %v903_v33 = vmul.f32 0.03125, %v898_v32  ;;  %v4539_v32 = vld [vmem:[#allocation2 + $0x18] sm:$0xff]  }
 0xa94   :  { %v901_v34 = vpop.xlane.xlu1 %900 }
 0xa95   :  { %v905_v35 = vsub.f32 %v894_v28, %v903_v33  ;;  %v904_v36 = vmul.f32 0.03125, %v901_v34 }
 0xa97   :  { %v906_v45 = vsub.f32 %v895_v30, %v904_v36  ;;  %v907_v37 = vmul.f32 %v905_v35, %v905_v35 }
 0xa99   :  { %v909_v38 = vsel %vm204_vm2, %v907_v37, 0.0  ;;  %v908_v39 = vmul.f32 %v906_v45, %v906_v45 }
 0xa9a   :  { %910 = vadd.xlane.f32.xlu0 %v909_v38 }
 0xa9b   :  { %v912_v10 = vsel %vm204_vm2, %v908_v39, 0.0 }
 0xa9e   :  { %913 = vadd.xlane.f32.xlu0 %v912_v10 }
 0xb27   :  { %v911_v41 = vpop.xlane.xlu0 %910 }
 0xb28   :  { %v915_v42 = vmul.f32 0.03125, %v911_v41  ;;  %v4081_v41 = vld [vmem:[#allocation2 + $0xa8] sm:$0xff]  }
 0xb2a   :  { %v917_v43 = vadd.f32 1e-05, %v915_v42  ;;  %v4082_v42 = vld [vmem:[#allocation2 + $0xb0] sm:$0xff]  }
 0xb2b   :  { %v914_v44 = vpop.xlane.xlu0 %913 }
 0xb2c   :  { %4142 = vrsqrt.f32 %v917_v43  ;;  %v916_v46 = vmul.f32 0.03125, %v914_v44  ;;  %v4083_v43 = vld [vmem:[#allocation2 + $0xb8] sm:$0xff]   ;;  %v4084_v44 = vld [vmem:[#allocation2 + $0xc0] sm:$0xff]  }
 0xb2e   :  { %v918_v47 = vadd.f32 1e-05, %v916_v46  ;;  %v4085_v46 = vld [vmem:[#allocation2 + $0xc8] sm:$0xff]  }
 0xb30   :  { %4144 = vrsqrt.f32 %v918_v47 }
 0xb36   :  { %v4143_v48 = vpop.eup %4142 }
 0xb37   :  { %v921_v50 = vmul.f32 %v4143_v48, %v905_v35 }
 0xb39   :  { %v928_v54 = vmul.f32 %v3436_v52, %v921_v50 }
 0xb3a   :  { %v4145_v53 = vpop.eup %4144 }
 0xb3b   :  { %v922_v55 = vmul.f32 %v4145_v53, %v906_v45  ;;  %v4501_v58 = vadd.f32 %v3437_v56, %v928_v54 }
 0xb3d   :  { %v929_v57 = vmul.f32 %v3436_v52, %v922_v55 }
 0xb3f   :  { %v4503_v59 = vadd.f32 %v3437_v56, %v929_v57 }
 0xb41   :  { %v937_v60 = vpack.c.bf16 %v4503_v59, %v4501_v58 }
 0xb43   :  { %3751 = vmatmul.mubr.msk.bf16.vlgmr.msra.gmra.mrb[20].mxu1 %vm204_vm2, %v937_v60 }
 0xb44   :  { %3767 = vmatpush3.bf16.msra.mxu1 %v4073_v49  ;;  %3768 = vmatprep.mubr.msk.bf16.mxu1 %vm4272_vm0, %v4271_v0 }
 0xb45   :  { %3772 = vmatprep.subr.bf16.mxu1 %v4271_v0 }
 0xb4b   :  { %3769 = vmatmul.mubr.msk.bf16.vlgmr.msra.gmra.mrb[24].mxu1 %vm48_vm1, %v1187_v62 }
 0xb4c   :  { %3774 = vmatprep.mubr.msk.bf16.mxu1 %vm4272_vm0, %v4271_v0 }
 0xc16   :  { %v996_v5 = vpop.f32.mrb[20].mxu1 }
 0xc17   :  { %v997_v6 = vadd.f32 %v3438_v4, %v996_v5  ;;  %v3752_v7 = vpop.f32.mrb[21].mxu1 }
 0xc18   :  { %v999_v8 = vpop.f32.mrb[22].mxu1 }
 0xc19   :  { %v1005_v9 = vmul.f32 0.044715, %v997_v6  ;;  %v1000_v12 = vadd.f32 %v3438_v4, %v999_v8  ;;  %v3753_v13 = vpop.f32.mrb[23].mxu1  ;;  %v1003_v36 = vmul.f32 0.5, %v997_v6  ;;  %v3458_v4 = vld [vmem:[%s4963_s2 + $0xa0] ss:$0 sm:$0xff] }
 0xc1b   :  { %v1007_v14 = vmul.f32 %v1005_v9, %v997_v6  ;;  %v1006_v15 = vmul.f32 0.044715, %v1000_v12  ;;  %v1004_v45 = vmul.f32 0.5, %v1000_v12 }
 0xc1d   :  { %v1009_v17 = vmul.f32 %v1007_v14, %v997_v6  ;;  %v1008_v18 = vmul.f32 %v1006_v15, %v1000_v12 }
 0xc1e   :  { %v1235_v19 = vpop.f32.mrb[24].mxu1 }
 0xc1f   :  { %v1011_v25 = vadd.f32 %v1009_v17, %v997_v6  ;;  %v1010_v27 = vmul.f32 %v1008_v18, %v1000_v12  ;;  %v4533_v21 = vadd.f32 %v1235_v19, %v1190_v16  ;;  %v3770_v22 = vpop.f32.mrb[25].mxu1  ;;  %v4588_v19 = vld [vmem:[%s4963_s2 + $0x30] sm:$0xff] }
 0xc20   :  { %v1238_v23 = vpop.f32.mrb[26].mxu1 }
 0xc21   :  { %v1013_v24 = vmul.f32 0.7978846, %v1011_v25  ;;  %v1012_v26 = vadd.f32 %v1010_v27, %v1000_v12  ;;  %v4535_v28 = vadd.f32 %v1238_v23, %v1191_v20  ;;  %v3771_v29 = vpop.f32.mrb[27].mxu1  ;;  %v4593_v25 = vld [vmem:[%s4963_s2 + $0x38] sm:$0xff] }
 0xc23   :  { %4146 = vtanh.f32 %v1013_v24  ;;  %v1014_v30 = vmul.f32 0.7978846, %v1012_v26  ;;  %v1242_v31 = vpack.c.bf16 %v4535_v28, %v4533_v21 }
 0xc25   :  { %4148 = vtanh.f32 %v1014_v30  ;;  %1351 = vrot.lane.b32.xlu0 %v1242_v31, %s4269_s22  ;;  %3773 = vmatpush3.bf16.msra.mxu1 %v1242_v31 }
 0xc26   :  { %3784 = vmatprep.subr.bf16.mxu1 %v4271_v0 }
 0xc28   :  { %3775 = vmatmul.mubr.msk.bf16.vlgmr.msra.gmra.mrb[28].mxu1 %vm48_vm1, %v4539_v32 }
 0xc29   :  { %3796 = vmatprep.mubr.msk.bf16.mxu1 %vm4272_vm0, %v4271_v0  ;;  %3785 = vmatpush3.bf16.msra.mxu1 %v4080_v11 }
 0xc2a   :  { %3786 = vmatprep.subr.bf16.mxu1 %v4271_v0 }
 0xc2d   :  { %v4147_v33 = vpop.eup %4146  ;;  %3787 = vmatpush3.bf16.msra.mxu1 %v4081_v41 }
 0xc2e   :  { %v1017_v34 = vadd.f32 1.0, %v4147_v33  ;;  %3788 = vmatprep.subr.bf16.mxu1 %v4271_v0 }
 0xc2f   :  { %v4149_v35 = vpop.eup %4148 }
 0xc30   :  { %v1018_v37 = vadd.f32 1.0, %v4149_v35  ;;  %v1019_v38 = vmul.f32 %v1017_v34, %v1003_v36 }
 0xc31   :  { %3789 = vmatpush3.bf16.msra.mxu1 %v4082_v42 }
 0xc32   :  { %v1020_v39 = vmul.f32 %v1018_v37, %v1004_v45  ;;  %3790 = vmatprep.subr.bf16.mxu1 %v4271_v0 }
 0xc34   :  { %v1021_v10 = vpack.c.bf16 %v1020_v39, %v1019_v38 }
 0xc35   :  { %3791 = vmatpush3.bf16.msra.mxu1 %v4083_v43 }
 0xc36   :  { %3763 = vmatmul.mubr.msk.bf16.vlgmr.msra.gmra.mrb[32].mxu0 %vm208_vm3, %v1021_v10  ;;  %3792 = vmatprep.subr.bf16.mxu1 %v4271_v0 }
 0xc37   :  { %3779 = vmatpush3.bf16.msra.mxu0 %v1242_v31  ;;  %3780 = vmatprep.mubr.msk.bf16.mxu0 %vm4272_vm0, %v4271_v0 }
 0xc38   :  { %3800 = vmatprep.subr.bf16.mxu0 %v4271_v0 }
 0xc39   :  { %3793 = vmatpush3.bf16.msra.mxu1 %v4084_v44 }
 0xc3a   :  { %3794 = vmatprep.subr.bf16.mxu1 %v4271_v0 }
 0xc3d   :  { %3795 = vmatpush3.bf16.msra.mxu1 %v4085_v46 }
 0xc3e   :  { %3781 = vmatmul.mubr.msk.bf16.vlgmr.msra.gmra.mrb[36].mxu0 %vm48_vm1, %v4551_v40  ;;  %3818 = vmatprep.subr.bf16.mxu1 %v4271_v0 }
 0xc3f   :  { %3802 = vmatprep.mubr.msk.bf16.mxu0 %vm4272_vm0, %v4271_v0 }
 0xc97   :  { %v1352_v1 = vpop.permute.xlu0 %1351 }
 0xcfb   :  { %v1287_v47 = vpop.f32.mrb[28].mxu1 }
 0xcfc   :  { %v3776_v48 = vpop.f32.mrb[29].mxu1 }
 0xcfd   :  { %v1290_v50 = vpop.f32.mrb[30].mxu1 }
 0xcfe   :  { %v1294_v52 = vpack.c.bf16 %v1290_v50, %v1287_v47  ;;  %v3777_v53 = vpop.f32.mrb[31].mxu1 }
 0xd09   :  { %v4563_v54 = vpop.f32.mrb[32].mxu0 }
 0xd0a   :  { %v3764_v55 = vpop.f32.mrb[33].mxu0 }
 0xd0b   :  { %v4565_v56 = vpop.f32.mrb[34].mxu0 }
 0xd0c   :  { %v3765_v57 = vpop.f32.mrb[35].mxu0 }
 0xd11   :  { %v1339_v49 = vpop.f32.mrb[36].mxu0 }
 0xd12   :  { %v3782_v60 = vpop.f32.mrb[37].mxu0 }
 0xd13   :  { %v1342_v51 = vpop.f32.mrb[38].mxu0 }
 0xd14   :  { %v1346_v61 = vpack.c.bf16 %v1342_v51, %v1339_v49  ;;  %v3783_v62 = vpop.f32.mrb[39].mxu0 }
 0xd16   :  { %1348 = vrot.lane.b32.xlu1 %v1346_v61, %s4273_s6 }
 0xd88   :  { %v1349_v63 = vpop.permute.xlu1 %1348 }
 0xd89   :  { %v1355_v2 = vsel %vm204_vm2, %v1294_v52, %v1349_v63 }
 0xd8a   :  { %v1357_v3 = vsel %vm208_vm3, %v1355_v2, %v1352_v1 }
 0xd8b   :  { %3797 = vmatmul.mubr.msk.bf16.vlgmr.msra.gmra.mrb[32].mxu1 %vm264_vm4, %v1357_v3 }
 0xd8c   :  { %3820 = vmatprep.mubr.msk.bf16.mxu1 %vm4272_vm0, %v4271_v0 }
 0xe5e   :  { %v1447_v5 = vpop.f32.mrb[32].mxu1 }
 0xe5f   :  { %v1448_v6 = vadd.f32 %v3458_v4, %v1447_v5  ;;  %v3798_v7 = vpop.f32.mrb[33].mxu1 }
 0xe60   :  { %v1450_v8 = vpop.f32.mrb[34].mxu1 }
 0xe61   :  { %v1451_v9 = vadd.f32 %v3458_v4, %v1450_v8  ;;  %v3799_v12 = vpop.f32.mrb[35].mxu1  ;;  %v1454_v13 = vmul.f32 0.35355338, %v1448_v6 }
 0xe63   :  { %v1455_v14 = vmul.f32 0.35355338, %v1451_v9  ;;  %v4576_v15 = vpack.c.bf16 %v1451_v9, %v1448_v6 }
 0xe65   :  { %v1456_v16 = vpack.c.bf16 %v1455_v14, %v1454_v13  ;;  %1459 = vrot.lane.b32.xlu1 %v4576_v15, %s4274_s9 }
 0xed7   :  { %v1460_v17 = vpop.permute.xlu1 %1459 }
 0xed8   :  { %v1465_v18 = vsel %vm315_vm5, %v1460_v17, 0 }
 0xed9   :  { %3801 = vmatpush3.bf16.xpose.msra.mxu0 %v1465_v18 }
 0xeda   :  { %3806 = vmatprep.subr.bf16.mxu0 %v4271_v0 }
 0xee0   :  { %3803 = vmatmul.mubr.msk.bf16.vlgmr.msra.gmra.mrb[40].mxu0 %vm315_vm5, %v1456_v16 }
 0xee1   :  { %3808 = vmatprep.mubr.msk.bf16.mxu0 %vm4272_vm0, %v4271_v0 }
 0xfb3   :  { %v1501_v20 = vpop.f32.mrb[40].mxu0 }
 0xfb4   :  { %v1502_v27 = vadd.f32 %v1501_v20, %v4588_v19  ;;  %v3804_v22 = vpop.f32.mrb[41].mxu0 }
 0xfb5   :  { %v1504_v23 = vpop.f32.mrb[42].mxu0 }
 0xfb6   :  { %v1505_v24 = vadd.f32 %v1504_v23, %v4593_v25  ;;  %v3805_v26 = vpop.f32.mrb[43].mxu0  ;;  %v1508_v29 = vsel %vm48_vm1, %v1502_v27, -inf }
 0xfb7   :  { %1509 = vmax.xlane.f32.xlu1 %v1508_v29 }
 0xfb8   :  { %v1511_v30 = vsel %vm48_vm1, %v1505_v24, -inf }
 0xfb9   :  { %1512 = vmax.xlane.f32.xlu0 %v1511_v30 }
0x1044   :  { %v1510_v31 = vpop.xlane.xlu1 %1509 }
0x1045   :  { %v1514_v33 = vsub.f32 %v1502_v27, %v1510_v31 }
0x1046   :  { %v1513_v34 = vpop.xlane.xlu0 %1512 }
0x1047   :  { %v1516_v35 = vmul.f32 1.442695, %v1514_v33  ;;  %v1515_v36 = vsub.f32 %v1505_v24, %v1513_v34 }
0x1049   :  { %4150 = vpow2.f32 %v1516_v35  ;;  %v1518_v45 = vmul.f32 1.442695, %v1515_v36 }
0x104b   :  { %4152 = vpow2.f32 %v1518_v45 }
0x1053   :  { %v4151_v37 = vpop.eup %4150 }
0x1054   :  { %v1520_v38 = vsel %vm48_vm1, %v4151_v37, 0.0 }
0x1055   :  { %v4153_v39 = vpop.eup %4152  ;;  %1521 = vadd.xlane.f32.xlu0 %v1520_v38 }
0x1056   :  { %v1523_v10 = vsel %vm48_vm1, %v4153_v39, 0.0 }
0x1057   :  { %1524 = vadd.xlane.f32.xlu1 %v1523_v10 }
0x1068   :  { %1581 = vrot.lane.b32.xlu1 %v4576_v15, %s4275_s14 }
0x106b   :  { %1531 = vrot.lane.b32.xlu0 %v4576_v15, %s4269_s22 }
0x106c   :  { %1579 = vrot.lane.b32.xlu1 %v1456_v16, %s4276_s15 }
0x106f   :  { %1702 = vrot.lane.b32.xlu0 %v4576_v15, %s4277_s16 }
0x1070   :  { %1700 = vrot.lane.b32.xlu1 %v1456_v16, %s4278_s17 }
0x1073   :  { %1823 = vrot.lane.b32.xlu0 %v4576_v15, %s4279_s18 }
0x1074   :  { %1821 = vrot.lane.b32.xlu1 %v1456_v16, %s4280_s19 }
0x10e2   :  { %v1522_v11 = vpop.xlane.xlu0 %1521 }
0x10e3   :  { %4154 = vrcp.f32 %v1522_v11 }
0x10e4   :  { %v1525_v41 = vpop.xlane.xlu1 %1524 }
0x10e5   :  { %4156 = vrcp.f32 %v1525_v41 }
0x10e6   :  { %v1532_v42 = vpop.permute.xlu0 %1531 }
0x10e7   :  { %3807 = vmatpush3.bf16.msra.mxu0 %v1532_v42 }
0x10e8   :  { %3812 = vmatprep.subr.bf16.mxu0 %v4271_v0  ;;  %v1582_v48 = vpop.permute.xlu1 %1581 }
0x10e9   :  { %v1587_v52 = vsel %vm315_vm5, %v1582_v48, 0 }
0x10ea   :  { %v1703_v53 = vpop.permute.xlu0 %1702 }
0x10eb   :  { %v1708_v57 = vsel %vm315_vm5, %v1703_v53, 0 }
0x10ec   :  { %v1580_v55 = vpop.permute.xlu1 %1579 }
0x10ed   :  { %v4155_v43 = vpop.eup %4154 }
0x10ee   :  { %v1528_v46 = vmul.f32 %v4155_v43, %v4151_v37  ;;  %v1824_v49 = vpop.permute.xlu0 %1823 }
0x10ef   :  { %v4157_v44 = vpop.eup %4156  ;;  %v1829_v51 = vsel %vm315_vm5, %v1824_v49, 0 }
0x10f0   :  { %v1529_v47 = vmul.f32 %v4157_v44, %v4153_v39  ;;  %v1701_v60 = vpop.permute.xlu1 %1700 }
0x10f2   :  { %v1530_v50 = vpack.c.bf16 %v1529_v47, %v1528_v46 }
0x10f4   :  { %3809 = vmatmul.mubr.msk.bf16.vlgmr.msra.gmra.mrb[44].mxu0 %vm48_vm1, %v1530_v50  ;;  %v1822_v61 = vpop.permute.xlu1 %1821 }
0x10f5   :  { %3813 = vmatpush3.bf16.xpose.msra.mxu0 %v1587_v52  ;;  %3814 = vmatprep.mubr.msk.bf16.mxu0 %vm4272_vm0, %v4271_v0 }
0x10f6   :  { %3824 = vmatprep.subr.bf16.mxu0 %v4271_v0 }
0x10fc   :  { %3815 = vmatmul.mubr.msk.bf16.vlgmr.msra.gmra.mrb[48].mxu0 %vm315_vm5, %v1580_v55 }
0x10fd   :  { %3825 = vmatpush3.bf16.xpose.msra.mxu0 %v1708_v57  ;;  %3826 = vmatprep.mubr.msk.bf16.mxu0 %vm4272_vm0, %v4271_v0 }
0x10fe   :  { %3836 = vmatprep.subr.bf16.mxu0 %v4271_v0 }
0x1104   :  { %3827 = vmatmul.mubr.msk.bf16.vlgmr.msra.gmra.mrb[52].mxu0 %vm315_vm5, %v1701_v60 }
0x1105   :  { %3837 = vmatpush3.bf16.xpose.msra.mxu0 %v1829_v51  ;;  %3838 = vmatprep.mubr.msk.bf16.mxu0 %vm4272_vm0, %v4271_v0 }
0x1106   :  { %3848 = vmatprep.subr.bf16.mxu0 %v4271_v0 }
0x110c   :  { %3839 = vmatmul.mubr.msk.bf16.vlgmr.msra.gmra.mrb[56].mxu0 %vm315_vm5, %v1822_v61 }
0x110d   :  { %3852 = vmatprep.mubr.msk.bf16.mxu0 %vm4272_vm0, %v4271_v0 }
0x11c7   :  { %v4631_v62 = vpop.f32.mrb[44].mxu0 }
0x11c8   :  { %v3810_v63 = vpop.f32.mrb[45].mxu0 }
0x11c9   :  { %v4633_v1 = vpop.f32.mrb[46].mxu0 }
0x11ca   :  { %v3811_v2 = vpop.f32.mrb[47].mxu0 }
0x11cf   :  { %v1623_v3 = vpop.f32.mrb[48].mxu0 }
0x11d0   :  { %v1624_v4 = vadd.f32 %v1623_v3, %v4588_v19  ;;  %v3816_v5 = vpop.f32.mrb[49].mxu0 }
0x11d1   :  { %v1626_v6 = vpop.f32.mrb[50].mxu0 }
0x11d2   :  { %v1627_v7 = vadd.f32 %v1626_v6, %v4593_v25  ;;  %v3817_v8 = vpop.f32.mrb[51].mxu0  ;;  %v1630_v9 = vsel %vm48_vm1, %v1624_v4, -inf }
0x11d3   :  { %1631 = vmax.xlane.f32.xlu0 %v1630_v9 }
0x11d4   :  { %v1633_v12 = vsel %vm48_vm1, %v1627_v7, -inf }
0x11d5   :  { %1634 = vmax.xlane.f32.xlu1 %v1633_v12 }
0x11d7   :  { %v1744_v13 = vpop.f32.mrb[52].mxu0 }
0x11d8   :  { %v1745_v14 = vadd.f32 %v1744_v13, %v4588_v19  ;;  %v3828_v16 = vpop.f32.mrb[53].mxu0 }
0x11d9   :  { %v1747_v17 = vpop.f32.mrb[54].mxu0 }
0x11da   :  { %v1748_v18 = vadd.f32 %v1747_v17, %v4593_v25  ;;  %v3829_v20 = vpop.f32.mrb[55].mxu0  ;;  %v1751_v27 = vsel %vm48_vm1, %v1745_v14, -inf }
0x11db   :  { %1752 = vmax.xlane.f32.xlu0 %v1751_v27 }
0x11dc   :  { %v1754_v22 = vsel %vm48_vm1, %v1748_v18, -inf }
0x11df   :  { %1755 = vmax.xlane.f32.xlu0 %v1754_v22  ;;  %v1865_v23 = vpop.f32.mrb[56].mxu0 }
0x11e0   :  { %v1866_v24 = vadd.f32 %v1865_v23, %v4588_v19  ;;  %v3840_v26 = vpop.f32.mrb[57].mxu0 }
0x11e1   :  { %v1868_v29 = vpop.f32.mrb[58].mxu0 }
0x11e2   :  { %v1869_v30 = vadd.f32 %v1868_v29, %v4593_v25  ;;  %v3841_v31 = vpop.f32.mrb[59].mxu0  ;;  %v1872_v33 = vsel %vm48_vm1, %v1866_v24, -inf }
0x11e3   :  { %1873 = vmax.xlane.f32.xlu1 %v1872_v33 }
0x11e4   :  { %v1875_v34 = vsel %vm48_vm1, %v1869_v30, -inf }
0x11e5   :  { %1876 = vmax.xlane.f32.xlu0 %v1875_v34 }
0x11f4   :  { %1653 = vrot.lane.b32.xlu1 %v4576_v15, %s4281_s20 }
0x1260   :  { %v1632_v35 = vpop.xlane.xlu0 %1631 }
0x1261   :  { %v1636_v36 = vsub.f32 %v1624_v4, %v1632_v35 }
0x1262   :  { %v1635_v45 = vpop.xlane.xlu1 %1634 }
0x1263   :  { %v1638_v37 = vmul.f32 1.442695, %v1636_v36  ;;  %v1637_v38 = vsub.f32 %v1627_v7, %v1635_v45 }
0x1265   :  { %4158 = vpow2.f32 %v1638_v37  ;;  %v1640_v19 = vmul.f32 1.442695, %v1637_v38 }
0x1267   :  { %4160 = vpow2.f32 %v1640_v19 }
0x1268   :  { %v1753_v39 = vpop.xlane.xlu0 %1752 }
0x1269   :  { %v1757_v25 = vsub.f32 %v1745_v14, %v1753_v39  ;;  %v4086_v39 = vld [vmem:[#allocation2 + $0xd0] sm:$0xff]  }
0x126a   :  { %3849 = vmatpush3.bf16.msra.mxu0 %v4086_v39 }
0x126b   :  { %v1759_v10 = vmul.f32 1.442695, %v1757_v25  ;;  %3850 = vmatprep.subr.bf16.mxu0 %v4271_v0 }
0x126c   :  { %v1756_v11 = vpop.xlane.xlu0 %1755 }
0x126d   :  { %4162 = vpow2.f32 %v1759_v10  ;;  %v1758_v41 = vsub.f32 %v1748_v18, %v1756_v11  ;;  %v4087_v11 = vld [vmem:[#allocation2 + $0xd8] sm:$0xff]  }
0x126e   :  { %3851 = vmatpush3.bf16.msra.mxu0 %v4087_v11 }
0x126f   :  { %v4159_v42 = vpop.eup %4158  ;;  %v1761_v43 = vmul.f32 1.442695, %v1758_v41  ;;  %3862 = vmatprep.subr.bf16.mxu0 %v4271_v0 }
0x1270   :  { %v1874_v44 = vpop.xlane.xlu1 %1873  ;;  %v1642_v46 = vsel %vm48_vm1, %v4159_v42, 0.0 }
0x1271   :  { %v4161_v47 = vpop.eup %4160  ;;  %4164 = vpow2.f32 %v1761_v43  ;;  %v1878_v48 = vsub.f32 %v1866_v24, %v1874_v44  ;;  %1643 = vadd.xlane.f32.xlu1 %v1642_v46 }
0x1272   :  { %v1877_v50 = vpop.xlane.xlu0 %1876  ;;  %v1645_v52 = vsel %vm48_vm1, %v4161_v47, 0.0 }
0x1273   :  { %v1880_v53 = vmul.f32 1.442695, %v1878_v48  ;;  %v1879_v55 = vsub.f32 %v1869_v30, %v1877_v50  ;;  %1646 = vadd.xlane.f32.xlu0 %v1645_v52  ;;  %v3442_v52 = vld [vmem:[%s4963_s2 + $0x78] ss:$0 sm:$0xff] }
0x1274   :  { %v1654_v57 = vpop.permute.xlu1 %1653 }
0x1275   :  { %4166 = vpow2.f32 %v1880_v53  ;;  %v1882_v49 = vmul.f32 1.442695, %v1879_v55  ;;  %3819 = vmatpush3.bf16.msra.mxu1 %v1654_v57  ;;  %v1097_v53 = vadd.f32 %v3442_v52, %v4563_v54 }
0x1276   :  { %3830 = vmatprep.subr.bf16.mxu1 %v4271_v0 }
0x1277   :  { %v4163_v60 = vpop.eup %4162  ;;  %4168 = vpow2.f32 %v1882_v49  ;;  %v1103_v55 = vadd.f32 %v1097_v53, %v4501_v58  ;;  %v1100_v49 = vadd.f32 %v3442_v52, %v4565_v56 }
0x1278   :  { %v1763_v51 = vsel %vm48_vm1, %v4163_v60, 0.0 }
0x1279   :  { %1764 = vadd.xlane.f32.xlu1 %v1763_v51  ;;  %v1105_v57 = vsel %vm204_vm2, %v1103_v55, 0.0 }
0x127b   :  { %v4165_v61 = vpop.eup %4164 }
0x127c   :  { %v1766_v63 = vsel %vm48_vm1, %v4165_v61, 0.0 }
0x127d   :  { %1767 = vadd.xlane.f32.xlu0 %v1766_v63 }
0x127f   :  { %v4167_v2 = vpop.eup %4166 }
0x1280   :  { %v1884_v3 = vsel %vm48_vm1, %v4167_v2, 0.0 }
0x1281   :  { %v4169_v4 = vpop.eup %4168  ;;  %1885 = vadd.xlane.f32.xlu1 %v1884_v3 }
0x1282   :  { %v1887_v5 = vsel %vm48_vm1, %v4169_v4, 0.0 }
0x1283   :  { %1888 = vadd.xlane.f32.xlu0 %v1887_v5 }
0x1292   :  { %1895 = vrot.lane.b32.xlu1 %v4576_v15, %s4282_s21 }
0x1299   :  { %1774 = vrot.lane.b32.xlu0 %v4576_v15, %s4283_s23 }
0x12fe   :  { %v1644_v6 = vpop.xlane.xlu1 %1643 }
0x12ff   :  { %4170 = vrcp.f32 %v1644_v6 }
0x1300   :  { %v1647_v7 = vpop.xlane.xlu0 %1646 }
0x1301   :  { %4172 = vrcp.f32 %v1647_v7 }
0x1306   :  { %v1765_v8 = vpop.xlane.xlu1 %1764 }
0x1307   :  { %4174 = vrcp.f32 %v1765_v8 }
0x1309   :  { %v4171_v9 = vpop.eup %4170 }
0x130a   :  { %v1768_v12 = vpop.xlane.xlu0 %1767  ;;  %v1650_v14 = vmul.f32 %v4171_v9, %v4159_v42 }
0x130b   :  { %v4173_v13 = vpop.eup %4172  ;;  %4176 = vrcp.f32 %v1768_v12 }
0x130c   :  { %v1651_v16 = vmul.f32 %v4173_v13, %v4161_v47 }
0x130e   :  { %v1886_v17 = vpop.xlane.xlu1 %1885  ;;  %v1652_v18 = vpack.c.bf16 %v1651_v16, %v1650_v14 }
0x130f   :  { %4178 = vrcp.f32 %v1886_v17 }
0x1310   :  { %3821 = vmatmul.mubr.msk.bf16.vlgmr.msra.gmra.mrb[36].mxu1 %vm48_vm1, %v1652_v18  ;;  %v1889_v20 = vpop.xlane.xlu0 %1888 }
0x1311   :  { %4180 = vrcp.f32 %v1889_v20  ;;  %3832 = vmatprep.mubr.msk.bf16.mxu1 %vm4272_vm0, %v4271_v0  ;;  %v4175_v15 = vpop.eup %4174 }
0x1312   :  { %v1771_v23 = vmul.f32 %v4175_v15, %v4163_v60  ;;  %v1896_v30 = vpop.permute.xlu1 %1895  ;;  %v1104_v60 = vadd.f32 %v1100_v49, %v4503_v59 }
0x1314   :  { %v1775_v27 = vpop.permute.xlu0 %1774  ;;  %v1108_v51 = vsel %vm204_vm2, %v1104_v60, 0.0 }
0x1315   :  { %v4177_v22 = vpop.eup %4176  ;;  %3831 = vmatpush3.bf16.msra.mxu1 %v1775_v27 }
0x1316   :  { %v1772_v24 = vmul.f32 %v4177_v22, %v4165_v61  ;;  %3842 = vmatprep.subr.bf16.mxu1 %v4271_v0 }
0x1318   :  { %v1773_v26 = vpack.c.bf16 %v1772_v24, %v1771_v23 }
0x1319   :  { %v4179_v29 = vpop.eup %4178 }
0x131a   :  { %3833 = vmatmul.mubr.msk.bf16.vlgmr.msra.gmra.mrb[40].mxu1 %vm48_vm1, %v1773_v26  ;;  %v1892_v34 = vmul.f32 %v4179_v29, %v4167_v2 }
0x131b   :  { %v4181_v31 = vpop.eup %4180  ;;  %3843 = vmatpush3.bf16.msra.mxu1 %v1896_v30  ;;  %3844 = vmatprep.mubr.msk.bf16.mxu1 %vm4272_vm0, %v4271_v0 }
0x131c   :  { %v1893_v33 = vmul.f32 %v4181_v31, %v4169_v4  ;;  %3856 = vmatprep.subr.bf16.mxu1 %v4271_v0 }
0x131e   :  { %v1894_v35 = vpack.c.bf16 %v1893_v33, %v1892_v34  ;;  %v3474_v34 = vld [vmem:[%s4963_s2 + $0xa8] ss:$0 sm:$0xff] }
0x1322   :  { %3845 = vmatmul.mubr.msk.bf16.vlgmr.msra.gmra.mrb[44].mxu1 %vm48_vm1, %v1894_v35 }
0x1323   :  { %3858 = vmatprep.mubr.msk.bf16.mxu1 %vm4272_vm0, %v4271_v0 }
0x13e3   :  { %v1693_v36 = vpop.f32.mrb[36].mxu1 }
0x13e4   :  { %v3822_v45 = vpop.f32.mrb[37].mxu1 }
0x13e5   :  { %v1696_v37 = vpop.f32.mrb[38].mxu1 }
0x13e6   :  { %v4030_v38 = vpack.i.bf16 %v1696_v37, %v1693_v36  ;;  %v3823_v19 = vpop.f32.mrb[39].mxu1  ;;  %v3448_v36 = vld [vmem:[%s4963_s2 + $0x80] ss:$0 sm:$0xff] }
0x13e8   :  { %4031 = vrot.lane.b32.xlu1 %v4030_v38, %s4284_s24 }
0x13ed   :  { %v1814_v25 = vpop.f32.mrb[40].mxu1 }
0x13ee   :  { %v3834_v10 = vpop.f32.mrb[41].mxu1 }
0x13ef   :  { %v1817_v41 = vpop.f32.mrb[42].mxu1 }
0x13f0   :  { %v4035_v42 = vpack.i.bf16 %v1817_v41, %v1814_v25  ;;  %v3835_v43 = vpop.f32.mrb[43].mxu1  ;;  %v3449_v25 = vld [vmem:[%s4963_s2 + $0x88] ss:$0 sm:$0xff] }
0x13f2   :  { %4036 = vrot.lane.b32.xlu0 %v4035_v42, %s4285_s25 }
0x13f5   :  { %v1935_v44 = vpop.f32.mrb[44].mxu1 }
0x13f6   :  { %v3846_v46 = vpop.f32.mrb[45].mxu1 }
0x13f7   :  { %v1938_v47 = vpop.f32.mrb[46].mxu1 }
0x13f8   :  { %v4040_v48 = vpack.i.bf16 %v1938_v47, %v1935_v44  ;;  %v3847_v50 = vpop.f32.mrb[47].mxu1 }
0x13fa   :  { %4041 = vrot.lane.b32.xlu1 %v4040_v48, %s4286_s26 }
0x1411   :  { %1106 = vadd.xlane.f32.xlu0 %v1105_v57 }
0x141e   :  { %1109 = vadd.xlane.f32.xlu1 %v1108_v51 }
0x145a   :  { %v4032_v61 = vpop.permute.xlu1 %4031 }
0x145b   :  { %v4034_v2 = vunpack.i.h.bf16 %v4032_v61  ;;  %v4033_v3 = vunpack.i.l.bf16 %v4032_v61 }
0x145d   :  { %v1967_v58 = vsel %vm315_vm5, %v4633_v1, %v4034_v2  ;;  %v1966_v54 = vsel %vm315_vm5, %v4631_v62, %v4033_v3 }
0x1464   :  { %v4037_v63 = vpop.permute.xlu0 %4036 }
0x1465   :  { %v4039_v4 = vunpack.i.h.bf16 %v4037_v63  ;;  %v4038_v5 = vunpack.i.l.bf16 %v4037_v63 }
0x1467   :  { %v1969_v59 = vsel %vm48_vm1, %v1967_v58, %v4039_v4  ;;  %v1968_v8 = vsel %vm48_vm1, %v1966_v54, %v4038_v5 }
0x146c   :  { %v4042_v6 = vpop.permute.xlu1 %4041 }
0x146d   :  { %v4044_v7 = vunpack.i.h.bf16 %v4042_v6  ;;  %v4043_v56 = vunpack.i.l.bf16 %v4042_v6 }
0x146f   :  { %v1971_v9 = vsel %vm825_vm6, %v1969_v59, %v4044_v7  ;;  %v1970_v12 = vsel %vm825_vm6, %v1968_v8, %v4043_v56 }
0x1470   :  { %v1972_v13 = vpack.c.bf16 %v1971_v9, %v1970_v12 }
0x1472   :  { %3853 = vmatmul.mubr.msk.bf16.vlgmr.msra.gmra.mrb[60].mxu0 %vm204_vm2, %v1972_v13 }
0x1473   :  { %3864 = vmatprep.mubr.msk.bf16.mxu0 %vm4272_vm0, %v4271_v0 }
0x149e   :  { %v1107_v1 = vpop.xlane.xlu0 %1106 }
0x149f   :  { %v1111_v14 = vmul.f32 0.03125, %v1107_v1 }
0x14a1   :  { %v1113_v16 = vsub.f32 %v1103_v55, %v1111_v14 }
0x14a3   :  { %v1115_v62 = vmul.f32 %v1113_v16, %v1113_v16 }
0x14a5   :  { %v1117_v17 = vsel %vm204_vm2, %v1115_v62, 0.0 }
0x14a6   :  { %1118 = vadd.xlane.f32.xlu0 %v1117_v17 }
0x14ab   :  { %v1110_v18 = vpop.xlane.xlu1 %1109 }
0x14ac   :  { %v1112_v20 = vmul.f32 0.03125, %v1110_v18 }
0x14ae   :  { %v1114_v15 = vsub.f32 %v1104_v60, %v1112_v20 }
0x14b0   :  { %v1116_v27 = vmul.f32 %v1114_v15, %v1114_v15 }
0x14b2   :  { %v1120_v22 = vsel %vm204_vm2, %v1116_v27, 0.0 }
0x14b3   :  { %1121 = vadd.xlane.f32.xlu0 %v1120_v22 }
0x1533   :  { %v1119_v23 = vpop.xlane.xlu0 %1118 }
0x1534   :  { %v1123_v24 = vmul.f32 0.03125, %v1119_v23 }
0x1536   :  { %v1125_v26 = vadd.f32 1e-05, %v1123_v24  ;;  %v3478_v24 = vld [vmem:[%s4963_s2 + $0xb0] ss:$0 sm:$0xff] }
0x1538   :  { %4182 = vrsqrt.f32 %v1125_v26 }
0x1540   :  { %v1122_v29 = vpop.xlane.xlu0 %1121 }
0x1541   :  { %v1124_v30 = vmul.f32 0.03125, %v1122_v29 }
0x1542   :  { %v4183_v31 = vpop.eup %4182 }
0x1543   :  { %v1126_v33 = vadd.f32 1e-05, %v1124_v30  ;;  %v1129_v35 = vmul.f32 %v4183_v31, %v1113_v16 }
0x1545   :  { %4184 = vrsqrt.f32 %v1126_v33  ;;  %v2031_v45 = vpop.f32.mrb[60].mxu0  ;;  %v1136_v19 = vmul.f32 %v3448_v36, %v1129_v35  ;;  %v3479_v33 = vld [vmem:[%s4963_s2 + $0xb8] ss:$0 sm:$0xff] }
0x1546   :  { %v2032_v37 = vadd.f32 %v3474_v34, %v2031_v45  ;;  %v3854_v38 = vpop.f32.mrb[61].mxu0 }
0x1547   :  { %v2034_v39 = vpop.f32.mrb[62].mxu0  ;;  %v1143_v44 = vadd.f32 %v3449_v25, %v1136_v19  ;;  %v3450_v19 = vld [vmem:[%s4963_s2 + $0x90] ss:$0 sm:$0xff] }
0x1548   :  { %v2035_v10 = vadd.f32 %v3474_v34, %v2034_v39  ;;  %v3855_v11 = vpop.f32.mrb[63].mxu0  ;;  %v2038_v41 = vadd.f32 %v2032_v37, %v4533_v21 }
0x1549   :  { %v1145_v47 = vsel %vm204_vm2, %v1143_v44, 0.0  ;;  %v3451_v11 = vld [vmem:[%s4963_s2 + $0x98] ss:$0 sm:$0xff] }
0x154a   :  { %v2040_v42 = vsel %vm204_vm2, %v2038_v41, 0.0  ;;  %v2039_v43 = vadd.f32 %v2035_v10, %v4535_v28 }
0x154b   :  { %2041 = vadd.xlane.f32.xlu1 %v2040_v42 }
0x154c   :  { %v2043_v46 = vsel %vm204_vm2, %v2039_v43, 0.0 }
0x154d   :  { %2044 = vadd.xlane.f32.xlu0 %v2043_v46  ;;  %v4088_v46 = vld [vmem:[#allocation2 + $0x110] sm:$0xff]  }
0x154f   :  { %v4185_v48 = vpop.eup %4184  ;;  %1146 = vadd.xlane.f32.xlu1 %v1145_v47  ;;  %v4090_v47 = vld [vmem:[#allocation2 + $0xe0] sm:$0xff]  }
0x1550   :  { %v1130_v50 = vmul.f32 %v4185_v48, %v1114_v15  ;;  %v4089_v48 = vld [vmem:[#allocation2 + $0x118] sm:$0xff]  }
0x1552   :  { %v1137_v52 = vmul.f32 %v3448_v36, %v1130_v50  ;;  %v4092_v50 = vld [vmem:[#allocation2 + $0xe8] sm:$0xff]  }
0x1554   :  { %v1144_v53 = vadd.f32 %v3449_v25, %v1137_v52  ;;  %v4091_v52 = vld [vmem:[#allocation2 + $0x120] sm:$0xff]  }
0x1556   :  { %v1148_v55 = vsel %vm204_vm2, %v1144_v53, 0.0 }
0x1557   :  { %1149 = vadd.xlane.f32.xlu0 %v1148_v55  ;;  %v4093_v55 = vld [vmem:[#allocation2 + $0x128] sm:$0xff]  }
0x15d8   :  { %v2042_v21 = vpop.xlane.xlu1 %2041 }
0x15d9   :  { %v2046_v57 = vmul.f32 0.03125, %v2042_v21  ;;  %v4096_v21 = vld [vmem:[#allocation2 + $0xf8] sm:$0xff]  }
0x15da   :  { %v2045_v49 = vpop.xlane.xlu0 %2044 }
0x15db   :  { %v2048_v60 = vsub.f32 %v2038_v41, %v2046_v57  ;;  %v2047_v28 = vmul.f32 0.03125, %v2045_v49  ;;  %v4095_v57 = vld [vmem:[#allocation2 + $0x130] sm:$0xff]   ;;  %v4097_v49 = vld [vmem:[#allocation2 + $0x138] sm:$0xff]  }
0x15dc   :  { %v1147_v51 = vpop.xlane.xlu1 %1146 }
0x15dd   :  { %v2049_v61 = vsub.f32 %v2039_v43, %v2047_v28  ;;  %v1151_v63 = vmul.f32 0.03125, %v1147_v51  ;;  %v2050_v2 = vmul.f32 %v2048_v60, %v2048_v60 }
0x15df   :  { %v1153_v3 = vsub.f32 %v1143_v44, %v1151_v63  ;;  %v2052_v4 = vsel %vm204_vm2, %v2050_v2, 0.0  ;;  %v2051_v5 = vmul.f32 %v2049_v61, %v2049_v61 }
0x15e0   :  { %2053 = vadd.xlane.f32.xlu1 %v2052_v4 }
0x15e1   :  { %v2055_v6 = vsel %vm204_vm2, %v2051_v5, 0.0  ;;  %v1155_v58 = vmul.f32 %v1153_v3, %v1153_v3 }
0x15e2   :  { %2056 = vadd.xlane.f32.xlu0 %v2055_v6 }
0x15e3   :  { %v1157_v54 = vsel %vm204_vm2, %v1155_v58, 0.0  ;;  %v4098_v58 = vld [vmem:[#allocation2 + $0x100] sm:$0xff]  }
0x15e4   :  { %1158 = vadd.xlane.f32.xlu1 %v1157_v54  ;;  %v1150_v7 = vpop.xlane.xlu0 %1149 }
0x15e5   :  { %v1152_v56 = vmul.f32 0.03125, %v1150_v7 }
0x15e7   :  { %v1154_v59 = vsub.f32 %v1144_v53, %v1152_v56  ;;  %v4094_v53 = vld [vmem:[#allocation2 + $0xf0] sm:$0xff]  }
0x15e9   :  { %v1156_v8 = vmul.f32 %v1154_v59, %v1154_v59 }
0x15eb   :  { %v1160_v9 = vsel %vm204_vm2, %v1156_v8, 0.0 }
0x15ec   :  { %1161 = vadd.xlane.f32.xlu0 %v1160_v9  ;;  %v4099_v9 = vld [vmem:[#allocation2 + $0x108] sm:$0xff]  }
0x166d   :  { %v2054_v12 = vpop.xlane.xlu1 %2053 }
0x166e   :  { %v2058_v13 = vmul.f32 0.03125, %v2054_v12 }
0x166f   :  { %v2057_v1 = vpop.xlane.xlu0 %2056 }
0x1670   :  { %v2060_v14 = vadd.f32 1e-05, %v2058_v13  ;;  %v2059_v16 = vmul.f32 0.03125, %v2057_v1 }
0x1671   :  { %v1159_v62 = vpop.xlane.xlu1 %1158 }
0x1672   :  { %4186 = vrsqrt.f32 %v2060_v14  ;;  %v2061_v17 = vadd.f32 1e-05, %v2059_v16  ;;  %v1163_v18 = vmul.f32 0.03125, %v1159_v62 }
0x1674   :  { %4188 = vrsqrt.f32 %v2061_v17  ;;  %v1165_v20 = vadd.f32 1e-05, %v1163_v18 }
0x1676   :  { %4190 = vrsqrt.f32 %v1165_v20 }
0x1679   :  { %v1162_v15 = vpop.xlane.xlu0 %1161 }
0x167a   :  { %v1164_v27 = vmul.f32 0.03125, %v1162_v15 }
0x167c   :  { %v4187_v22 = vpop.eup %4186  ;;  %v1166_v23 = vadd.f32 1e-05, %v1164_v27 }
0x167d   :  { %v2064_v26 = vmul.f32 %v4187_v22, %v2048_v60 }
0x167e   :  { %v4189_v29 = vpop.eup %4188  ;;  %4192 = vrsqrt.f32 %v1166_v23 }
0x167f   :  { %v2065_v30 = vmul.f32 %v4189_v29, %v2049_v61  ;;  %v2071_v31 = vmul.f32 %v3478_v24, %v2064_v26 }
0x1680   :  { %v4191_v35 = vpop.eup %4190 }
0x1681   :  { %v2072_v34 = vmul.f32 %v3478_v24, %v2065_v30  ;;  %v4723_v36 = vadd.f32 %v3479_v33, %v2071_v31  ;;  %v1169_v38 = vmul.f32 %v4191_v35, %v1153_v3  ;;  %v3492_v24 = vld [vmem:[%s4963_s2 + $0xc8] ss:$0 sm:$0xff] }
0x1683   :  { %v4725_v45 = vadd.f32 %v3479_v33, %v2072_v34  ;;  %v1176_v10 = vmul.f32 %v3450_v19, %v1169_v38 }
0x1685   :  { %v4729_v37 = vpack.c.bf16 %v4725_v45, %v4723_v36  ;;  %v1183_v42 = vadd.f32 %v3451_v11, %v1176_v10 }
0x1687   :  { %3857 = vmatpush3.bf16.msra.mxu1 %v4729_v37  ;;  %3863 = vmatpush3.bf16.msra.mxu0 %v4729_v37 }
0x1688   :  { %v4193_v39 = vpop.eup %4192  ;;  %3884 = vmatprep.subr.bf16.mxu0 %v4271_v0  ;;  %3868 = vmatprep.subr.bf16.mxu1 %v4271_v0 }
0x1689   :  { %v1170_v25 = vmul.f32 %v4193_v39, %v1154_v59 }
0x168a   :  { %3865 = vmatmul.mubr.msk.bf16.vlgmr.msra.gmra.mrb[64].mxu0 %vm48_vm1, %v4551_v40  ;;  %3859 = vmatmul.mubr.msk.bf16.vlgmr.msra.gmra.mrb[48].mxu1 %vm48_vm1, %v4539_v32  ;;  %v4242_v40 = vld [vmem:[#allocation2 + $0x10] sm:$0xff]   ;;  %v4243_v32 = vld [vmem:[#allocation2] sm:$0xff]  }
0x168b   :  { %v1177_v41 = vmul.f32 %v3450_v19, %v1170_v25  ;;  %3886 = vmatprep.mubr.msk.bf16.mxu0 %vm4272_vm0, %v4271_v0  ;;  %3880 = vmatprep.mubr.msk.bf16.mxu1 %vm4272_vm0, %v4271_v0 }
0x168c   :  { %3869 = vmatpush3.bf16.msra.mxu1 %v4090_v47 }
0x168d   :  { %v1184_v43 = vadd.f32 %v3451_v11, %v1177_v41  ;;  %3870 = vmatprep.subr.bf16.mxu1 %v4271_v0 }
0x168f   :  { %v2272_v44 = vpack.c.bf16 %v1184_v43, %v1183_v42 }
0x1690   :  { %3871 = vmatpush3.bf16.msra.mxu1 %v4092_v50 }
0x1691   :  { %2361 = vrot.lane.b32.xlu0 %v2272_v44, %s4269_s22  ;;  %3885 = vmatpush3.bf16.msra.mxu0 %v2272_v44 }
0x1692   :  { %3890 = vmatprep.subr.bf16.mxu0 %v4271_v0  ;;  %3872 = vmatprep.subr.bf16.mxu1 %v4271_v0 }
0x1694   :  { %3887 = vmatmul.mubr.msk.bf16.vlgmr.msra.gmra.mrb[68].mxu0 %vm48_vm1, %v4242_v40  ;;  %3873 = vmatpush3.bf16.msra.mxu1 %v4094_v53  ;;  %v4801_v40 = vld [vmem:[%s4963_s2 + $0x40] sm:$0xff] }
0x1695   :  { %3891 = vmatpush3.bf16.msra.mxu0 %v2272_v44  ;;  %3892 = vmatprep.mubr.msk.bf16.mxu0 %vm4272_vm0, %v4271_v0 }
0x1696   :  { %3896 = vmatprep.subr.bf16.mxu0 %v4271_v0  ;;  %3874 = vmatprep.subr.bf16.mxu1 %v4271_v0 }
0x1698   :  { %3875 = vmatpush3.bf16.msra.mxu1 %v4096_v21 }
0x1699   :  { %3876 = vmatprep.subr.bf16.mxu1 %v4271_v0 }
0x169c   :  { %3893 = vmatmul.mubr.msk.bf16.vlgmr.msra.gmra.mrb[72].mxu0 %vm48_vm1, %v4243_v32  ;;  %3877 = vmatpush3.bf16.msra.mxu1 %v4098_v58 }
0x169d   :  { %3908 = vmatprep.mubr.msk.bf16.mxu0 %vm4272_vm0, %v4271_v0  ;;  %3897 = vmatpush3.bf16.msra.mxu0 %v4088_v46  ;;  %v4806_v46 = vld [vmem:[%s4963_s2 + $0x48] sm:$0xff] }
0x169e   :  { %3898 = vmatprep.subr.bf16.mxu0 %v4271_v0  ;;  %3878 = vmatprep.subr.bf16.mxu1 %v4271_v0 }
0x16a0   :  { %3879 = vmatpush3.bf16.msra.mxu1 %v4099_v9 }
0x16a1   :  { %3899 = vmatpush3.bf16.msra.mxu0 %v4089_v48  ;;  %3912 = vmatprep.subr.bf16.mxu1 %v4271_v0 }
0x16a2   :  { %3900 = vmatprep.subr.bf16.mxu0 %v4271_v0 }
0x16a5   :  { %3901 = vmatpush3.bf16.msra.mxu0 %v4091_v52 }
0x16a6   :  { %3902 = vmatprep.subr.bf16.mxu0 %v4271_v0 }
0x16a9   :  { %3903 = vmatpush3.bf16.msra.mxu0 %v4093_v55 }
0x16aa   :  { %3904 = vmatprep.subr.bf16.mxu0 %v4271_v0 }
0x16ad   :  { %3905 = vmatpush3.bf16.msra.mxu0 %v4095_v57 }
0x16ae   :  { %3906 = vmatprep.subr.bf16.mxu0 %v4271_v0 }
0x16b1   :  { %3907 = vmatpush3.bf16.msra.mxu0 %v4097_v49 }
0x16b2   :  { %3930 = vmatprep.subr.bf16.mxu0 %v4271_v0 }
0x1703   :  { %v2362_v17 = vpop.permute.xlu0 %2361 }
0x175d   :  { %v2157_v60 = vpop.f32.mrb[64].mxu0  ;;  %v2115_v28 = vpop.f32.mrb[48].mxu1 }
0x175e   :  { %v3866_v51 = vpop.f32.mrb[65].mxu0  ;;  %v3860_v61 = vpop.f32.mrb[49].mxu1 }
0x175f   :  { %v2160_v63 = vpop.f32.mrb[66].mxu0  ;;  %v2118_v6 = vpop.f32.mrb[50].mxu1 }
0x1760   :  { %v2164_v2 = vpack.c.bf16 %v2160_v63, %v2157_v60  ;;  %v3867_v3 = vpop.f32.mrb[67].mxu0  ;;  %v2122_v7 = vpack.c.bf16 %v2118_v6, %v2115_v28  ;;  %v3861_v56 = vpop.f32.mrb[51].mxu1 }
0x1767   :  { %v2307_v4 = vpop.f32.mrb[68].mxu0 }
0x1768   :  { %v3888_v5 = vpop.f32.mrb[69].mxu0 }
0x1769   :  { %v2310_v54 = vpop.f32.mrb[70].mxu0 }
0x176a   :  { %v2314_v59 = vpack.c.bf16 %v2310_v54, %v2307_v4  ;;  %v3889_v8 = vpop.f32.mrb[71].mxu0 }
0x176f   :  { %v2349_v12 = vpop.f32.mrb[72].mxu0 }
0x1770   :  { %v3894_v13 = vpop.f32.mrb[73].mxu0 }
0x1771   :  { %v2352_v1 = vpop.f32.mrb[74].mxu0 }
0x1772   :  { %v2356_v14 = vpack.c.bf16 %v2352_v1, %v2349_v12  ;;  %v3895_v16 = vpop.f32.mrb[75].mxu0 }
0x1774   :  { %2358 = vrot.lane.b32.xlu1 %v2356_v14, %s4273_s6 }
0x1778   :  { %2166 = vrot.lane.b32.xlu1 %v2164_v2, %s4273_s6 }
0x177c   :  { %2169 = vrot.lane.b32.xlu1 %v4729_v37, %s4269_s22  ;;  %v3482_v37 = vld [vmem:[%s4963_s2 + $0xc0] ss:$0 sm:$0xff] }
0x17e6   :  { %v2359_v62 = vpop.permute.xlu1 %2358 }
0x17e7   :  { %v2365_v18 = vsel %vm204_vm2, %v2314_v59, %v2359_v62 }
0x17e8   :  { %v2367_v20 = vsel %vm208_vm3, %v2365_v18, %v2362_v17 }
0x17e9   :  { %3909 = vmatmul.mubr.msk.bf16.vlgmr.msra.gmra.mrb[76].mxu0 %vm264_vm4, %v2367_v20 }
0x17ea   :  { %v2167_v15 = vpop.permute.xlu1 %2166  ;;  %3932 = vmatprep.mubr.msk.bf16.mxu0 %vm4272_vm0, %v4271_v0 }
0x17eb   :  { %v2173_v27 = vsel %vm204_vm2, %v2122_v7, %v2167_v15 }
0x17ee   :  { %v2170_v22 = vpop.permute.xlu1 %2169 }
0x17ef   :  { %v2175_v23 = vsel %vm208_vm3, %v2173_v27, %v2170_v22 }
0x17f0   :  { %3881 = vmatmul.mubr.msk.bf16.vlgmr.msra.gmra.mrb[52].mxu1 %vm264_vm4, %v2175_v23 }
0x17f1   :  { %3914 = vmatprep.mubr.msk.bf16.mxu1 %vm4272_vm0, %v4271_v0 }
0x18bc   :  { %v2457_v26 = vpop.f32.mrb[76].mxu0 }
0x18bd   :  { %v3910_v29 = vpop.f32.mrb[77].mxu0  ;;  %v2458_v31 = vadd.f32 %v3492_v24, %v2457_v26 }
0x18be   :  { %v2460_v30 = vpop.f32.mrb[78].mxu0 }
0x18bf   :  { %v2461_v33 = vadd.f32 %v3492_v24, %v2460_v30  ;;  %v3911_v34 = vpop.f32.mrb[79].mxu0 }
0x18c1   :  { %v4787_v35 = vpack.c.bf16 %v2461_v33, %v2458_v31 }
0x18c3   :  { %v2265_v38 = vpop.f32.mrb[52].mxu1  ;;  %v2472_v19 = vsel %vm315_vm5, %v4787_v35, 0 }
0x18c4   :  { %v2266_v39 = vadd.f32 %v3482_v37, %v2265_v38  ;;  %v3882_v25 = vpop.f32.mrb[53].mxu1  ;;  %3913 = vmatpush3.bf16.xpose.msra.mxu1 %v2472_v19 }
0x18c5   :  { %v2268_v10 = vpop.f32.mrb[54].mxu1  ;;  %3918 = vmatprep.subr.bf16.mxu1 %v4271_v0 }
0x18c6   :  { %v2269_v11 = vadd.f32 %v3482_v37, %v2268_v10  ;;  %v3883_v41 = vpop.f32.mrb[55].mxu1  ;;  %v2464_v42 = vmul.f32 0.35355338, %v2266_v39 }
0x18c8   :  { %v2465_v43 = vmul.f32 0.35355338, %v2269_v11 }
0x18ca   :  { %v2466_v44 = vpack.c.bf16 %v2465_v43, %v2464_v42 }
0x18cc   :  { %3915 = vmatmul.mubr.msk.bf16.vlgmr.msra.gmra.mrb[56].mxu1 %vm315_vm5, %v2466_v44 }
0x18cd   :  { %3920 = vmatprep.mubr.msk.bf16.mxu1 %vm4272_vm0, %v4271_v0 }
0x199f   :  { %v2508_v32 = vpop.f32.mrb[56].mxu1 }
0x19a0   :  { %v2509_v47 = vadd.f32 %v2508_v32, %v4801_v40  ;;  %v3916_v48 = vpop.f32.mrb[57].mxu1 }
0x19a1   :  { %v2511_v50 = vpop.f32.mrb[58].mxu1 }
0x19a2   :  { %v2512_v52 = vadd.f32 %v2511_v50, %v4806_v46  ;;  %v3917_v53 = vpop.f32.mrb[59].mxu1  ;;  %v2515_v55 = vsel %vm48_vm1, %v2509_v47, -inf }
0x19a3   :  { %2516 = vmax.xlane.f32.xlu0 %v2515_v55 }
0x19a4   :  { %v2518_v21 = vsel %vm48_vm1, %v2512_v52, -inf }
0x19a5   :  { %2519 = vmax.xlane.f32.xlu1 %v2518_v21 }
0x19b6   :  { %2539 = vrot.lane.b32.xlu1 %v4787_v35, %s4274_s9 }
0x19ba   :  { %2587 = vrot.lane.b32.xlu1 %v2466_v44, %s4276_s15 }
0x19be   :  { %2710 = vrot.lane.b32.xlu1 %v4787_v35, %s4278_s17 }
0x19c2   :  { %2831 = vrot.lane.b32.xlu1 %v4787_v35, %s4280_s19 }
0x1a30   :  { %v2517_v57 = vpop.xlane.xlu0 %2516 }
0x1a31   :  { %v2521_v49 = vsub.f32 %v2509_v47, %v2517_v57 }
0x1a32   :  { %v2520_v60 = vpop.xlane.xlu1 %2519 }
0x1a33   :  { %v2523_v28 = vmul.f32 1.442695, %v2521_v49  ;;  %v2522_v51 = vsub.f32 %v2512_v52, %v2520_v60 }
0x1a35   :  { %4194 = vpow2.f32 %v2523_v28  ;;  %v2525_v61 = vmul.f32 1.442695, %v2522_v51 }
0x1a36   :  { %v2540_v63 = vpop.permute.xlu1 %2539 }
0x1a37   :  { %4196 = vpow2.f32 %v2525_v61  ;;  %3919 = vmatpush3.bf16.msra.mxu1 %v2540_v63 }
0x1a38   :  { %3924 = vmatprep.subr.bf16.mxu1 %v4271_v0 }
0x1a3a   :  { %v2588_v12 = vpop.permute.xlu1 %2587 }
0x1a3e   :  { %v2711_v1 = vpop.permute.xlu1 %2710 }
0x1a3f   :  { %v4195_v2 = vpop.eup %4194  ;;  %v2716_v14 = vsel %vm315_vm5, %v2711_v1, 0 }
0x1a40   :  { %v2527_v3 = vsel %vm48_vm1, %v4195_v2, 0.0 }
0x1a41   :  { %v4197_v4 = vpop.eup %4196  ;;  %2528 = vadd.xlane.f32.xlu0 %v2527_v3 }
0x1a42   :  { %v2530_v5 = vsel %vm48_vm1, %v4197_v4, 0.0  ;;  %v2832_v16 = vpop.permute.xlu1 %2831 }
0x1a43   :  { %v2837_v17 = vsel %vm315_vm5, %v2832_v16, 0 }
0x1a45   :  { %2531 = vadd.xlane.f32.xlu0 %v2530_v5 }
0x1a5b   :  { %2589 = vrot.lane.b32.xlu0 %v4787_v35, %s4276_s15 }
0x1a5f   :  { %2708 = vrot.lane.b32.xlu0 %v2466_v44, %s4278_s17 }
0x1a63   :  { %2829 = vrot.lane.b32.xlu0 %v2466_v44, %s4280_s19 }
0x1ace   :  { %v2529_v6 = vpop.xlane.xlu0 %2528 }
0x1acf   :  { %4198 = vrcp.f32 %v2529_v6 }
0x1ad2   :  { %v2532_v58 = vpop.xlane.xlu0 %2531 }
0x1ad3   :  { %4200 = vrcp.f32 %v2532_v58 }
0x1ad6   :  { %v2590_v8 = vpop.permute.xlu0 %2589 }
0x1ad7   :  { %v2595_v13 = vsel %vm315_vm5, %v2590_v8, 0 }
0x1ad9   :  { %v4199_v54 = vpop.eup %4198 }
0x1ada   :  { %v2535_v56 = vmul.f32 %v4199_v54, %v4195_v2  ;;  %v2709_v62 = vpop.permute.xlu0 %2708 }
0x1add   :  { %v4201_v7 = vpop.eup %4200 }
0x1ade   :  { %v2536_v59 = vmul.f32 %v4201_v7, %v4197_v4  ;;  %v2830_v18 = vpop.permute.xlu0 %2829 }
0x1ae0   :  { %v2537_v9 = vpack.c.bf16 %v2536_v59, %v2535_v56 }
0x1ae2   :  { %3921 = vmatmul.mubr.msk.bf16.vlgmr.msra.gmra.mrb[60].mxu1 %vm48_vm1, %v2537_v9 }
0x1ae3   :  { %3925 = vmatpush3.bf16.xpose.msra.mxu1 %v2595_v13  ;;  %3926 = vmatprep.mubr.msk.bf16.mxu1 %vm4272_vm0, %v4271_v0 }
0x1ae4   :  { %3936 = vmatprep.subr.bf16.mxu1 %v4271_v0 }
0x1aea   :  { %3927 = vmatmul.mubr.msk.bf16.vlgmr.msra.gmra.mrb[64].mxu1 %vm315_vm5, %v2588_v12 }
0x1aeb   :  { %3937 = vmatpush3.bf16.xpose.msra.mxu1 %v2716_v14  ;;  %3938 = vmatprep.mubr.msk.bf16.mxu1 %vm4272_vm0, %v4271_v0 }
0x1aec   :  { %3948 = vmatprep.subr.bf16.mxu1 %v4271_v0 }
0x1af2   :  { %3939 = vmatmul.mubr.msk.bf16.vlgmr.msra.gmra.mrb[68].mxu1 %vm315_vm5, %v2709_v62 }
0x1af3   :  { %3949 = vmatpush3.bf16.xpose.msra.mxu1 %v2837_v17  ;;  %3950 = vmatprep.mubr.msk.bf16.mxu1 %vm4272_vm0, %v4271_v0 }
0x1af4   :  { %3960 = vmatprep.subr.bf16.mxu1 %v4271_v0 }
0x1afa   :  { %3951 = vmatmul.mubr.msk.bf16.vlgmr.msra.gmra.mrb[72].mxu1 %vm315_vm5, %v2830_v18 }
0x1afb   :  { %3964 = vmatprep.mubr.msk.bf16.mxu1 %vm4272_vm0, %v4271_v0 }
0x1bb5   :  { %v4844_v20 = vpop.f32.mrb[60].mxu1 }
0x1bb6   :  { %v3922_v15 = vpop.f32.mrb[61].mxu1 }
0x1bb7   :  { %v4846_v27 = vpop.f32.mrb[62].mxu1 }
0x1bb8   :  { %v3923_v22 = vpop.f32.mrb[63].mxu1 }
0x1bbd   :  { %v2631_v23 = vpop.f32.mrb[64].mxu1 }
0x1bbe   :  { %v2632_v24 = vadd.f32 %v2631_v23, %v4801_v40  ;;  %v3928_v26 = vpop.f32.mrb[65].mxu1 }
0x1bbf   :  { %v2634_v29 = vpop.f32.mrb[66].mxu1 }
0x1bc0   :  { %v2635_v30 = vadd.f32 %v2634_v29, %v4806_v46  ;;  %v3929_v31 = vpop.f32.mrb[67].mxu1  ;;  %v2638_v33 = vsel %vm48_vm1, %v2632_v24, -inf }
0x1bc1   :  { %2639 = vmax.xlane.f32.xlu1 %v2638_v33 }
0x1bc2   :  { %v2641_v34 = vsel %vm48_vm1, %v2635_v30, -inf }
0x1bc3   :  { %2642 = vmax.xlane.f32.xlu0 %v2641_v34 }
0x1bc5   :  { %v2752_v37 = vpop.f32.mrb[68].mxu1 }
0x1bc6   :  { %v2753_v38 = vadd.f32 %v2752_v37, %v4801_v40  ;;  %v3940_v19 = vpop.f32.mrb[69].mxu1 }
0x1bc7   :  { %v2755_v39 = vpop.f32.mrb[70].mxu1 }
0x1bc8   :  { %v2756_v25 = vadd.f32 %v2755_v39, %v4806_v46  ;;  %v3941_v10 = vpop.f32.mrb[71].mxu1  ;;  %v2759_v11 = vsel %vm48_vm1, %v2753_v38, -inf }
0x1bc9   :  { %2760 = vmax.xlane.f32.xlu0 %v2759_v11 }
0x1bca   :  { %v2762_v41 = vsel %vm48_vm1, %v2756_v25, -inf }
0x1bcb   :  { %2763 = vmax.xlane.f32.xlu1 %v2762_v41 }
0x1bcd   :  { %v2873_v42 = vpop.f32.mrb[72].mxu1 }
0x1bce   :  { %v2874_v43 = vadd.f32 %v2873_v42, %v4801_v40  ;;  %v3952_v44 = vpop.f32.mrb[73].mxu1 }
0x1bcf   :  { %v2876_v32 = vpop.f32.mrb[74].mxu1 }
0x1bd0   :  { %v2877_v47 = vadd.f32 %v2876_v32, %v4806_v46  ;;  %v3953_v48 = vpop.f32.mrb[75].mxu1  ;;  %v2880_v50 = vsel %vm48_vm1, %v2874_v43, -inf }
0x1bd1   :  { %2881 = vmax.xlane.f32.xlu0 %v2880_v50  ;;  %v4100_v50 = vld [vmem:[#allocation2 + $0x140] sm:$0xff]  }
0x1bd2   :  { %v2883_v52 = vsel %vm48_vm1, %v2877_v47, -inf  ;;  %3961 = vmatpush3.bf16.msra.mxu1 %v4100_v50 }
0x1bd3   :  { %2884 = vmax.xlane.f32.xlu1 %v2883_v52  ;;  %3962 = vmatprep.subr.bf16.mxu1 %v4271_v0 }
0x1c4e   :  { %v2640_v53 = vpop.xlane.xlu1 %2639 }
0x1c4f   :  { %v2644_v55 = vsub.f32 %v2632_v24, %v2640_v53 }
0x1c50   :  { %v2643_v21 = vpop.xlane.xlu0 %2642 }
0x1c51   :  { %v2646_v57 = vmul.f32 1.442695, %v2644_v55  ;;  %v2645_v49 = vsub.f32 %v2635_v30, %v2643_v21 }
0x1c53   :  { %4202 = vpow2.f32 %v2646_v57  ;;  %v2648_v60 = vmul.f32 1.442695, %v2645_v49 }
0x1c55   :  { %4204 = vpow2.f32 %v2648_v60 }
0x1c56   :  { %v2761_v40 = vpop.xlane.xlu0 %2760 }
0x1c57   :  { %v2765_v28 = vsub.f32 %v2753_v38, %v2761_v40  ;;  %v4101_v40 = vld [vmem:[#allocation2 + $0x148] sm:$0xff]  }
0x1c58   :  { %v2764_v51 = vpop.xlane.xlu1 %2763  ;;  %3963 = vmatpush3.bf16.msra.mxu1 %v4101_v40  ;;  %v4105_v40 = vld [vmem:[#allocation2 + $0x168] sm:$0xff]  }
0x1c59   :  { %v2767_v61 = vmul.f32 1.442695, %v2765_v28  ;;  %v2766_v46 = vsub.f32 %v2756_v25, %v2764_v51  ;;  %3976 = vmatprep.subr.bf16.mxu1 %v4271_v0 }
0x1c5b   :  { %4206 = vpow2.f32 %v2767_v61  ;;  %v2769_v63 = vmul.f32 1.442695, %v2766_v46 }
0x1c5d   :  { %v4203_v2 = vpop.eup %4202  ;;  %4208 = vpow2.f32 %v2769_v63 }
0x1c5e   :  { %v2882_v3 = vpop.xlane.xlu0 %2881  ;;  %v2650_v4 = vsel %vm48_vm1, %v4203_v2, 0.0 }
0x1c5f   :  { %v4205_v5 = vpop.eup %4204  ;;  %v2886_v6 = vsub.f32 %v2874_v43, %v2882_v3  ;;  %2651 = vadd.xlane.f32.xlu0 %v2650_v4 }
0x1c60   :  { %v2653_v58 = vsel %vm48_vm1, %v4205_v5, 0.0  ;;  %v2885_v13 = vpop.xlane.xlu1 %2884 }
0x1c61   :  { %v2888_v54 = vmul.f32 1.442695, %v2886_v6  ;;  %2654 = vadd.xlane.f32.xlu1 %v2653_v58  ;;  %v2887_v1 = vsub.f32 %v2877_v47, %v2885_v13 }
0x1c63   :  { %4210 = vpow2.f32 %v2888_v54  ;;  %v2890_v14 = vmul.f32 1.442695, %v2887_v1 }
0x1c65   :  { %v4207_v7 = vpop.eup %4206  ;;  %4212 = vpow2.f32 %v2890_v14 }
0x1c66   :  { %v2771_v56 = vsel %vm48_vm1, %v4207_v7, 0.0 }
0x1c67   :  { %v4209_v59 = vpop.eup %4208  ;;  %2772 = vadd.xlane.f32.xlu0 %v2771_v56 }
0x1c68   :  { %v2774_v8 = vsel %vm48_vm1, %v4209_v59, 0.0 }
0x1c69   :  { %2775 = vadd.xlane.f32.xlu1 %v2774_v8 }
0x1c6d   :  { %v4211_v9 = vpop.eup %4210 }
0x1c6e   :  { %v2892_v12 = vsel %vm48_vm1, %v4211_v9, 0.0 }
0x1c6f   :  { %2893 = vadd.xlane.f32.xlu0 %v2892_v12  ;;  %v4213_v16 = vpop.eup %4212 }
0x1c70   :  { %v2895_v62 = vsel %vm48_vm1, %v4213_v16, 0.0 }
0x1c7a   :  { %2782 = vrot.lane.b32.xlu1 %v4787_v35, %s4277_s16 }
0x1c85   :  { %2661 = vrot.lane.b32.xlu0 %v4787_v35, %s4275_s14 }
0x1c9e   :  { %2896 = vadd.xlane.f32.xlu1 %v2895_v62 }
0x1caf   :  { %2903 = vrot.lane.b32.xlu1 %v4787_v35, %s4279_s18 }
0x1cec   :  { %v2652_v18 = vpop.xlane.xlu0 %2651 }
0x1cee   :  { %v2655_v17 = vpop.xlane.xlu1 %2654 }
0x1cef   :  { %4214 = vrcp.f32 %v2655_v17 }
0x1cf0   :  { %4216 = vrcp.f32 %v2652_v18 }
0x1cf4   :  { %v2773_v22 = vpop.xlane.xlu0 %2772 }
0x1cf6   :  { %v2776_v15 = vpop.xlane.xlu1 %2775 }
0x1cf7   :  { %4218 = vrcp.f32 %v2776_v15 }
0x1cf8   :  { %4220 = vrcp.f32 %v2773_v22 }
0x1cf9   :  { %v4215_v23 = vpop.eup %4214 }
0x1cfa   :  { %v4217_v26 = vpop.eup %4216  ;;  %v2659_v29 = vmul.f32 %v4215_v23, %v4205_v5  ;;  %v2783_v35 = vpop.permute.xlu1 %2782 }
0x1cfb   :  { %v2658_v30 = vmul.f32 %v4217_v26, %v4203_v2 }
0x1cfc   :  { %v2894_v24 = vpop.xlane.xlu0 %2893 }
0x1cfd   :  { %v2660_v33 = vpack.c.bf16 %v2659_v29, %v2658_v30  ;;  %4222 = vrcp.f32 %v2894_v24 }
0x1d00   :  { %v2662_v31 = vpop.permute.xlu0 %2661 }
0x1d01   :  { %3931 = vmatpush3.bf16.msra.mxu0 %v2662_v31  ;;  %v4219_v34 = vpop.eup %4218 }
0x1d02   :  { %3942 = vmatprep.subr.bf16.mxu0 %v4271_v0  ;;  %v4221_v37 = vpop.eup %4220  ;;  %v2780_v38 = vmul.f32 %v4219_v34, %v4209_v59 }
0x1d03   :  { %v2779_v19 = vmul.f32 %v4221_v37, %v4207_v7 }
0x1d04   :  { %3933 = vmatmul.mubr.msk.bf16.vlgmr.msra.gmra.mrb[80].mxu0 %vm48_vm1, %v2660_v33 }
0x1d05   :  { %3943 = vmatpush3.bf16.msra.mxu0 %v2783_v35  ;;  %3944 = vmatprep.mubr.msk.bf16.mxu0 %vm4272_vm0, %v4271_v0  ;;  %v2781_v39 = vpack.c.bf16 %v2780_v38, %v2779_v19 }
0x1d06   :  { %3954 = vmatprep.subr.bf16.mxu0 %v4271_v0 }
0x1d07   :  { %v4223_v11 = vpop.eup %4222 }
0x1d08   :  { %v2900_v42 = vmul.f32 %v4223_v11, %v4211_v9 }
0x1d0c   :  { %3945 = vmatmul.mubr.msk.bf16.vlgmr.msra.gmra.mrb[84].mxu0 %vm48_vm1, %v2781_v39  ;;  %v4103_v39 = vld [vmem:[#allocation2 + $0x158] sm:$0xff]  }
0x1d0d   :  { %3956 = vmatprep.mubr.msk.bf16.mxu0 %vm4272_vm0, %v4271_v0 }
0x1d2b   :  { %v2897_v25 = vpop.xlane.xlu1 %2896 }
0x1d2c   :  { %4224 = vrcp.f32 %v2897_v25 }
0x1d2f   :  { %v2904_v10 = vpop.permute.xlu1 %2903 }
0x1d30   :  { %3955 = vmatpush3.bf16.msra.mxu0 %v2904_v10 }
0x1d31   :  { %3968 = vmatprep.subr.bf16.mxu0 %v4271_v0 }
0x1d36   :  { %v4225_v41 = vpop.eup %4224 }
0x1d37   :  { %v2901_v43 = vmul.f32 %v4225_v41, %v4213_v16 }
0x1d39   :  { %v2902_v44 = vpack.c.bf16 %v2901_v43, %v2900_v42 }
0x1d3b   :  { %3957 = vmatmul.mubr.msk.bf16.vlgmr.msra.gmra.mrb[88].mxu0 %vm48_vm1, %v2902_v44 }
0x1d3c   :  { %3972 = vmatprep.mubr.msk.bf16.mxu0 %vm4272_vm0, %v4271_v0 }
0x1dd7   :  { %v2701_v32 = vpop.f32.mrb[80].mxu0 }
0x1dd8   :  { %v3934_v47 = vpop.f32.mrb[81].mxu0 }
0x1dd9   :  { %v2704_v48 = vpop.f32.mrb[82].mxu0 }
0x1dda   :  { %v4045_v52 = vpack.i.bf16 %v2704_v48, %v2701_v32  ;;  %v3935_v53 = vpop.f32.mrb[83].mxu0  ;;  %v3512_v32 = vld [vmem:[%s4963_s2 + $0xd8] ss:$0 sm:$0xff] }
0x1ddb   :  { %v3513_v53 = vld [vmem:[%s4963_s2 + $0xe0] ss:$0 sm:$0xff] }
0x1ddc   :  { %4046 = vrot.lane.b32.xlu0 %v4045_v52, %s4284_s24 }
0x1ddf   :  { %v2822_v55 = vpop.f32.mrb[84].mxu0 }
0x1de0   :  { %v3946_v21 = vpop.f32.mrb[85].mxu0 }
0x1de1   :  { %v2825_v57 = vpop.f32.mrb[86].mxu0 }
0x1de2   :  { %v4050_v49 = vpack.i.bf16 %v2825_v57, %v2822_v55  ;;  %v3947_v60 = vpop.f32.mrb[87].mxu0 }
0x1de3   :  { %v4104_v60 = vld [vmem:[#allocation2 + $0x160] sm:$0xff]  }
0x1de4   :  { %4051 = vrot.lane.b32.xlu1 %v4050_v49, %s4285_s25 }
0x1e0e   :  { %v2943_v28 = vpop.f32.mrb[88].mxu0 }
0x1e0f   :  { %v3958_v51 = vpop.f32.mrb[89].mxu0 }
0x1e10   :  { %v2946_v61 = vpop.f32.mrb[90].mxu0  ;;  %v4107_v51 = vld [vmem:[#allocation2 + $0x178] sm:$0xff]  }
0x1e11   :  { %v4055_v46 = vpack.i.bf16 %v2946_v61, %v2943_v28  ;;  %v3959_v63 = vpop.f32.mrb[91].mxu0  ;;  %v4106_v28 = vld [vmem:[#allocation2 + $0x170] sm:$0xff]   ;;  %v3514_v61 = vld [vmem:[%s4963_s2 + $0xe8] ss:$0 sm:$0xff] }
0x1e13   :  { %4056 = vrot.lane.b32.xlu0 %v4055_v46, %s4286_s26 }
0x1e4e   :  { %v4047_v2 = vpop.permute.xlu0 %4046 }
0x1e4f   :  { %v4049_v4 = vunpack.i.h.bf16 %v4047_v2  ;;  %v4048_v5 = vunpack.i.l.bf16 %v4047_v2 }
0x1e51   :  { %v2975_v7 = vsel %vm315_vm5, %v4846_v27, %v4049_v4  ;;  %v2974_v56 = vsel %vm315_vm5, %v4844_v20, %v4048_v5  ;;  %v3508_v20 = vld [vmem:[%s4963_s2 + $0xd0] ss:$0 sm:$0xff] }
0x1e56   :  { %v4052_v3 = vpop.permute.xlu1 %4051 }
0x1e57   :  { %v4054_v6 = vunpack.i.h.bf16 %v4052_v3  ;;  %v4053_v58 = vunpack.i.l.bf16 %v4052_v3 }
0x1e59   :  { %v2977_v9 = vsel %vm48_vm1, %v2975_v7, %v4054_v6  ;;  %v2976_v12 = vsel %vm48_vm1, %v2974_v56, %v4053_v58 }
0x1e85   :  { %v4057_v54 = vpop.permute.xlu0 %4056 }
0x1e86   :  { %v4059_v59 = vunpack.i.h.bf16 %v4057_v54  ;;  %v4058_v8 = vunpack.i.l.bf16 %v4057_v54 }
0x1e88   :  { %v2979_v13 = vsel %vm825_vm6, %v2977_v9, %v4059_v59  ;;  %v2978_v1 = vsel %vm825_vm6, %v2976_v12, %v4058_v8 }
0x1e89   :  { %v2980_v14 = vpack.c.bf16 %v2979_v13, %v2978_v1 }
0x1e8b   :  { %3965 = vmatmul.mubr.msk.bf16.vlgmr.msra.gmra.mrb[76].mxu1 %vm204_vm2, %v2980_v14 }
0x1e8c   :  { %3984 = vmatprep.mubr.msk.bf16.mxu1 %vm4272_vm0, %v4271_v0  ;;  %3977 = vmatpush3.bf16.msra.mxu1 %v4104_v60 }
0x1e8d   :  { %3978 = vmatprep.subr.bf16.mxu1 %v4271_v0 }
0x1e90   :  { %3979 = vmatpush3.bf16.msra.mxu1 %v4105_v40 }
0x1e91   :  { %3980 = vmatprep.subr.bf16.mxu1 %v4271_v0 }
0x1e94   :  { %3981 = vmatpush3.bf16.msra.mxu1 %v4106_v28 }
0x1e95   :  { %3982 = vmatprep.subr.bf16.mxu1 %v4271_v0 }
0x1e98   :  { %3983 = vmatpush3.bf16.msra.mxu1 %v4107_v51 }
0x1f5e   :  { %v3039_v27 = vpop.f32.mrb[76].mxu1 }
0x1f5f   :  { %v3040_v16 = vadd.f32 %v3508_v20, %v3039_v27  ;;  %v3966_v62 = vpop.f32.mrb[77].mxu1 }
0x1f60   :  { %v3042_v17 = vpop.f32.mrb[78].mxu1 }
0x1f61   :  { %v3046_v18 = vadd.f32 %v3040_v16, %v4723_v36  ;;  %v3043_v15 = vadd.f32 %v3508_v20, %v3042_v17  ;;  %v3967_v22 = vpop.f32.mrb[79].mxu1 }
0x1f62   :  { %v3518_v22 = vld [vmem:[%s4963_s2 + $0xf0] ss:$0 sm:$0xff] }
0x1f63   :  { %v3047_v23 = vadd.f32 %v3043_v15, %v4725_v45  ;;  %v3048_v24 = vsel %vm204_vm2, %v3046_v18, 0.0  ;;  %v4102_v45 = vld [vmem:[#allocation2 + $0x150] sm:$0xff]  }
0x1f64   :  { %3049 = vadd.xlane.f32.xlu1 %v3048_v24  ;;  %3969 = vmatpush3.bf16.msra.mxu0 %v4102_v45 }
0x1f65   :  { %v3051_v26 = vsel %vm204_vm2, %v3047_v23, 0.0  ;;  %3970 = vmatprep.subr.bf16.mxu0 %v4271_v0 }
0x1f66   :  { %3052 = vadd.xlane.f32.xlu0 %v3051_v26 }
0x1f68   :  { %3971 = vmatpush3.bf16.msra.mxu0 %v4103_v39 }
0x1f69   :  { %3988 = vmatprep.subr.bf16.mxu0 %v4271_v0 }
0x1ff1   :  { %v3050_v29 = vpop.xlane.xlu1 %3049 }
0x1ff2   :  { %v3054_v30 = vmul.f32 0.03125, %v3050_v29 }
0x1ff3   :  { %v3053_v31 = vpop.xlane.xlu0 %3052 }
0x1ff4   :  { %v3056_v33 = vsub.f32 %v3046_v18, %v3054_v30  ;;  %v3055_v34 = vmul.f32 0.03125, %v3053_v31 }
0x1ff6   :  { %v3057_v35 = vsub.f32 %v3047_v23, %v3055_v34  ;;  %v3058_v37 = vmul.f32 %v3056_v33, %v3056_v33 }
0x1ff8   :  { %v3060_v38 = vsel %vm204_vm2, %v3058_v37, 0.0  ;;  %v3059_v36 = vmul.f32 %v3057_v35, %v3057_v35 }
0x1ff9   :  { %3061 = vadd.xlane.f32.xlu0 %v3060_v38 }
0x1ffa   :  { %v3063_v19 = vsel %vm204_vm2, %v3059_v36, 0.0 }
0x1ffb   :  { %3064 = vadd.xlane.f32.xlu1 %v3063_v19 }
0x2086   :  { %v3062_v25 = vpop.xlane.xlu0 %3061 }
0x2087   :  { %v3066_v10 = vmul.f32 0.03125, %v3062_v25 }
0x2088   :  { %v3065_v11 = vpop.xlane.xlu1 %3064 }
0x2089   :  { %v3068_v41 = vadd.f32 1e-05, %v3066_v10  ;;  %v3067_v42 = vmul.f32 0.03125, %v3065_v11 }
0x208b   :  { %4226 = vrsqrt.f32 %v3068_v41  ;;  %v3069_v43 = vadd.f32 1e-05, %v3067_v42 }
0x208d   :  { %4228 = vrsqrt.f32 %v3069_v43 }
0x2095   :  { %v4227_v44 = vpop.eup %4226 }
0x2096   :  { %v3072_v47 = vmul.f32 %v4227_v44, %v3056_v33 }
0x2097   :  { %v4229_v48 = vpop.eup %4228 }
0x2098   :  { %v3079_v50 = vmul.f32 %v3512_v32, %v3072_v47  ;;  %v3073_v52 = vmul.f32 %v4229_v48, %v3057_v35 }
0x209a   :  { %v3080_v55 = vmul.f32 %v3512_v32, %v3073_v52  ;;  %v3086_v21 = vadd.f32 %v3513_v53, %v3079_v50 }
0x209c   :  { %v3087_v57 = vadd.f32 %v3513_v53, %v3080_v55  ;;  %v3524_v53 = vld [vmem:[%s4963_s2 + $0xf8] ss:$0 sm:$0xff] }
0x209e   :  { %v3088_v49 = vpack.c.bf16 %v3087_v57, %v3086_v21 }
0x20a0   :  { %3973 = vmatmul.mubr.msk.bf16.vlgmr.msra.gmra.mrb[92].mxu0 %vm204_vm2, %v3088_v49 }
0x20a1   :  { %3992 = vmatprep.mubr.msk.bf16.mxu0 %vm4272_vm0, %v4271_v0 }
0x2173   :  { %v3147_v46 = vpop.f32.mrb[92].mxu0 }
0x2174   :  { %v3148_v63 = vadd.f32 %v3514_v61, %v3147_v46  ;;  %v3974_v2 = vpop.f32.mrb[93].mxu0 }
0x2175   :  { %v3150_v3 = vpop.f32.mrb[94].mxu0 }
0x2176   :  { %v3156_v4 = vmul.f32 0.044715, %v3148_v63  ;;  %v3151_v5 = vadd.f32 %v3514_v61, %v3150_v3  ;;  %v3975_v6 = vpop.f32.mrb[95].mxu0  ;;  %v3154_v27 = vmul.f32 0.5, %v3148_v63 }
0x2178   :  { %v3158_v58 = vmul.f32 %v3156_v4, %v3148_v63  ;;  %v3157_v54 = vmul.f32 0.044715, %v3151_v5  ;;  %v3155_v16 = vmul.f32 0.5, %v3151_v5 }
0x217a   :  { %v3160_v7 = vmul.f32 %v3158_v58, %v3148_v63  ;;  %v3159_v56 = vmul.f32 %v3157_v54, %v3151_v5 }
0x217c   :  { %v3162_v59 = vadd.f32 %v3160_v7, %v3148_v63  ;;  %v3161_v8 = vmul.f32 %v3159_v56, %v3151_v5 }
0x217e   :  { %v3164_v9 = vmul.f32 0.7978846, %v3162_v59  ;;  %v3163_v12 = vadd.f32 %v3161_v8, %v3151_v5  ;;  %v4108_v59 = vld [vmem:[#allocation2 + $0x180] sm:$0xff]   ;;  %v4109_v8 = vld [vmem:[#allocation2 + $0x188] sm:$0xff]  }
0x217f   :  { %3989 = vmatpush3.bf16.msra.mxu0 %v4108_v59 }
0x2180   :  { %4230 = vtanh.f32 %v3164_v9  ;;  %v3165_v13 = vmul.f32 0.7978846, %v3163_v12  ;;  %3990 = vmatprep.subr.bf16.mxu0 %v4271_v0  ;;  %v3527_v0 = vld [vmem:[%s4963_s2 + $0x110] ss:$0 sm:$0xff] }
0x2182   :  { %4232 = vtanh.f32 %v3165_v13 }
0x2183   :  { %3991 = vmatpush3.bf16.msra.mxu0 %v4109_v8 }
0x218a   :  { %v4231_v1 = vpop.eup %4230 }
0x218b   :  { %v3168_v14 = vadd.f32 1.0, %v4231_v1 }
0x218c   :  { %v4233_v20 = vpop.eup %4232 }
0x218d   :  { %v3169_v62 = vadd.f32 1.0, %v4233_v20  ;;  %v3170_v17 = vmul.f32 %v3168_v14, %v3154_v27 }
0x218f   :  { %v3171_v18 = vmul.f32 %v3169_v62, %v3155_v16  ;;  %v3526_v16 = vld [vmem:[%s4963_s2 + $0x108] ss:$0 sm:$0xff] }
0x2191   :  { %v3172_v15 = vpack.c.bf16 %v3171_v18, %v3170_v17 }
0x2193   :  { %3985 = vmatmul.mubr.msk.bf16.vlgmr.msra.gmra.mrb[80].mxu1 %vm208_vm3, %v3172_v15 }
0x2266   :  { %v3247_v23 = vpop.f32.mrb[80].mxu1 }
0x2267   :  { %v3248_v24 = vadd.f32 %v3518_v22, %v3247_v23  ;;  %v3986_v26 = vpop.f32.mrb[81].mxu1 }
0x2268   :  { %v3250_v29 = vpop.f32.mrb[82].mxu1 }
0x2269   :  { %v3254_v30 = vadd.f32 %v3248_v24, %v3086_v21  ;;  %v3251_v31 = vadd.f32 %v3518_v22, %v3250_v29  ;;  %v3987_v33 = vpop.f32.mrb[83].mxu1  ;;  %v3528_v29 = vld [vmem:[%s4963_s2 + $0x118] ss:$0 sm:$0xff] }
0x226b   :  { %v3255_v34 = vadd.f32 %v3251_v31, %v3087_v57  ;;  %v3256_v35 = vsel %vm204_vm2, %v3254_v30, 0.0  ;;  %v3525_v57 = vld [vmem:[%s4963_s2 + $0x100] ss:$0 sm:$0xff] }
0x226c   :  { %3257 = vadd.xlane.f32.xlu0 %v3256_v35 }
0x226d   :  { %v3259_v37 = vsel %vm204_vm2, %v3255_v34, 0.0 }
0x226e   :  { %3260 = vadd.xlane.f32.xlu1 %v3259_v37 }
0x22f9   :  { %v3258_v38 = vpop.xlane.xlu0 %3257 }
0x22fa   :  { %v3262_v36 = vmul.f32 0.03125, %v3258_v38 }
0x22fb   :  { %v3261_v19 = vpop.xlane.xlu1 %3260 }
0x22fc   :  { %v3264_v45 = vsub.f32 %v3254_v30, %v3262_v36  ;;  %v3263_v39 = vmul.f32 0.03125, %v3261_v19 }
0x22fe   :  { %v3265_v25 = vsub.f32 %v3255_v34, %v3263_v39  ;;  %v3266_v10 = vmul.f32 %v3264_v45, %v3264_v45 }
0x2300   :  { %v3268_v11 = vsel %vm204_vm2, %v3266_v10, 0.0  ;;  %v3267_v41 = vmul.f32 %v3265_v25, %v3265_v25 }
0x2301   :  { %3269 = vadd.xlane.f32.xlu0 %v3268_v11 }
0x2302   :  { %v3271_v42 = vsel %vm204_vm2, %v3267_v41, 0.0 }
0x2303   :  { %3272 = vadd.xlane.f32.xlu1 %v3271_v42 }
0x238e   :  { %v3270_v43 = vpop.xlane.xlu0 %3269 }
0x238f   :  { %v3274_v44 = vmul.f32 0.03125, %v3270_v43 }
0x2390   :  { %v3273_v32 = vpop.xlane.xlu1 %3272 }
0x2391   :  { %v3276_v47 = vadd.f32 1e-05, %v3274_v44  ;;  %v3275_v48 = vmul.f32 0.03125, %v3273_v32 }
0x2393   :  { %4234 = vrsqrt.f32 %v3276_v47  ;;  %v3277_v50 = vadd.f32 1e-05, %v3275_v48 }
0x2395   :  { %4236 = vrsqrt.f32 %v3277_v50 }
0x239d   :  { %v4235_v52 = vpop.eup %4234 }
0x239e   :  { %v3280_v55 = vmul.f32 %v4235_v52, %v3264_v45 }
0x239f   :  { %v4237_v21 = vpop.eup %4236 }
0x23a0   :  { %v3287_v49 = vmul.f32 %v3524_v53, %v3280_v55  ;;  %v3281_v60 = vmul.f32 %v4237_v21, %v3265_v25 }
0x23a2   :  { %v3294_v40 = vadd.f32 %v3525_v57, %v3287_v49  ;;  %v3288_v28 = vmul.f32 %v3524_v53, %v3281_v60 }
0x23a4   :  { %v3296_v51 = vsel %vm204_vm2, %v3294_v40, 0.0  ;;  %v3295_v61 = vadd.f32 %v3525_v57, %v3288_v28 }
0x23a5   :  { %3297 = vadd.xlane.f32.xlu0 %v3296_v51 }
0x23a6   :  { %v3299_v46 = vsel %vm204_vm2, %v3295_v61, 0.0 }
0x23a7   :  { %3300 = vadd.xlane.f32.xlu1 %v3299_v46 }
0x2432   :  { %v3298_v63 = vpop.xlane.xlu0 %3297 }
0x2433   :  { %v3302_v2 = vmul.f32 0.03125, %v3298_v63 }
0x2434   :  { %v3301_v3 = vpop.xlane.xlu1 %3300 }
0x2435   :  { %v3304_v4 = vsub.f32 %v3294_v40, %v3302_v2  ;;  %v3303_v5 = vmul.f32 0.03125, %v3301_v3 }
0x2437   :  { %v3305_v6 = vsub.f32 %v3295_v61, %v3303_v5  ;;  %v3306_v58 = vmul.f32 %v3304_v4, %v3304_v4 }
0x2439   :  { %v3308_v54 = vsel %vm204_vm2, %v3306_v58, 0.0  ;;  %v3307_v7 = vmul.f32 %v3305_v6, %v3305_v6 }
0x243a   :  { %3309 = vadd.xlane.f32.xlu0 %v3308_v54 }
0x243b   :  { %v3311_v56 = vsel %vm204_vm2, %v3307_v7, 0.0 }
0x243c   :  { %3312 = vadd.xlane.f32.xlu1 %v3311_v56 }
0x24c7   :  { %v3310_v9 = vpop.xlane.xlu0 %3309 }
0x24c8   :  { %v3314_v12 = vmul.f32 0.03125, %v3310_v9 }
0x24c9   :  { %v3313_v13 = vpop.xlane.xlu1 %3312 }
0x24ca   :  { %v3316_v1 = vadd.f32 1e-05, %v3314_v12  ;;  %v3315_v14 = vmul.f32 0.03125, %v3313_v13 }
0x24cc   :  { %4238 = vrsqrt.f32 %v3316_v1  ;;  %v3317_v20 = vadd.f32 1e-05, %v3315_v14 }
0x24ce   :  { %4240 = vrsqrt.f32 %v3317_v20 }
0x24d6   :  { %v4239_v27 = vpop.eup %4238 }
0x24d7   :  { %v3320_v62 = vmul.f32 %v4239_v27, %v3304_v4 }
0x24d8   :  { %v4241_v17 = vpop.eup %4240 }
0x24d9   :  { %v3327_v18 = vmul.f32 %v3526_v16, %v3320_v62  ;;  %v3321_v15 = vmul.f32 %v4241_v17, %v3305_v6 }
0x24db   :  { %v3328_v22 = vmul.f32 %v3526_v16, %v3321_v15  ;;  %v3334_v23 = vadd.f32 %v3527_v0, %v3327_v18 }
0x24dd   :  { %v3335_v24 = vadd.f32 %v3527_v0, %v3328_v22 }
0x24df   :  { %v3336_v26 = vpack.c.bf16 %v3335_v24, %v3334_v23 }
0x24e1   :  { %3993 = vmatmul.mubr.msk.bf16.vlgmr.msra.gmra.mrb[96].mxu0 %vm204_vm2, %v3336_v26 }
0x25b4   :  { %v3395_v30 = vpop.f32.mrb[96].mxu0 }
0x25b5   :  { %v3396_v31 = vadd.f32 %v3528_v29, %v3395_v30  ;;  %v3994_v33 = vpop.f32.mrb[97].mxu0 }
0x25b6   :  { %v3398_v34 = vpop.f32.mrb[98].mxu0 }
0x25b7   :  { %3403 = vst.msk [vmem:[%s4964_s3] sm:$0xff] %vm3402_vm7, %v3396_v31  ;;  %v3399_v35 = vadd.f32 %v3528_v29, %v3398_v34  ;;  %v3995_v37 = vpop.f32.mrb[99].mxu0 }
0x25b9   :  { %3404 = vst.msk [vmem:[%s4964_s3 + $0x8] sm:$0xff] %vm3402_vm7, %v3399_v35 }
0x25ba   :  { %3409 = vsyncpa [#allocation3], 1 }

</bundles_post_ra>
